<compile_context>
chip_gen: v6e
topology: v6e:2x2x1
jax: 0.10.0
libtpu: 0.0.40
codegen_flags: <defaults>
</compile_context>

<pallas_src>
import jax
import jax.numpy as jnp
from jax.experimental import pallas as pl
from jax.experimental.pallas import tpu as pltpu


_TB_MAX = 64  # batch tile: big enough to amortize grid-step overhead, small enough for v7x VMEM


def _pick_tb(B):
    """Pick a batch tile: multiple of 8, <= _TB_MAX, and >= 2 grid steps when B allows (v7x)."""
    if B <= 8:
        return B
    half = -(-B // 2)                       # cdiv(B, 2) -> at least 2 grid steps
    return min(_TB_MAX, max(8, (half // 8) * 8))


# ------------------------------ XLA-side input prep (cheap, one pass) ------------------------------

def _prep_input(x_nchw):
    """[B,1,28,28] -> [B, 2(col parity), 2(row parity), 16, 48] bf16 tap slabs.

    XP[b, wp, rq, a, dw*16 + j] = xpad[b, 2a+rq, 2j+wp+dw]  (zero outside the 30x30 pad).
    """
    B = x_nchw.shape[0]
    xp = jnp.pad(x_nchw.reshape(B, 28, 28).astype(jnp.float32),
                 ((0, 0), (1, 1), (1, 1)))            # [B,30,30] zero-padded image
    xp = jnp.pad(xp, ((0, 0), (0, 2), (0, 4)))        # [B,32,34] room for parity/tap slices
    out = []
    for wp in range(2):
        per_rq = []
        for rq in range(2):
            rows = xp[:, rq::2, :]                    # [B,16,34]
            parts = [rows[:, :, wp + dw: wp + dw + 31: 2] for dw in range(3)]   # 3 x [B,16,16]
            per_rq.append(jnp.concatenate(parts, axis=-1))                       # [B,16,48]
        out.append(jnp.stack(per_rq, axis=1))         # [B,2,16,48]
    return jnp.stack(out, axis=1).astype(jnp.bfloat16)  # [B,2,2,16,48]


# ------------------------------ fused forward kernel ------------------------------

def _make_fused_kernel(tb):
    f32, bf16 = jnp.float32, jnp.bfloat16

    def kernel(xp_ref, w1b_ref, b1_ref, w2b_ref, b2_ref,
               fc1w_ref, fc1b_ref, fc2w_ref, fc2b_ref, out_ref, h1p_ref):
        # ---------------- conv1 + relu + 2x2 maxpool (banded MXU, lane-dense) ----------------
        # X[wp][rq]: [tb*16, 48] bf16 (rows = batch*row-half, lanes = tap*16 + col index)
        X = [[xp_ref[:, wp, rq].reshape(tb * 16, 48) for rq in range(2)] for wp in range(2)]

        m1 = None
        for wp in range(2):
            for hp in range(2):
                acc = None
                for dh in range(3):
                    rq, da = (hp + dh) % 2, (hp + dh) // 2
                    z = jnp.dot(X[wp][rq], w1b_ref[dh],
                                preferred_element_type=f32).reshape(tb, 16, 256)
                    z = z[:, da:da + 14, :]
                    acc = z if acc is None else acc + z
                m1 = acc if m1 is None else jnp.maximum(m1, acc)
        # lanes = (padded col s)*16 + c1; pad lanes (s=0,15) stay exactly 0 (zero weight + bias)
        h1p = jnp.maximum(m1 + b1_ref[...], 0.0)        # [tb, 14, 256] f32

        # ----- stage h1 into conv2's zero-padded, row-parity-split layout (VMEM scratch) -----
        zrow = jnp.zeros((tb, 256), f32)
        h1p_ref[:, 0, 0, :] = zrow                      # padded row r = 0
        h1p_ref[:, 1, 7, :] = zrow                      # padded row r = 15
        for r in range(1, 15):                          # padded rows 1..14 <- pooled rows 0..13
            h1p_ref[:, r % 2, r // 2, :] = h1p[:, r - 1, :]

        # ---------------- conv2 + relu + 2x2 maxpool (banded MXU, lane-dense) ----------------
        L = [h1p_ref[:, rq].reshape(tb * 8, 256).astype(bf16) for rq in range(2)]
        m2 = None
        for wp in range(2):
            for hp in range(2):
                acc = None
                for dh in range(3):
                    rq, da = (hp + dh) % 2, (hp + dh) // 2
                    z = jnp.dot(L[rq], w2b_ref[wp, dh],
                                preferred_element_type=f32).reshape(tb, 8, 224)
                    z = z[:, da:da + 7, :]
                    acc = z if acc is None else acc + z
                m2 = acc if m2 is None else jnp.maximum(m2, acc)
        h2 = jnp.maximum(m2 + b2_ref[...], 0.0)         # [tb, 7, 224], lanes = j2*32 + c2

        # ---------------- fc1 + relu (+ dropout identity) + fc2 ----------------
        # TODO(synk): Dropout(p=0.3) is the identity in inference-mode forward; training-mode
        # dropout (pltpu.prng_seed/prng_random_bits mask + 1/(1-p) scaling) is not implemented.
        a = None
        for i2 in range(7):
            t = jnp.dot(h2[:, i2, :].astype(bf16), fc1w_ref[i2], preferred_element_type=f32)
            a = t if a is None else a + t
        h = jnp.maximum(a + fc1b_ref[...], 0.0)         # [tb, 128] f32
        logits = jnp.dot(h.astype(bf16), fc2w_ref[...], preferred_element_type=f32)
        out_ref[...] = (logits + fc2b_ref[...]).astype(out_ref.dtype)

    return kernel


def cnn_forward(x_nchw, kp):
    B = x_nchw.shape[0]
    xp = _prep_input(x_nchw)                            # [B,2,2,16,48] bf16
    tb = _pick_tb(B)
    nb = pl.cdiv(B, tb)
    Bp = nb * tb
    if Bp != B:
        xp = jnp.pad(xp, ((0, Bp - B), (0, 0), (0, 0), (0, 0), (0, 0)))

    wbytes = sum(int(v.size) * v.dtype.itemsize
                 for v in (kp["w1b"], kp["w2b"], kp["fc1w"], kp["fc2w"]))
    cost = pl.CostEstimate(
        flops=int(Bp) * (2 * 12 * 16 * 48 * 256 + 2 * 12 * 8 * 256 * 224
                         + 2 * 7 * 224 * 128 + 2 * 128 * 128),
        transcendentals=0,
        bytes_accessed=int(xp.size) * 2 + int(Bp) * 128 * 4 + wbytes,
    )

    out = pl.pallas_call(
        _make_fused_kernel(tb),
        out_shape=jax.ShapeDtypeStruct((Bp, 128), jnp.float32),
        grid=(nb,),
        in_specs=[
            pl.BlockSpec((tb, 2, 2, 16, 48), lambda i: (i, 0, 0, 0, 0)),
            pl.BlockSpec((3, 48, 256), lambda i: (0, 0, 0)),
            pl.BlockSpec((1, 256), lambda i: (0, 0)),
            pl.BlockSpec((2, 3, 256, 224), lambda i: (0, 0, 0, 0)),
            pl.BlockSpec((1, 224), lambda i: (0, 0)),
            pl.BlockSpec((7, 224, 128), lambda i: (0, 0, 0)),
            pl.BlockSpec((1, 128), lambda i: (0, 0)),
            pl.BlockSpec((128, 128), lambda i: (0, 0)),
            pl.BlockSpec((1, 128), lambda i: (0, 0)),
        ],
        out_specs=pl.BlockSpec((tb, 128), lambda i: (i, 0)),
        scratch_shapes=[pltpu.VMEM((tb, 2, 8, 256), jnp.float32)],
        compiler_params=pltpu.CompilerParams(
            dimension_semantics=("parallel",),
            vmem_limit_bytes=48 * 1024 * 1024,
        ),
        cost_estimate=cost,
    )(xp, kp["w1b"], kp["b1v"], kp["w2b"], kp["b2v"],
      kp["fc1w"], kp["fc1b"], kp["fc2w"], kp["fc2b"])
    return out[:B, :10]


# ------------------------------ params ------------------------------

def init_params(key):
    """PyTorch-layout parameters (same as the nn.Module state)."""
    ks = jax.random.split(key, 8)
    s = 0.05
    return {
        "conv1_w": s * jax.random.normal(ks[0], (16, 1, 3, 3), jnp.float32),
        "conv1_b": s * jax.random.normal(ks[1], (16,), jnp.float32),
        "conv2_w": s * jax.random.normal(ks[2], (32, 16, 3, 3), jnp.float32),
        "conv2_b": s * jax.random.normal(ks[3], (32,), jnp.float32),
        "fc1_w":   s * jax.random.normal(ks[4], (128, 32 * 7 * 7), jnp.float32),
        "fc1_b":   s * jax.random.normal(ks[5], (128,), jnp.float32),
        "fc2_w":   s * jax.random.normal(ks[6], (10, 128), jnp.float32),
        "fc2_b":   s * jax.random.normal(ks[7], (10,), jnp.float32),
    }


def prepare_params(p):
    """One-time conversion to kernel-friendly layouts (done once, outside the jitted forward)."""
    f32, bf16 = jnp.float32, jnp.bfloat16
    # conv1 banded weights: [3(dh), 48(dw*16+k), 256((k+1)*16+c)]
    w1t = jnp.transpose(p["conv1_w"][:, 0], (1, 2, 0))                    # [dh, dw, c]
    k = jnp.arange(16)
    shift = (((k[:, None] + 1) == k[None, :]) & (k[:, None] < 14)).astype(f32)   # [k, kout]
    w1b = (shift[None, None, :, :, None] * w1t[:, :, None, None, :]).reshape(3, 48, 256)
    ok = ((k >= 1) & (k <= 14)).astype(f32)
    b1v = (ok[:, None] * p["conv1_b"][None, :]).reshape(1, 256).astype(f32)

    # conv2 banded weights: [2(wp2), 3(dh), 256(s*16+c1), 224(j2*32+c2)]
    w2t = jnp.transpose(p["conv2_w"], (2, 3, 1, 0))                       # [dh, dw, c1, c2]
    s_ = jnp.arange(16)[None, :, None, None]
    j_ = jnp.arange(7)[None, None, :, None]
    p_ = jnp.arange(2)[:, None, None, None]
    d_ = jnp.arange(3)[None, None, None, :]
    sel = (s_ == 2 * j_ + p_ + d_).astype(f32)                            # [2,16,7,3]
    w2b = jnp.einsum("psjd,hdac->phsajc", sel, w2t).reshape(2, 3, 256, 224)
    b2v = jnp.tile(p["conv2_b"], 7).reshape(1, 224).astype(f32)

    # fc1: fold PyTorch's NCHW flatten (c*49 + i*7 + j) into the weight; the kernel consumes
    # h2 as [i2, j2*32 + c2].
    fc1 = jnp.transpose(p["fc1_w"].reshape(128, 32, 7, 7), (2, 3, 1, 0)).reshape(7, 224, 128)
    fc1b = p["fc1_b"].reshape(1, 128).astype(f32)

    # fc2: transpose + zero-pad N 10 -> 128 for a lane-dense store (sliced back in XLA).
    fc2 = jnp.zeros((128, 128), f32).at[:, :10].set(p["fc2_w"].T)
    fc2b = jnp.zeros((1, 128), f32).at[0, :10].set(p["fc2_b"])

    return {"w1b": w1b.astype(bf16), "b1v": b1v,
            "w2b": w2b.astype(bf16), "b2v": b2v,
            "fc1w": fc1.astype(bf16), "fc1b": fc1b,
            "fc2w": fc2.astype(bf16), "fc2b": fc2b}


# ------------------------------ pure-JAX reference (f32, PyTorch layout) ------------------------------

def cnn_reference(x_nchw, p):
    x = x_nchw.astype(jnp.float32)

    def conv3x3(xin, w, b):                                        # xin: [B,C,H,W]
        B, C, H, W = xin.shape
        xp = jnp.pad(xin, ((0, 0), (0, 0), (1, 1), (1, 1)))
        out = jnp.zeros((B, w.shape[0], H, W), jnp.float32)
        for dh in range(3):
            for dw in range(3):
                win = xp[:, :, dh:dh + H, dw:dw + W]
                out = out + jnp.einsum('bchw,oc->bohw', win, w[:, :, dh, dw])
        return out + b[None, :, None, None]

    def pool2(t):                                                  # [B,C,H,W]
        B, C, H, W = t.shape
        return jnp.max(t.reshape(B, C, H // 2, 2, W // 2, 2), axis=(3, 5))

    h = pool2(jax.nn.relu(conv3x3(x, p["conv1_w"], p["conv1_b"])))
    h = pool2(jax.nn.relu(conv3x3(h, p["conv2_w"], p["conv2_b"])))
    h = h.reshape(x.shape[0], 32 * 7 * 7)                          # NCHW flatten (PyTorch view)
    h = jax.nn.relu(h @ p["fc1_w"].T + p["fc1_b"])
    return h @ p["fc2_w"].T + p["fc2_b"]


# ------------------------------ test ------------------------------

if __name__ == "__main__":
    key = jax.random.PRNGKey(0)
    k_x, k_p = jax.random.split(key)
    params = init_params(k_p)            # PyTorch layout
    kparams = prepare_params(params)     # kernel layout (once, outside jit)

    # Spatial size 28 is required by fc1 (32*7*7 after two 2x2 pools); small batch = 2.
    x = jax.random.normal(k_x, (2, 1, 28, 28), jnp.float32)

    fwd = jax.jit(cnn_forward)
    out = fwd(x, kparams)
    jax.block_until_ready(out)

    assert out.shape == (2, 10) and out.dtype == jnp.float32
    assert bool(jnp.all(jnp.isfinite(out)))

    ref = cnn_reference(x, params)
    max_err = float(jnp.max(jnp.abs(out - ref)))
    assert jnp.allclose(out, ref, atol=3e-2, rtol=1e-1), (
        "mismatch vs reference, max abs diff = %s" % max_err)

    print("KERNEL_OK")
</pallas_src>

<mosaic_0001>
module attributes {stable_mosaic.version = 11 : i64} {
  func.func @kernel(%arg0: i32, %arg1: memref<2x2x2x16x48xbf16, #tpu.memory_space<vmem>>, %arg2: memref<3x48x256xbf16, #tpu.memory_space<vmem>>, %arg3: memref<1x256xf32, #tpu.memory_space<vmem>>, %arg4: memref<2x3x256x224xbf16, #tpu.memory_space<vmem>>, %arg5: memref<1x224xf32, #tpu.memory_space<vmem>>, %arg6: memref<7x224x128xbf16, #tpu.memory_space<vmem>>, %arg7: memref<1x128xf32, #tpu.memory_space<vmem>>, %arg8: memref<128x128xbf16, #tpu.memory_space<vmem>>, %arg9: memref<1x128xf32, #tpu.memory_space<vmem>>, %arg10: memref<2x128xf32, #tpu.memory_space<vmem>>, %arg11: memref<2x2x8x256xf32, #tpu.memory_space<vmem>>) attributes {dimension_semantics = [#tpu.dimension_semantics<parallel>], iteration_bounds = array<i64: 1>, scalar_prefetch = 0 : i64, scratch_operands = 1 : i64, tpu.core_type = #tpu.core_type<tc>, window_params = [{transform_indices = @transform_0, window_bounds = array<i64: 2, 2, 2, 16, 48>}, {pipeline_mode = #tpu.pipeline_mode<synchronous>, transform_indices = @transform_1, window_bounds = array<i64: 3, 48, 256>}, {pipeline_mode = #tpu.pipeline_mode<synchronous>, transform_indices = @transform_2, window_bounds = array<i64: 1, 256>}, {pipeline_mode = #tpu.pipeline_mode<synchronous>, transform_indices = @transform_3, window_bounds = array<i64: 2, 3, 256, 224>}, {pipeline_mode = #tpu.pipeline_mode<synchronous>, transform_indices = @transform_4, window_bounds = array<i64: 1, 224>}, {pipeline_mode = #tpu.pipeline_mode<synchronous>, transform_indices = @transform_5, window_bounds = array<i64: 7, 224, 128>}, {pipeline_mode = #tpu.pipeline_mode<synchronous>, transform_indices = @transform_6, window_bounds = array<i64: 1, 128>}, {pipeline_mode = #tpu.pipeline_mode<synchronous>, transform_indices = @transform_7, window_bounds = array<i64: 128, 128>}, {pipeline_mode = #tpu.pipeline_mode<synchronous>, transform_indices = @transform_8, window_bounds = array<i64: 1, 128>}, {transform_indices = @transform_9, window_bounds = array<i64: 2, 128>}]} {
    %c0 = arith.constant 0 : index
    %c0_0 = arith.constant 0 : index
    %c0_1 = arith.constant 0 : index
    %c0_2 = arith.constant 0 : index
    %c0_3 = arith.constant 0 : index
    %0 = vector.load %arg1[%c0, %c0_0, %c0_1, %c0_2, %c0_3] : memref<2x2x2x16x48xbf16, #tpu.memory_space<vmem>>, vector<2x1x1x16x48xbf16>
    %1 = vector.shape_cast %0 : vector<2x1x1x16x48xbf16> to vector<2x16x48xbf16>
    %2 = vector.shape_cast %1 : vector<2x16x48xbf16> to vector<32x48xbf16>
    %c0_4 = arith.constant 0 : index
    %c0_5 = arith.constant 0 : index
    %c1 = arith.constant 1 : index
    %c0_6 = arith.constant 0 : index
    %c0_7 = arith.constant 0 : index
    %3 = vector.load %arg1[%c0_4, %c0_5, %c1, %c0_6, %c0_7] : memref<2x2x2x16x48xbf16, #tpu.memory_space<vmem>>, vector<2x1x1x16x48xbf16>
    %4 = vector.shape_cast %3 : vector<2x1x1x16x48xbf16> to vector<2x16x48xbf16>
    %5 = vector.shape_cast %4 : vector<2x16x48xbf16> to vector<32x48xbf16>
    %c0_8 = arith.constant 0 : index
    %c1_9 = arith.constant 1 : index
    %c0_10 = arith.constant 0 : index
    %c0_11 = arith.constant 0 : index
    %c0_12 = arith.constant 0 : index
    %6 = vector.load %arg1[%c0_8, %c1_9, %c0_10, %c0_11, %c0_12] : memref<2x2x2x16x48xbf16, #tpu.memory_space<vmem>>, vector<2x1x1x16x48xbf16>
    %7 = vector.shape_cast %6 : vector<2x1x1x16x48xbf16> to vector<2x16x48xbf16>
    %8 = vector.shape_cast %7 : vector<2x16x48xbf16> to vector<32x48xbf16>
    %c0_13 = arith.constant 0 : index
    %c1_14 = arith.constant 1 : index
    %c1_15 = arith.constant 1 : index
    %c0_16 = arith.constant 0 : index
    %c0_17 = arith.constant 0 : index
    %9 = vector.load %arg1[%c0_13, %c1_14, %c1_15, %c0_16, %c0_17] : memref<2x2x2x16x48xbf16, #tpu.memory_space<vmem>>, vector<2x1x1x16x48xbf16>
    %10 = vector.shape_cast %9 : vector<2x1x1x16x48xbf16> to vector<2x16x48xbf16>
    %11 = vector.shape_cast %10 : vector<2x16x48xbf16> to vector<32x48xbf16>
    %c0_18 = arith.constant 0 : index
    %c0_19 = arith.constant 0 : index
    %c0_20 = arith.constant 0 : index
    %12 = vector.load %arg2[%c0_18, %c0_19, %c0_20] : memref<3x48x256xbf16, #tpu.memory_space<vmem>>, vector<1x48x256xbf16>
    %13 = vector.shape_cast %12 : vector<1x48x256xbf16> to vector<48x256xbf16>
    %cst = arith.constant dense<0.000000e+00> : vector<32x256xf32>
    %14 = tpu.matmul %2, %13, %cst {dimension_numbers = #tpu.dot_dimension_numbers<[1], [0], [0], [1], [0, 0, 1, 1], [], []>} : vector<32x48xbf16>, vector<48x256xbf16>, vector<32x256xf32> -> vector<32x256xf32>
    %15 = vector.shape_cast %14 : vector<32x256xf32> to vector<2x16x256xf32>
    %16 = vector.extract_strided_slice %15 {offsets = [0, 0, 0], sizes = [2, 14, 256], strides = [1, 1, 1]} : vector<2x16x256xf32> to vector<2x14x256xf32>
    %c1_21 = arith.constant 1 : index
    %c0_22 = arith.constant 0 : index
    %c0_23 = arith.constant 0 : index
    %17 = vector.load %arg2[%c1_21, %c0_22, %c0_23] : memref<3x48x256xbf16, #tpu.memory_space<vmem>>, vector<1x48x256xbf16>
    %18 = vector.shape_cast %17 : vector<1x48x256xbf16> to vector<48x256xbf16>
    %cst_24 = arith.constant dense<0.000000e+00> : vector<32x256xf32>
    %19 = tpu.matmul %5, %18, %cst_24 {dimension_numbers = #tpu.dot_dimension_numbers<[1], [0], [0], [1], [0, 0, 1, 1], [], []>} : vector<32x48xbf16>, vector<48x256xbf16>, vector<32x256xf32> -> vector<32x256xf32>
    %20 = vector.shape_cast %19 : vector<32x256xf32> to vector<2x16x256xf32>
    %21 = vector.extract_strided_slice %20 {offsets = [0, 0, 0], sizes = [2, 14, 256], strides = [1, 1, 1]} : vector<2x16x256xf32> to vector<2x14x256xf32>
    %22 = arith.addf %16, %21 : vector<2x14x256xf32>
    %c2 = arith.constant 2 : index
    %c0_25 = arith.constant 0 : index
    %c0_26 = arith.constant 0 : index
    %23 = vector.load %arg2[%c2, %c0_25, %c0_26] : memref<3x48x256xbf16, #tpu.memory_space<vmem>>, vector<1x48x256xbf16>
    %24 = vector.shape_cast %23 : vector<1x48x256xbf16> to vector<48x256xbf16>
    %cst_27 = arith.constant dense<0.000000e+00> : vector<32x256xf32>
    %25 = tpu.matmul %2, %24, %cst_27 {dimension_numbers = #tpu.dot_dimension_numbers<[1], [0], [0], [1], [0, 0, 1, 1], [], []>} : vector<32x48xbf16>, vector<48x256xbf16>, vector<32x256xf32> -> vector<32x256xf32>
    %26 = vector.shape_cast %25 : vector<32x256xf32> to vector<2x16x256xf32>
    %27 = vector.extract_strided_slice %26 {offsets = [0, 1, 0], sizes = [2, 14, 256], strides = [1, 1, 1]} : vector<2x16x256xf32> to vector<2x14x256xf32>
    %28 = arith.addf %22, %27 : vector<2x14x256xf32>
    %c0_28 = arith.constant 0 : index
    %c0_29 = arith.constant 0 : index
    %c0_30 = arith.constant 0 : index
    %29 = vector.load %arg2[%c0_28, %c0_29, %c0_30] : memref<3x48x256xbf16, #tpu.memory_space<vmem>>, vector<1x48x256xbf16>
    %30 = vector.shape_cast %29 : vector<1x48x256xbf16> to vector<48x256xbf16>
    %cst_31 = arith.constant dense<0.000000e+00> : vector<32x256xf32>
    %31 = tpu.matmul %5, %30, %cst_31 {dimension_numbers = #tpu.dot_dimension_numbers<[1], [0], [0], [1], [0, 0, 1, 1], [], []>} : vector<32x48xbf16>, vector<48x256xbf16>, vector<32x256xf32> -> vector<32x256xf32>
    %32 = vector.shape_cast %31 : vector<32x256xf32> to vector<2x16x256xf32>
    %33 = vector.extract_strided_slice %32 {offsets = [0, 0, 0], sizes = [2, 14, 256], strides = [1, 1, 1]} : vector<2x16x256xf32> to vector<2x14x256xf32>
    %c1_32 = arith.constant 1 : index
    %c0_33 = arith.constant 0 : index
    %c0_34 = arith.constant 0 : index
    %34 = vector.load %arg2[%c1_32, %c0_33, %c0_34] : memref<3x48x256xbf16, #tpu.memory_space<vmem>>, vector<1x48x256xbf16>
    %35 = vector.shape_cast %34 : vector<1x48x256xbf16> to vector<48x256xbf16>
    %cst_35 = arith.constant dense<0.000000e+00> : vector<32x256xf32>
    %36 = tpu.matmul %2, %35, %cst_35 {dimension_numbers = #tpu.dot_dimension_numbers<[1], [0], [0], [1], [0, 0, 1, 1], [], []>} : vector<32x48xbf16>, vector<48x256xbf16>, vector<32x256xf32> -> vector<32x256xf32>
    %37 = vector.shape_cast %36 : vector<32x256xf32> to vector<2x16x256xf32>
    %38 = vector.extract_strided_slice %37 {offsets = [0, 1, 0], sizes = [2, 14, 256], strides = [1, 1, 1]} : vector<2x16x256xf32> to vector<2x14x256xf32>
    %39 = arith.addf %33, %38 : vector<2x14x256xf32>
    %c2_36 = arith.constant 2 : index
    %c0_37 = arith.constant 0 : index
    %c0_38 = arith.constant 0 : index
    %40 = vector.load %arg2[%c2_36, %c0_37, %c0_38] : memref<3x48x256xbf16, #tpu.memory_space<vmem>>, vector<1x48x256xbf16>
    %41 = vector.shape_cast %40 : vector<1x48x256xbf16> to vector<48x256xbf16>
    %cst_39 = arith.constant dense<0.000000e+00> : vector<32x256xf32>
    %42 = tpu.matmul %5, %41, %cst_39 {dimension_numbers = #tpu.dot_dimension_numbers<[1], [0], [0], [1], [0, 0, 1, 1], [], []>} : vector<32x48xbf16>, vector<48x256xbf16>, vector<32x256xf32> -> vector<32x256xf32>
    %43 = vector.shape_cast %42 : vector<32x256xf32> to vector<2x16x256xf32>
    %44 = vector.extract_strided_slice %43 {offsets = [0, 1, 0], sizes = [2, 14, 256], strides = [1, 1, 1]} : vector<2x16x256xf32> to vector<2x14x256xf32>
    %45 = arith.addf %39, %44 : vector<2x14x256xf32>
    %46 = arith.maximumf %28, %45 : vector<2x14x256xf32>
    %c0_40 = arith.constant 0 : index
    %c0_41 = arith.constant 0 : index
    %c0_42 = arith.constant 0 : index
    %47 = vector.load %arg2[%c0_40, %c0_41, %c0_42] : memref<3x48x256xbf16, #tpu.memory_space<vmem>>, vector<1x48x256xbf16>
    %48 = vector.shape_cast %47 : vector<1x48x256xbf16> to vector<48x256xbf16>
    %cst_43 = arith.constant dense<0.000000e+00> : vector<32x256xf32>
    %49 = tpu.matmul %8, %48, %cst_43 {dimension_numbers = #tpu.dot_dimension_numbers<[1], [0], [0], [1], [0, 0, 1, 1], [], []>} : vector<32x48xbf16>, vector<48x256xbf16>, vector<32x256xf32> -> vector<32x256xf32>
    %50 = vector.shape_cast %49 : vector<32x256xf32> to vector<2x16x256xf32>
    %51 = vector.extract_strided_slice %50 {offsets = [0, 0, 0], sizes = [2, 14, 256], strides = [1, 1, 1]} : vector<2x16x256xf32> to vector<2x14x256xf32>
    %c1_44 = arith.constant 1 : index
    %c0_45 = arith.constant 0 : index
    %c0_46 = arith.constant 0 : index
    %52 = vector.load %arg2[%c1_44, %c0_45, %c0_46] : memref<3x48x256xbf16, #tpu.memory_space<vmem>>, vector<1x48x256xbf16>
    %53 = vector.shape_cast %52 : vector<1x48x256xbf16> to vector<48x256xbf16>
    %cst_47 = arith.constant dense<0.000000e+00> : vector<32x256xf32>
    %54 = tpu.matmul %11, %53, %cst_47 {dimension_numbers = #tpu.dot_dimension_numbers<[1], [0], [0], [1], [0, 0, 1, 1], [], []>} : vector<32x48xbf16>, vector<48x256xbf16>, vector<32x256xf32> -> vector<32x256xf32>
    %55 = vector.shape_cast %54 : vector<32x256xf32> to vector<2x16x256xf32>
    %56 = vector.extract_strided_slice %55 {offsets = [0, 0, 0], sizes = [2, 14, 256], strides = [1, 1, 1]} : vector<2x16x256xf32> to vector<2x14x256xf32>
    %57 = arith.addf %51, %56 : vector<2x14x256xf32>
    %c2_48 = arith.constant 2 : index
    %c0_49 = arith.constant 0 : index
    %c0_50 = arith.constant 0 : index
    %58 = vector.load %arg2[%c2_48, %c0_49, %c0_50] : memref<3x48x256xbf16, #tpu.memory_space<vmem>>, vector<1x48x256xbf16>
    %59 = vector.shape_cast %58 : vector<1x48x256xbf16> to vector<48x256xbf16>
    %cst_51 = arith.constant dense<0.000000e+00> : vector<32x256xf32>
    %60 = tpu.matmul %8, %59, %cst_51 {dimension_numbers = #tpu.dot_dimension_numbers<[1], [0], [0], [1], [0, 0, 1, 1], [], []>} : vector<32x48xbf16>, vector<48x256xbf16>, vector<32x256xf32> -> vector<32x256xf32>
    %61 = vector.shape_cast %60 : vector<32x256xf32> to vector<2x16x256xf32>
    %62 = vector.extract_strided_slice %61 {offsets = [0, 1, 0], sizes = [2, 14, 256], strides = [1, 1, 1]} : vector<2x16x256xf32> to vector<2x14x256xf32>
    %63 = arith.addf %57, %62 : vector<2x14x256xf32>
    %64 = arith.maximumf %46, %63 : vector<2x14x256xf32>
    %c0_52 = arith.constant 0 : index
    %c0_53 = arith.constant 0 : index
    %c0_54 = arith.constant 0 : index
    %65 = vector.load %arg2[%c0_52, %c0_53, %c0_54] : memref<3x48x256xbf16, #tpu.memory_space<vmem>>, vector<1x48x256xbf16>
    %66 = vector.shape_cast %65 : vector<1x48x256xbf16> to vector<48x256xbf16>
    %cst_55 = arith.constant dense<0.000000e+00> : vector<32x256xf32>
    %67 = tpu.matmul %11, %66, %cst_55 {dimension_numbers = #tpu.dot_dimension_numbers<[1], [0], [0], [1], [0, 0, 1, 1], [], []>} : vector<32x48xbf16>, vector<48x256xbf16>, vector<32x256xf32> -> vector<32x256xf32>
    %68 = vector.shape_cast %67 : vector<32x256xf32> to vector<2x16x256xf32>
    %69 = vector.extract_strided_slice %68 {offsets = [0, 0, 0], sizes = [2, 14, 256], strides = [1, 1, 1]} : vector<2x16x256xf32> to vector<2x14x256xf32>
    %c1_56 = arith.constant 1 : index
    %c0_57 = arith.constant 0 : index
    %c0_58 = arith.constant 0 : index
    %70 = vector.load %arg2[%c1_56, %c0_57, %c0_58] : memref<3x48x256xbf16, #tpu.memory_space<vmem>>, vector<1x48x256xbf16>
    %71 = vector.shape_cast %70 : vector<1x48x256xbf16> to vector<48x256xbf16>
    %cst_59 = arith.constant dense<0.000000e+00> : vector<32x256xf32>
    %72 = tpu.matmul %8, %71, %cst_59 {dimension_numbers = #tpu.dot_dimension_numbers<[1], [0], [0], [1], [0, 0, 1, 1], [], []>} : vector<32x48xbf16>, vector<48x256xbf16>, vector<32x256xf32> -> vector<32x256xf32>
    %73 = vector.shape_cast %72 : vector<32x256xf32> to vector<2x16x256xf32>
    %74 = vector.extract_strided_slice %73 {offsets = [0, 1, 0], sizes = [2, 14, 256], strides = [1, 1, 1]} : vector<2x16x256xf32> to vector<2x14x256xf32>
    %75 = arith.addf %69, %74 : vector<2x14x256xf32>
    %c2_60 = arith.constant 2 : index
    %c0_61 = arith.constant 0 : index
    %c0_62 = arith.constant 0 : index
    %76 = vector.load %arg2[%c2_60, %c0_61, %c0_62] : memref<3x48x256xbf16, #tpu.memory_space<vmem>>, vector<1x48x256xbf16>
    %77 = vector.shape_cast %76 : vector<1x48x256xbf16> to vector<48x256xbf16>
    %cst_63 = arith.constant dense<0.000000e+00> : vector<32x256xf32>
    %78 = tpu.matmul %11, %77, %cst_63 {dimension_numbers = #tpu.dot_dimension_numbers<[1], [0], [0], [1], [0, 0, 1, 1], [], []>} : vector<32x48xbf16>, vector<48x256xbf16>, vector<32x256xf32> -> vector<32x256xf32>
    %79 = vector.shape_cast %78 : vector<32x256xf32> to vector<2x16x256xf32>
    %80 = vector.extract_strided_slice %79 {offsets = [0, 1, 0], sizes = [2, 14, 256], strides = [1, 1, 1]} : vector<2x16x256xf32> to vector<2x14x256xf32>
    %81 = arith.addf %75, %80 : vector<2x14x256xf32>
    %82 = arith.maximumf %64, %81 : vector<2x14x256xf32>
    %c0_64 = arith.constant 0 : index
    %c0_65 = arith.constant 0 : index
    %83 = vector.load %arg3[%c0_64, %c0_65] : memref<1x256xf32, #tpu.memory_space<vmem>>, vector<1x256xf32>
    %84 = vector.shape_cast %83 : vector<1x256xf32> to vector<1x1x256xf32>
    %85 = vector.broadcast %84 : vector<1x1x256xf32> to vector<2x14x256xf32>
    %86 = arith.addf %82, %85 : vector<2x14x256xf32>
    %cst_66 = arith.constant 0.000000e+00 : f32
    %87 = vector.broadcast %cst_66 : f32 to vector<2x14x256xf32>
    %88 = arith.maximumf %86, %87 : vector<2x14x256xf32>
    %cst_67 = arith.constant 0.000000e+00 : f32
    %89 = vector.broadcast %cst_67 : f32 to vector<2x256xf32>
    %c0_68 = arith.constant 0 : index
    %c0_69 = arith.constant 0 : index
    %c0_70 = arith.constant 0 : index
    %c0_71 = arith.constant 0 : index
    %90 = vector.load %arg11[%c0_68, %c0_69, %c0_70, %c0_71] : memref<2x2x8x256xf32, #tpu.memory_space<vmem>>, vector<2x1x1x256xf32>
    %91 = vector.shape_cast %90 : vector<2x1x1x256xf32> to vector<2x256xf32>
    %92 = vector.shape_cast %89 : vector<2x256xf32> to vector<2x1x1x256xf32>
    tpu.vector_store %arg11[%c0_68, %c0_69, %c0_70, %c0_71], %92 {strides = array<i32>} : memref<2x2x8x256xf32, #tpu.memory_space<vmem>>, vector<2x1x1x256xf32>,
    %c0_72 = arith.constant 0 : index
    %c1_73 = arith.constant 1 : index
    %c7 = arith.constant 7 : index
    %c0_74 = arith.constant 0 : index
    %93 = vector.load %arg11[%c0_72, %c1_73, %c7, %c0_74] : memref<2x2x8x256xf32, #tpu.memory_space<vmem>>, vector<2x1x1x256xf32>
    %94 = vector.shape_cast %93 : vector<2x1x1x256xf32> to vector<2x256xf32>
    %95 = vector.shape_cast %89 : vector<2x256xf32> to vector<2x1x1x256xf32>
    tpu.vector_store %arg11[%c0_72, %c1_73, %c7, %c0_74], %95 {strides = array<i32>} : memref<2x2x8x256xf32, #tpu.memory_space<vmem>>, vector<2x1x1x256xf32>,
    %96 = vector.extract_strided_slice %88 {offsets = [0, 0, 0], sizes = [2, 1, 256], strides = [1, 1, 1]} : vector<2x14x256xf32> to vector<2x1x256xf32>
    %97 = vector.shape_cast %96 : vector<2x1x256xf32> to vector<2x256xf32>
    %c0_75 = arith.constant 0 : index
    %c1_76 = arith.constant 1 : index
    %c0_77 = arith.constant 0 : index
    %c0_78 = arith.constant 0 : index
    %98 = vector.load %arg11[%c0_75, %c1_76, %c0_77, %c0_78] : memref<2x2x8x256xf32, #tpu.memory_space<vmem>>, vector<2x1x1x256xf32>
    %99 = vector.shape_cast %98 : vector<2x1x1x256xf32> to vector<2x256xf32>
    %100 = vector.shape_cast %97 : vector<2x256xf32> to vector<2x1x1x256xf32>
    tpu.vector_store %arg11[%c0_75, %c1_76, %c0_77, %c0_78], %100 {strides = array<i32>} : memref<2x2x8x256xf32, #tpu.memory_space<vmem>>, vector<2x1x1x256xf32>,
    %101 = vector.extract_strided_slice %88 {offsets = [0, 1, 0], sizes = [2, 1, 256], strides = [1, 1, 1]} : vector<2x14x256xf32> to vector<2x1x256xf32>
    %102 = vector.shape_cast %101 : vector<2x1x256xf32> to vector<2x256xf32>
    %c0_79 = arith.constant 0 : index
    %c0_80 = arith.constant 0 : index
    %c1_81 = arith.constant 1 : index
    %c0_82 = arith.constant 0 : index
    %103 = vector.load %arg11[%c0_79, %c0_80, %c1_81, %c0_82] : memref<2x2x8x256xf32, #tpu.memory_space<vmem>>, vector<2x1x1x256xf32>
    %104 = vector.shape_cast %103 : vector<2x1x1x256xf32> to vector<2x256xf32>
    %105 = vector.shape_cast %102 : vector<2x256xf32> to vector<2x1x1x256xf32>
    tpu.vector_store %arg11[%c0_79, %c0_80, %c1_81, %c0_82], %105 {strides = array<i32>} : memref<2x2x8x256xf32, #tpu.memory_space<vmem>>, vector<2x1x1x256xf32>,
    %106 = vector.extract_strided_slice %88 {offsets = [0, 2, 0], sizes = [2, 1, 256], strides = [1, 1, 1]} : vector<2x14x256xf32> to vector<2x1x256xf32>
    %107 = vector.shape_cast %106 : vector<2x1x256xf32> to vector<2x256xf32>
    %c0_83 = arith.constant 0 : index
    %c1_84 = arith.constant 1 : index
    %c1_85 = arith.constant 1 : index
    %c0_86 = arith.constant 0 : index
    %108 = vector.load %arg11[%c0_83, %c1_84, %c1_85, %c0_86] : memref<2x2x8x256xf32, #tpu.memory_space<vmem>>, vector<2x1x1x256xf32>
    %109 = vector.shape_cast %108 : vector<2x1x1x256xf32> to vector<2x256xf32>
    %110 = vector.shape_cast %107 : vector<2x256xf32> to vector<2x1x1x256xf32>
    tpu.vector_store %arg11[%c0_83, %c1_84, %c1_85, %c0_86], %110 {strides = array<i32>} : memref<2x2x8x256xf32, #tpu.memory_space<vmem>>, vector<2x1x1x256xf32>,
    %111 = vector.extract_strided_slice %88 {offsets = [0, 3, 0], sizes = [2, 1, 256], strides = [1, 1, 1]} : vector<2x14x256xf32> to vector<2x1x256xf32>
    %112 = vector.shape_cast %111 : vector<2x1x256xf32> to vector<2x256xf32>
    %c0_87 = arith.constant 0 : index
    %c0_88 = arith.constant 0 : index
    %c2_89 = arith.constant 2 : index
    %c0_90 = arith.constant 0 : index
    %113 = vector.load %arg11[%c0_87, %c0_88, %c2_89, %c0_90] : memref<2x2x8x256xf32, #tpu.memory_space<vmem>>, vector<2x1x1x256xf32>
    %114 = vector.shape_cast %113 : vector<2x1x1x256xf32> to vector<2x256xf32>
    %115 = vector.shape_cast %112 : vector<2x256xf32> to vector<2x1x1x256xf32>
    tpu.vector_store %arg11[%c0_87, %c0_88, %c2_89, %c0_90], %115 {strides = array<i32>} : memref<2x2x8x256xf32, #tpu.memory_space<vmem>>, vector<2x1x1x256xf32>,
    %116 = vector.extract_strided_slice %88 {offsets = [0, 4, 0], sizes = [2, 1, 256], strides = [1, 1, 1]} : vector<2x14x256xf32> to vector<2x1x256xf32>
    %117 = vector.shape_cast %116 : vector<2x1x256xf32> to vector<2x256xf32>
    %c0_91 = arith.constant 0 : index
    %c1_92 = arith.constant 1 : index
    %c2_93 = arith.constant 2 : index
    %c0_94 = arith.constant 0 : index
    %118 = vector.load %arg11[%c0_91, %c1_92, %c2_93, %c0_94] : memref<2x2x8x256xf32, #tpu.memory_space<vmem>>, vector<2x1x1x256xf32>
    %119 = vector.shape_cast %118 : vector<2x1x1x256xf32> to vector<2x256xf32>
    %120 = vector.shape_cast %117 : vector<2x256xf32> to vector<2x1x1x256xf32>
    tpu.vector_store %arg11[%c0_91, %c1_92, %c2_93, %c0_94], %120 {strides = array<i32>} : memref<2x2x8x256xf32, #tpu.memory_space<vmem>>, vector<2x1x1x256xf32>,
    %121 = vector.extract_strided_slice %88 {offsets = [0, 5, 0], sizes = [2, 1, 256], strides = [1, 1, 1]} : vector<2x14x256xf32> to vector<2x1x256xf32>
    %122 = vector.shape_cast %121 : vector<2x1x256xf32> to vector<2x256xf32>
    %c0_95 = arith.constant 0 : index
    %c0_96 = arith.constant 0 : index
    %c3 = arith.constant 3 : index
    %c0_97 = arith.constant 0 : index
    %123 = vector.load %arg11[%c0_95, %c0_96, %c3, %c0_97] : memref<2x2x8x256xf32, #tpu.memory_space<vmem>>, vector<2x1x1x256xf32>
    %124 = vector.shape_cast %123 : vector<2x1x1x256xf32> to vector<2x256xf32>
    %125 = vector.shape_cast %122 : vector<2x256xf32> to vector<2x1x1x256xf32>
    tpu.vector_store %arg11[%c0_95, %c0_96, %c3, %c0_97], %125 {strides = array<i32>} : memref<2x2x8x256xf32, #tpu.memory_space<vmem>>, vector<2x1x1x256xf32>,
    %126 = vector.extract_strided_slice %88 {offsets = [0, 6, 0], sizes = [2, 1, 256], strides = [1, 1, 1]} : vector<2x14x256xf32> to vector<2x1x256xf32>
    %127 = vector.shape_cast %126 : vector<2x1x256xf32> to vector<2x256xf32>
    %c0_98 = arith.constant 0 : index
    %c1_99 = arith.constant 1 : index
    %c3_100 = arith.constant 3 : index
    %c0_101 = arith.constant 0 : index
    %128 = vector.load %arg11[%c0_98, %c1_99, %c3_100, %c0_101] : memref<2x2x8x256xf32, #tpu.memory_space<vmem>>, vector<2x1x1x256xf32>
    %129 = vector.shape_cast %128 : vector<2x1x1x256xf32> to vector<2x256xf32>
    %130 = vector.shape_cast %127 : vector<2x256xf32> to vector<2x1x1x256xf32>
    tpu.vector_store %arg11[%c0_98, %c1_99, %c3_100, %c0_101], %130 {strides = array<i32>} : memref<2x2x8x256xf32, #tpu.memory_space<vmem>>, vector<2x1x1x256xf32>,
    %131 = vector.extract_strided_slice %88 {offsets = [0, 7, 0], sizes = [2, 1, 256], strides = [1, 1, 1]} : vector<2x14x256xf32> to vector<2x1x256xf32>
    %132 = vector.shape_cast %131 : vector<2x1x256xf32> to vector<2x256xf32>
    %c0_102 = arith.constant 0 : index
    %c0_103 = arith.constant 0 : index
    %c4 = arith.constant 4 : index
    %c0_104 = arith.constant 0 : index
    %133 = vector.load %arg11[%c0_102, %c0_103, %c4, %c0_104] : memref<2x2x8x256xf32, #tpu.memory_space<vmem>>, vector<2x1x1x256xf32>
    %134 = vector.shape_cast %133 : vector<2x1x1x256xf32> to vector<2x256xf32>
    %135 = vector.shape_cast %132 : vector<2x256xf32> to vector<2x1x1x256xf32>
    tpu.vector_store %arg11[%c0_102, %c0_103, %c4, %c0_104], %135 {strides = array<i32>} : memref<2x2x8x256xf32, #tpu.memory_space<vmem>>, vector<2x1x1x256xf32>,
    %136 = vector.extract_strided_slice %88 {offsets = [0, 8, 0], sizes = [2, 1, 256], strides = [1, 1, 1]} : vector<2x14x256xf32> to vector<2x1x256xf32>
    %137 = vector.shape_cast %136 : vector<2x1x256xf32> to vector<2x256xf32>
    %c0_105 = arith.constant 0 : index
    %c1_106 = arith.constant 1 : index
    %c4_107 = arith.constant 4 : index
    %c0_108 = arith.constant 0 : index
    %138 = vector.load %arg11[%c0_105, %c1_106, %c4_107, %c0_108] : memref<2x2x8x256xf32, #tpu.memory_space<vmem>>, vector<2x1x1x256xf32>
    %139 = vector.shape_cast %138 : vector<2x1x1x256xf32> to vector<2x256xf32>
    %140 = vector.shape_cast %137 : vector<2x256xf32> to vector<2x1x1x256xf32>
    tpu.vector_store %arg11[%c0_105, %c1_106, %c4_107, %c0_108], %140 {strides = array<i32>} : memref<2x2x8x256xf32, #tpu.memory_space<vmem>>, vector<2x1x1x256xf32>,
    %141 = vector.extract_strided_slice %88 {offsets = [0, 9, 0], sizes = [2, 1, 256], strides = [1, 1, 1]} : vector<2x14x256xf32> to vector<2x1x256xf32>
    %142 = vector.shape_cast %141 : vector<2x1x256xf32> to vector<2x256xf32>
    %c0_109 = arith.constant 0 : index
    %c0_110 = arith.constant 0 : index
    %c5 = arith.constant 5 : index
    %c0_111 = arith.constant 0 : index
    %143 = vector.load %arg11[%c0_109, %c0_110, %c5, %c0_111] : memref<2x2x8x256xf32, #tpu.memory_space<vmem>>, vector<2x1x1x256xf32>
    %144 = vector.shape_cast %143 : vector<2x1x1x256xf32> to vector<2x256xf32>
    %145 = vector.shape_cast %142 : vector<2x256xf32> to vector<2x1x1x256xf32>
    tpu.vector_store %arg11[%c0_109, %c0_110, %c5, %c0_111], %145 {strides = array<i32>} : memref<2x2x8x256xf32, #tpu.memory_space<vmem>>, vector<2x1x1x256xf32>,
    %146 = vector.extract_strided_slice %88 {offsets = [0, 10, 0], sizes = [2, 1, 256], strides = [1, 1, 1]} : vector<2x14x256xf32> to vector<2x1x256xf32>
    %147 = vector.shape_cast %146 : vector<2x1x256xf32> to vector<2x256xf32>
    %c0_112 = arith.constant 0 : index
    %c1_113 = arith.constant 1 : index
    %c5_114 = arith.constant 5 : index
    %c0_115 = arith.constant 0 : index
    %148 = vector.load %arg11[%c0_112, %c1_113, %c5_114, %c0_115] : memref<2x2x8x256xf32, #tpu.memory_space<vmem>>, vector<2x1x1x256xf32>
    %149 = vector.shape_cast %148 : vector<2x1x1x256xf32> to vector<2x256xf32>
    %150 = vector.shape_cast %147 : vector<2x256xf32> to vector<2x1x1x256xf32>
    tpu.vector_store %arg11[%c0_112, %c1_113, %c5_114, %c0_115], %150 {strides = array<i32>} : memref<2x2x8x256xf32, #tpu.memory_space<vmem>>, vector<2x1x1x256xf32>,
    %151 = vector.extract_strided_slice %88 {offsets = [0, 11, 0], sizes = [2, 1, 256], strides = [1, 1, 1]} : vector<2x14x256xf32> to vector<2x1x256xf32>
    %152 = vector.shape_cast %151 : vector<2x1x256xf32> to vector<2x256xf32>
    %c0_116 = arith.constant 0 : index
    %c0_117 = arith.constant 0 : index
    %c6 = arith.constant 6 : index
    %c0_118 = arith.constant 0 : index
    %153 = vector.load %arg11[%c0_116, %c0_117, %c6, %c0_118] : memref<2x2x8x256xf32, #tpu.memory_space<vmem>>, vector<2x1x1x256xf32>
    %154 = vector.shape_cast %153 : vector<2x1x1x256xf32> to vector<2x256xf32>
    %155 = vector.shape_cast %152 : vector<2x256xf32> to vector<2x1x1x256xf32>
    tpu.vector_store %arg11[%c0_116, %c0_117, %c6, %c0_118], %155 {strides = array<i32>} : memref<2x2x8x256xf32, #tpu.memory_space<vmem>>, vector<2x1x1x256xf32>,
    %156 = vector.extract_strided_slice %88 {offsets = [0, 12, 0], sizes = [2, 1, 256], strides = [1, 1, 1]} : vector<2x14x256xf32> to vector<2x1x256xf32>
    %157 = vector.shape_cast %156 : vector<2x1x256xf32> to vector<2x256xf32>
    %c0_119 = arith.constant 0 : index
    %c1_120 = arith.constant 1 : index
    %c6_121 = arith.constant 6 : index
    %c0_122 = arith.constant 0 : index
    %158 = vector.load %arg11[%c0_119, %c1_120, %c6_121, %c0_122] : memref<2x2x8x256xf32, #tpu.memory_space<vmem>>, vector<2x1x1x256xf32>
    %159 = vector.shape_cast %158 : vector<2x1x1x256xf32> to vector<2x256xf32>
    %160 = vector.shape_cast %157 : vector<2x256xf32> to vector<2x1x1x256xf32>
    tpu.vector_store %arg11[%c0_119, %c1_120, %c6_121, %c0_122], %160 {strides = array<i32>} : memref<2x2x8x256xf32, #tpu.memory_space<vmem>>, vector<2x1x1x256xf32>,
    %161 = vector.extract_strided_slice %88 {offsets = [0, 13, 0], sizes = [2, 1, 256], strides = [1, 1, 1]} : vector<2x14x256xf32> to vector<2x1x256xf32>
    %162 = vector.shape_cast %161 : vector<2x1x256xf32> to vector<2x256xf32>
    %c0_123 = arith.constant 0 : index
    %c0_124 = arith.constant 0 : index
    %c7_125 = arith.constant 7 : index
    %c0_126 = arith.constant 0 : index
    %163 = vector.load %arg11[%c0_123, %c0_124, %c7_125, %c0_126] : memref<2x2x8x256xf32, #tpu.memory_space<vmem>>, vector<2x1x1x256xf32>
    %164 = vector.shape_cast %163 : vector<2x1x1x256xf32> to vector<2x256xf32>
    %165 = vector.shape_cast %162 : vector<2x256xf32> to vector<2x1x1x256xf32>
    tpu.vector_store %arg11[%c0_123, %c0_124, %c7_125, %c0_126], %165 {strides = array<i32>} : memref<2x2x8x256xf32, #tpu.memory_space<vmem>>, vector<2x1x1x256xf32>,
    %c0_127 = arith.constant 0 : index
    %c0_128 = arith.constant 0 : index
    %c0_129 = arith.constant 0 : index
    %c0_130 = arith.constant 0 : index
    %166 = vector.load %arg11[%c0_127, %c0_128, %c0_129, %c0_130] : memref<2x2x8x256xf32, #tpu.memory_space<vmem>>, vector<2x1x8x256xf32>
    %167 = vector.shape_cast %166 : vector<2x1x8x256xf32> to vector<2x8x256xf32>
    %168 = vector.shape_cast %167 : vector<2x8x256xf32> to vector<16x256xf32>
    %169 = arith.truncf %168 : vector<16x256xf32> to vector<16x256xbf16>
    %c0_131 = arith.constant 0 : index
    %c1_132 = arith.constant 1 : index
    %c0_133 = arith.constant 0 : index
    %c0_134 = arith.constant 0 : index
    %170 = vector.load %arg11[%c0_131, %c1_132, %c0_133, %c0_134] : memref<2x2x8x256xf32, #tpu.memory_space<vmem>>, vector<2x1x8x256xf32>
    %171 = vector.shape_cast %170 : vector<2x1x8x256xf32> to vector<2x8x256xf32>
    %172 = vector.shape_cast %171 : vector<2x8x256xf32> to vector<16x256xf32>
    %173 = arith.truncf %172 : vector<16x256xf32> to vector<16x256xbf16>
    %c0_135 = arith.constant 0 : index
    %c0_136 = arith.constant 0 : index
    %c0_137 = arith.constant 0 : index
    %c0_138 = arith.constant 0 : index
    %174 = vector.load %arg4[%c0_135, %c0_136, %c0_137, %c0_138] : memref<2x3x256x224xbf16, #tpu.memory_space<vmem>>, vector<1x1x256x224xbf16>
    %175 = vector.shape_cast %174 : vector<1x1x256x224xbf16> to vector<256x224xbf16>
    %cst_139 = arith.constant dense<0.000000e+00> : vector<16x224xf32>
    %176 = tpu.matmul %169, %175, %cst_139 {dimension_numbers = #tpu.dot_dimension_numbers<[1], [0], [0], [1], [0, 0, 1, 1], [], []>} : vector<16x256xbf16>, vector<256x224xbf16>, vector<16x224xf32> -> vector<16x224xf32>
    %177 = vector.shape_cast %176 : vector<16x224xf32> to vector<2x8x224xf32>
    %178 = vector.extract_strided_slice %177 {offsets = [0, 0, 0], sizes = [2, 7, 224], strides = [1, 1, 1]} : vector<2x8x224xf32> to vector<2x7x224xf32>
    %c0_140 = arith.constant 0 : index
    %c1_141 = arith.constant 1 : index
    %c0_142 = arith.constant 0 : index
    %c0_143 = arith.constant 0 : index
    %179 = vector.load %arg4[%c0_140, %c1_141, %c0_142, %c0_143] : memref<2x3x256x224xbf16, #tpu.memory_space<vmem>>, vector<1x1x256x224xbf16>
    %180 = vector.shape_cast %179 : vector<1x1x256x224xbf16> to vector<256x224xbf16>
    %cst_144 = arith.constant dense<0.000000e+00> : vector<16x224xf32>
    %181 = tpu.matmul %173, %180, %cst_144 {dimension_numbers = #tpu.dot_dimension_numbers<[1], [0], [0], [1], [0, 0, 1, 1], [], []>} : vector<16x256xbf16>, vector<256x224xbf16>, vector<16x224xf32> -> vector<16x224xf32>
    %182 = vector.shape_cast %181 : vector<16x224xf32> to vector<2x8x224xf32>
    %183 = vector.extract_strided_slice %182 {offsets = [0, 0, 0], sizes = [2, 7, 224], strides = [1, 1, 1]} : vector<2x8x224xf32> to vector<2x7x224xf32>
    %184 = arith.addf %178, %183 : vector<2x7x224xf32>
    %c0_145 = arith.constant 0 : index
    %c2_146 = arith.constant 2 : index
    %c0_147 = arith.constant 0 : index
    %c0_148 = arith.constant 0 : index
    %185 = vector.load %arg4[%c0_145, %c2_146, %c0_147, %c0_148] : memref<2x3x256x224xbf16, #tpu.memory_space<vmem>>, vector<1x1x256x224xbf16>
    %186 = vector.shape_cast %185 : vector<1x1x256x224xbf16> to vector<256x224xbf16>
    %cst_149 = arith.constant dense<0.000000e+00> : vector<16x224xf32>
    %187 = tpu.matmul %169, %186, %cst_149 {dimension_numbers = #tpu.dot_dimension_numbers<[1], [0], [0], [1], [0, 0, 1, 1], [], []>} : vector<16x256xbf16>, vector<256x224xbf16>, vector<16x224xf32> -> vector<16x224xf32>
    %188 = vector.shape_cast %187 : vector<16x224xf32> to vector<2x8x224xf32>
    %189 = vector.extract_strided_slice %188 {offsets = [0, 1, 0], sizes = [2, 7, 224], strides = [1, 1, 1]} : vector<2x8x224xf32> to vector<2x7x224xf32>
    %190 = arith.addf %184, %189 : vector<2x7x224xf32>
    %c0_150 = arith.constant 0 : index
    %c0_151 = arith.constant 0 : index
    %c0_152 = arith.constant 0 : index
    %c0_153 = arith.constant 0 : index
    %191 = vector.load %arg4[%c0_150, %c0_151, %c0_152, %c0_153] : memref<2x3x256x224xbf16, #tpu.memory_space<vmem>>, vector<1x1x256x224xbf16>
    %192 = vector.shape_cast %191 : vector<1x1x256x224xbf16> to vector<256x224xbf16>
    %cst_154 = arith.constant dense<0.000000e+00> : vector<16x224xf32>
    %193 = tpu.matmul %173, %192, %cst_154 {dimension_numbers = #tpu.dot_dimension_numbers<[1], [0], [0], [1], [0, 0, 1, 1], [], []>} : vector<16x256xbf16>, vector<256x224xbf16>, vector<16x224xf32> -> vector<16x224xf32>
    %194 = vector.shape_cast %193 : vector<16x224xf32> to vector<2x8x224xf32>
    %195 = vector.extract_strided_slice %194 {offsets = [0, 0, 0], sizes = [2, 7, 224], strides = [1, 1, 1]} : vector<2x8x224xf32> to vector<2x7x224xf32>
    %c0_155 = arith.constant 0 : index
    %c1_156 = arith.constant 1 : index
    %c0_157 = arith.constant 0 : index
    %c0_158 = arith.constant 0 : index
    %196 = vector.load %arg4[%c0_155, %c1_156, %c0_157, %c0_158] : memref<2x3x256x224xbf16, #tpu.memory_space<vmem>>, vector<1x1x256x224xbf16>
    %197 = vector.shape_cast %196 : vector<1x1x256x224xbf16> to vector<256x224xbf16>
    %cst_159 = arith.constant dense<0.000000e+00> : vector<16x224xf32>
    %198 = tpu.matmul %169, %197, %cst_159 {dimension_numbers = #tpu.dot_dimension_numbers<[1], [0], [0], [1], [0, 0, 1, 1], [], []>} : vector<16x256xbf16>, vector<256x224xbf16>, vector<16x224xf32> -> vector<16x224xf32>
    %199 = vector.shape_cast %198 : vector<16x224xf32> to vector<2x8x224xf32>
    %200 = vector.extract_strided_slice %199 {offsets = [0, 1, 0], sizes = [2, 7, 224], strides = [1, 1, 1]} : vector<2x8x224xf32> to vector<2x7x224xf32>
    %201 = arith.addf %195, %200 : vector<2x7x224xf32>
    %c0_160 = arith.constant 0 : index
    %c2_161 = arith.constant 2 : index
    %c0_162 = arith.constant 0 : index
    %c0_163 = arith.constant 0 : index
    %202 = vector.load %arg4[%c0_160, %c2_161, %c0_162, %c0_163] : memref<2x3x256x224xbf16, #tpu.memory_space<vmem>>, vector<1x1x256x224xbf16>
    %203 = vector.shape_cast %202 : vector<1x1x256x224xbf16> to vector<256x224xbf16>
    %cst_164 = arith.constant dense<0.000000e+00> : vector<16x224xf32>
    %204 = tpu.matmul %173, %203, %cst_164 {dimension_numbers = #tpu.dot_dimension_numbers<[1], [0], [0], [1], [0, 0, 1, 1], [], []>} : vector<16x256xbf16>, vector<256x224xbf16>, vector<16x224xf32> -> vector<16x224xf32>
    %205 = vector.shape_cast %204 : vector<16x224xf32> to vector<2x8x224xf32>
    %206 = vector.extract_strided_slice %205 {offsets = [0, 1, 0], sizes = [2, 7, 224], strides = [1, 1, 1]} : vector<2x8x224xf32> to vector<2x7x224xf32>
    %207 = arith.addf %201, %206 : vector<2x7x224xf32>
    %208 = arith.maximumf %190, %207 : vector<2x7x224xf32>
    %c1_165 = arith.constant 1 : index
    %c0_166 = arith.constant 0 : index
    %c0_167 = arith.constant 0 : index
    %c0_168 = arith.constant 0 : index
    %209 = vector.load %arg4[%c1_165, %c0_166, %c0_167, %c0_168] : memref<2x3x256x224xbf16, #tpu.memory_space<vmem>>, vector<1x1x256x224xbf16>
    %210 = vector.shape_cast %209 : vector<1x1x256x224xbf16> to vector<256x224xbf16>
    %cst_169 = arith.constant dense<0.000000e+00> : vector<16x224xf32>
    %211 = tpu.matmul %169, %210, %cst_169 {dimension_numbers = #tpu.dot_dimension_numbers<[1], [0], [0], [1], [0, 0, 1, 1], [], []>} : vector<16x256xbf16>, vector<256x224xbf16>, vector<16x224xf32> -> vector<16x224xf32>
    %212 = vector.shape_cast %211 : vector<16x224xf32> to vector<2x8x224xf32>
    %213 = vector.extract_strided_slice %212 {offsets = [0, 0, 0], sizes = [2, 7, 224], strides = [1, 1, 1]} : vector<2x8x224xf32> to vector<2x7x224xf32>
    %c1_170 = arith.constant 1 : index
    %c1_171 = arith.constant 1 : index
    %c0_172 = arith.constant 0 : index
    %c0_173 = arith.constant 0 : index
    %214 = vector.load %arg4[%c1_170, %c1_171, %c0_172, %c0_173] : memref<2x3x256x224xbf16, #tpu.memory_space<vmem>>, vector<1x1x256x224xbf16>
    %215 = vector.shape_cast %214 : vector<1x1x256x224xbf16> to vector<256x224xbf16>
    %cst_174 = arith.constant dense<0.000000e+00> : vector<16x224xf32>
    %216 = tpu.matmul %173, %215, %cst_174 {dimension_numbers = #tpu.dot_dimension_numbers<[1], [0], [0], [1], [0, 0, 1, 1], [], []>} : vector<16x256xbf16>, vector<256x224xbf16>, vector<16x224xf32> -> vector<16x224xf32>
    %217 = vector.shape_cast %216 : vector<16x224xf32> to vector<2x8x224xf32>
    %218 = vector.extract_strided_slice %217 {offsets = [0, 0, 0], sizes = [2, 7, 224], strides = [1, 1, 1]} : vector<2x8x224xf32> to vector<2x7x224xf32>
    %219 = arith.addf %213, %218 : vector<2x7x224xf32>
    %c1_175 = arith.constant 1 : index
    %c2_176 = arith.constant 2 : index
    %c0_177 = arith.constant 0 : index
    %c0_178 = arith.constant 0 : index
    %220 = vector.load %arg4[%c1_175, %c2_176, %c0_177, %c0_178] : memref<2x3x256x224xbf16, #tpu.memory_space<vmem>>, vector<1x1x256x224xbf16>
    %221 = vector.shape_cast %220 : vector<1x1x256x224xbf16> to vector<256x224xbf16>
    %cst_179 = arith.constant dense<0.000000e+00> : vector<16x224xf32>
    %222 = tpu.matmul %169, %221, %cst_179 {dimension_numbers = #tpu.dot_dimension_numbers<[1], [0], [0], [1], [0, 0, 1, 1], [], []>} : vector<16x256xbf16>, vector<256x224xbf16>, vector<16x224xf32> -> vector<16x224xf32>
    %223 = vector.shape_cast %222 : vector<16x224xf32> to vector<2x8x224xf32>
    %224 = vector.extract_strided_slice %223 {offsets = [0, 1, 0], sizes = [2, 7, 224], strides = [1, 1, 1]} : vector<2x8x224xf32> to vector<2x7x224xf32>
    %225 = arith.addf %219, %224 : vector<2x7x224xf32>
    %226 = arith.maximumf %208, %225 : vector<2x7x224xf32>
    %c1_180 = arith.constant 1 : index
    %c0_181 = arith.constant 0 : index
    %c0_182 = arith.constant 0 : index
    %c0_183 = arith.constant 0 : index
    %227 = vector.load %arg4[%c1_180, %c0_181, %c0_182, %c0_183] : memref<2x3x256x224xbf16, #tpu.memory_space<vmem>>, vector<1x1x256x224xbf16>
    %228 = vector.shape_cast %227 : vector<1x1x256x224xbf16> to vector<256x224xbf16>
    %cst_184 = arith.constant dense<0.000000e+00> : vector<16x224xf32>
    %229 = tpu.matmul %173, %228, %cst_184 {dimension_numbers = #tpu.dot_dimension_numbers<[1], [0], [0], [1], [0, 0, 1, 1], [], []>} : vector<16x256xbf16>, vector<256x224xbf16>, vector<16x224xf32> -> vector<16x224xf32>
    %230 = vector.shape_cast %229 : vector<16x224xf32> to vector<2x8x224xf32>
    %231 = vector.extract_strided_slice %230 {offsets = [0, 0, 0], sizes = [2, 7, 224], strides = [1, 1, 1]} : vector<2x8x224xf32> to vector<2x7x224xf32>
    %c1_185 = arith.constant 1 : index
    %c1_186 = arith.constant 1 : index
    %c0_187 = arith.constant 0 : index
    %c0_188 = arith.constant 0 : index
    %232 = vector.load %arg4[%c1_185, %c1_186, %c0_187, %c0_188] : memref<2x3x256x224xbf16, #tpu.memory_space<vmem>>, vector<1x1x256x224xbf16>
    %233 = vector.shape_cast %232 : vector<1x1x256x224xbf16> to vector<256x224xbf16>
    %cst_189 = arith.constant dense<0.000000e+00> : vector<16x224xf32>
    %234 = tpu.matmul %169, %233, %cst_189 {dimension_numbers = #tpu.dot_dimension_numbers<[1], [0], [0], [1], [0, 0, 1, 1], [], []>} : vector<16x256xbf16>, vector<256x224xbf16>, vector<16x224xf32> -> vector<16x224xf32>
    %235 = vector.shape_cast %234 : vector<16x224xf32> to vector<2x8x224xf32>
    %236 = vector.extract_strided_slice %235 {offsets = [0, 1, 0], sizes = [2, 7, 224], strides = [1, 1, 1]} : vector<2x8x224xf32> to vector<2x7x224xf32>
    %237 = arith.addf %231, %236 : vector<2x7x224xf32>
    %c1_190 = arith.constant 1 : index
    %c2_191 = arith.constant 2 : index
    %c0_192 = arith.constant 0 : index
    %c0_193 = arith.constant 0 : index
    %238 = vector.load %arg4[%c1_190, %c2_191, %c0_192, %c0_193] : memref<2x3x256x224xbf16, #tpu.memory_space<vmem>>, vector<1x1x256x224xbf16>
    %239 = vector.shape_cast %238 : vector<1x1x256x224xbf16> to vector<256x224xbf16>
    %cst_194 = arith.constant dense<0.000000e+00> : vector<16x224xf32>
    %240 = tpu.matmul %173, %239, %cst_194 {dimension_numbers = #tpu.dot_dimension_numbers<[1], [0], [0], [1], [0, 0, 1, 1], [], []>} : vector<16x256xbf16>, vector<256x224xbf16>, vector<16x224xf32> -> vector<16x224xf32>
    %241 = vector.shape_cast %240 : vector<16x224xf32> to vector<2x8x224xf32>
    %242 = vector.extract_strided_slice %241 {offsets = [0, 1, 0], sizes = [2, 7, 224], strides = [1, 1, 1]} : vector<2x8x224xf32> to vector<2x7x224xf32>
    %243 = arith.addf %237, %242 : vector<2x7x224xf32>
    %244 = arith.maximumf %226, %243 : vector<2x7x224xf32>
    %c0_195 = arith.constant 0 : index
    %c0_196 = arith.constant 0 : index
    %245 = vector.load %arg5[%c0_195, %c0_196] : memref<1x224xf32, #tpu.memory_space<vmem>>, vector<1x224xf32>
    %246 = vector.shape_cast %245 : vector<1x224xf32> to vector<1x1x224xf32>
    %247 = vector.broadcast %246 : vector<1x1x224xf32> to vector<2x7x224xf32>
    %248 = arith.addf %244, %247 : vector<2x7x224xf32>
    %cst_197 = arith.constant 0.000000e+00 : f32
    %249 = vector.broadcast %cst_197 : f32 to vector<2x7x224xf32>
    %250 = arith.maximumf %248, %249 : vector<2x7x224xf32>
    %251 = vector.extract_strided_slice %250 {offsets = [0, 0, 0], sizes = [2, 1, 224], strides = [1, 1, 1]} : vector<2x7x224xf32> to vector<2x1x224xf32>
    %252 = vector.shape_cast %251 : vector<2x1x224xf32> to vector<2x224xf32>
    %253 = arith.truncf %252 : vector<2x224xf32> to vector<2x224xbf16>
    %c0_198 = arith.constant 0 : index
    %c0_199 = arith.constant 0 : index
    %c0_200 = arith.constant 0 : index
    %254 = vector.load %arg6[%c0_198, %c0_199, %c0_200] : memref<7x224x128xbf16, #tpu.memory_space<vmem>>, vector<1x224x128xbf16>
    %255 = vector.shape_cast %254 : vector<1x224x128xbf16> to vector<224x128xbf16>
    %cst_201 = arith.constant dense<0.000000e+00> : vector<2x128xf32>
    %256 = tpu.matmul %253, %255, %cst_201 {dimension_numbers = #tpu.dot_dimension_numbers<[1], [0], [0], [1], [0, 0, 1, 1], [], []>} : vector<2x224xbf16>, vector<224x128xbf16>, vector<2x128xf32> -> vector<2x128xf32>
    %257 = vector.extract_strided_slice %250 {offsets = [0, 1, 0], sizes = [2, 1, 224], strides = [1, 1, 1]} : vector<2x7x224xf32> to vector<2x1x224xf32>
    %258 = vector.shape_cast %257 : vector<2x1x224xf32> to vector<2x224xf32>
    %259 = arith.truncf %258 : vector<2x224xf32> to vector<2x224xbf16>
    %c1_202 = arith.constant 1 : index
    %c0_203 = arith.constant 0 : index
    %c0_204 = arith.constant 0 : index
    %260 = vector.load %arg6[%c1_202, %c0_203, %c0_204] : memref<7x224x128xbf16, #tpu.memory_space<vmem>>, vector<1x224x128xbf16>
    %261 = vector.shape_cast %260 : vector<1x224x128xbf16> to vector<224x128xbf16>
    %cst_205 = arith.constant dense<0.000000e+00> : vector<2x128xf32>
    %262 = tpu.matmul %259, %261, %cst_205 {dimension_numbers = #tpu.dot_dimension_numbers<[1], [0], [0], [1], [0, 0, 1, 1], [], []>} : vector<2x224xbf16>, vector<224x128xbf16>, vector<2x128xf32> -> vector<2x128xf32>
    %263 = arith.addf %256, %262 : vector<2x128xf32>
    %264 = vector.extract_strided_slice %250 {offsets = [0, 2, 0], sizes = [2, 1, 224], strides = [1, 1, 1]} : vector<2x7x224xf32> to vector<2x1x224xf32>
    %265 = vector.shape_cast %264 : vector<2x1x224xf32> to vector<2x224xf32>
    %266 = arith.truncf %265 : vector<2x224xf32> to vector<2x224xbf16>
    %c2_206 = arith.constant 2 : index
    %c0_207 = arith.constant 0 : index
    %c0_208 = arith.constant 0 : index
    %267 = vector.load %arg6[%c2_206, %c0_207, %c0_208] : memref<7x224x128xbf16, #tpu.memory_space<vmem>>, vector<1x224x128xbf16>
    %268 = vector.shape_cast %267 : vector<1x224x128xbf16> to vector<224x128xbf16>
    %cst_209 = arith.constant dense<0.000000e+00> : vector<2x128xf32>
    %269 = tpu.matmul %266, %268, %cst_209 {dimension_numbers = #tpu.dot_dimension_numbers<[1], [0], [0], [1], [0, 0, 1, 1], [], []>} : vector<2x224xbf16>, vector<224x128xbf16>, vector<2x128xf32> -> vector<2x128xf32>
    %270 = arith.addf %263, %269 : vector<2x128xf32>
    %271 = vector.extract_strided_slice %250 {offsets = [0, 3, 0], sizes = [2, 1, 224], strides = [1, 1, 1]} : vector<2x7x224xf32> to vector<2x1x224xf32>
    %272 = vector.shape_cast %271 : vector<2x1x224xf32> to vector<2x224xf32>
    %273 = arith.truncf %272 : vector<2x224xf32> to vector<2x224xbf16>
    %c3_210 = arith.constant 3 : index
    %c0_211 = arith.constant 0 : index
    %c0_212 = arith.constant 0 : index
    %274 = vector.load %arg6[%c3_210, %c0_211, %c0_212] : memref<7x224x128xbf16, #tpu.memory_space<vmem>>, vector<1x224x128xbf16>
    %275 = vector.shape_cast %274 : vector<1x224x128xbf16> to vector<224x128xbf16>
    %cst_213 = arith.constant dense<0.000000e+00> : vector<2x128xf32>
    %276 = tpu.matmul %273, %275, %cst_213 {dimension_numbers = #tpu.dot_dimension_numbers<[1], [0], [0], [1], [0, 0, 1, 1], [], []>} : vector<2x224xbf16>, vector<224x128xbf16>, vector<2x128xf32> -> vector<2x128xf32>
    %277 = arith.addf %270, %276 : vector<2x128xf32>
    %278 = vector.extract_strided_slice %250 {offsets = [0, 4, 0], sizes = [2, 1, 224], strides = [1, 1, 1]} : vector<2x7x224xf32> to vector<2x1x224xf32>
    %279 = vector.shape_cast %278 : vector<2x1x224xf32> to vector<2x224xf32>
    %280 = arith.truncf %279 : vector<2x224xf32> to vector<2x224xbf16>
    %c4_214 = arith.constant 4 : index
    %c0_215 = arith.constant 0 : index
    %c0_216 = arith.constant 0 : index
    %281 = vector.load %arg6[%c4_214, %c0_215, %c0_216] : memref<7x224x128xbf16, #tpu.memory_space<vmem>>, vector<1x224x128xbf16>
    %282 = vector.shape_cast %281 : vector<1x224x128xbf16> to vector<224x128xbf16>
    %cst_217 = arith.constant dense<0.000000e+00> : vector<2x128xf32>
    %283 = tpu.matmul %280, %282, %cst_217 {dimension_numbers = #tpu.dot_dimension_numbers<[1], [0], [0], [1], [0, 0, 1, 1], [], []>} : vector<2x224xbf16>, vector<224x128xbf16>, vector<2x128xf32> -> vector<2x128xf32>
    %284 = arith.addf %277, %283 : vector<2x128xf32>
    %285 = vector.extract_strided_slice %250 {offsets = [0, 5, 0], sizes = [2, 1, 224], strides = [1, 1, 1]} : vector<2x7x224xf32> to vector<2x1x224xf32>
    %286 = vector.shape_cast %285 : vector<2x1x224xf32> to vector<2x224xf32>
    %287 = arith.truncf %286 : vector<2x224xf32> to vector<2x224xbf16>
    %c5_218 = arith.constant 5 : index
    %c0_219 = arith.constant 0 : index
    %c0_220 = arith.constant 0 : index
    %288 = vector.load %arg6[%c5_218, %c0_219, %c0_220] : memref<7x224x128xbf16, #tpu.memory_space<vmem>>, vector<1x224x128xbf16>
    %289 = vector.shape_cast %288 : vector<1x224x128xbf16> to vector<224x128xbf16>
    %cst_221 = arith.constant dense<0.000000e+00> : vector<2x128xf32>
    %290 = tpu.matmul %287, %289, %cst_221 {dimension_numbers = #tpu.dot_dimension_numbers<[1], [0], [0], [1], [0, 0, 1, 1], [], []>} : vector<2x224xbf16>, vector<224x128xbf16>, vector<2x128xf32> -> vector<2x128xf32>
    %291 = arith.addf %284, %290 : vector<2x128xf32>
    %292 = vector.extract_strided_slice %250 {offsets = [0, 6, 0], sizes = [2, 1, 224], strides = [1, 1, 1]} : vector<2x7x224xf32> to vector<2x1x224xf32>
    %293 = vector.shape_cast %292 : vector<2x1x224xf32> to vector<2x224xf32>
    %294 = arith.truncf %293 : vector<2x224xf32> to vector<2x224xbf16>
    %c6_222 = arith.constant 6 : index
    %c0_223 = arith.constant 0 : index
    %c0_224 = arith.constant 0 : index
    %295 = vector.load %arg6[%c6_222, %c0_223, %c0_224] : memref<7x224x128xbf16, #tpu.memory_space<vmem>>, vector<1x224x128xbf16>
    %296 = vector.shape_cast %295 : vector<1x224x128xbf16> to vector<224x128xbf16>
    %cst_225 = arith.constant dense<0.000000e+00> : vector<2x128xf32>
    %297 = tpu.matmul %294, %296, %cst_225 {dimension_numbers = #tpu.dot_dimension_numbers<[1], [0], [0], [1], [0, 0, 1, 1], [], []>} : vector<2x224xbf16>, vector<224x128xbf16>, vector<2x128xf32> -> vector<2x128xf32>
    %298 = arith.addf %291, %297 : vector<2x128xf32>
    %c0_226 = arith.constant 0 : index
    %c0_227 = arith.constant 0 : index
    %299 = vector.load %arg7[%c0_226, %c0_227] : memref<1x128xf32, #tpu.memory_space<vmem>>, vector<1x128xf32>
    %300 = vector.broadcast %299 : vector<1x128xf32> to vector<2x128xf32>
    %301 = arith.addf %298, %300 : vector<2x128xf32>
    %cst_228 = arith.constant 0.000000e+00 : f32
    %302 = vector.broadcast %cst_228 : f32 to vector<2x128xf32>
    %303 = arith.maximumf %301, %302 : vector<2x128xf32>
    %304 = arith.truncf %303 : vector<2x128xf32> to vector<2x128xbf16>
    %c0_229 = arith.constant 0 : index
    %c0_230 = arith.constant 0 : index
    %305 = vector.load %arg8[%c0_229, %c0_230] : memref<128x128xbf16, #tpu.memory_space<vmem>>, vector<128x128xbf16>
    %cst_231 = arith.constant dense<0.000000e+00> : vector<2x128xf32>
    %306 = tpu.matmul %304, %305, %cst_231 {dimension_numbers = #tpu.dot_dimension_numbers<[1], [0], [0], [1], [0, 0, 1, 1], [], []>} : vector<2x128xbf16>, vector<128x128xbf16>, vector<2x128xf32> -> vector<2x128xf32>
    %c0_232 = arith.constant 0 : index
    %c0_233 = arith.constant 0 : index
    %307 = vector.load %arg9[%c0_232, %c0_233] : memref<1x128xf32, #tpu.memory_space<vmem>>, vector<1x128xf32>
    %308 = vector.broadcast %307 : vector<1x128xf32> to vector<2x128xf32>
    %309 = arith.addf %306, %308 : vector<2x128xf32>
    %c0_234 = arith.constant 0 : index
    %c0_235 = arith.constant 0 : index
    %310 = vector.load %arg10[%c0_234, %c0_235] : memref<2x128xf32, #tpu.memory_space<vmem>>, vector<2x128xf32>
    tpu.vector_store %arg10[%c0_234, %c0_235], %309 {strides = array<i32>} : memref<2x128xf32, #tpu.memory_space<vmem>>, vector<2x128xf32>,
    return
  }
  func.func @transform_0(%arg0: i32) -> (i32, i32, i32, i32, i32) {
    %c0_i32 = arith.constant 0 : i32
    %c0_i32_0 = arith.constant 0 : i32
    %c0_i32_1 = arith.constant 0 : i32
    %c0_i32_2 = arith.constant 0 : i32
    %c0_i32_3 = arith.constant 0 : i32
    return %arg0, %c0_i32, %c0_i32_0, %c0_i32_1, %c0_i32_2 : i32, i32, i32, i32, i32
  }
  func.func @transform_1(%arg0: i32) -> (i32, i32, i32) {
    %c0_i32 = arith.constant 0 : i32
    %c0_i32_0 = arith.constant 0 : i32
    %c0_i32_1 = arith.constant 0 : i32
    %c0_i32_2 = arith.constant 0 : i32
    return %c0_i32, %c0_i32_0, %c0_i32_1 : i32, i32, i32
  }
  func.func @transform_2(%arg0: i32) -> (i32, i32) {
    %c0_i32 = arith.constant 0 : i32
    %c0_i32_0 = arith.constant 0 : i32
    %c0_i32_1 = arith.constant 0 : i32
    return %c0_i32, %c0_i32_0 : i32, i32
  }
  func.func @transform_3(%arg0: i32) -> (i32, i32, i32, i32) {
    %c0_i32 = arith.constant 0 : i32
    %c0_i32_0 = arith.constant 0 : i32
    %c0_i32_1 = arith.constant 0 : i32
    %c0_i32_2 = arith.constant 0 : i32
    %c0_i32_3 = arith.constant 0 : i32
    return %c0_i32, %c0_i32_0, %c0_i32_1, %c0_i32_2 : i32, i32, i32, i32
  }
  func.func @transform_4(%arg0: i32) -> (i32, i32) {
    %c0_i32 = arith.constant 0 : i32
    %c0_i32_0 = arith.constant 0 : i32
    %c0_i32_1 = arith.constant 0 : i32
    return %c0_i32, %c0_i32_0 : i32, i32
  }
  func.func @transform_5(%arg0: i32) -> (i32, i32, i32) {
    %c0_i32 = arith.constant 0 : i32
    %c0_i32_0 = arith.constant 0 : i32
    %c0_i32_1 = arith.constant 0 : i32
    %c0_i32_2 = arith.constant 0 : i32
    return %c0_i32, %c0_i32_0, %c0_i32_1 : i32, i32, i32
  }
  func.func @transform_6(%arg0: i32) -> (i32, i32) {
    %c0_i32 = arith.constant 0 : i32
    %c0_i32_0 = arith.constant 0 : i32
    %c0_i32_1 = arith.constant 0 : i32
    return %c0_i32, %c0_i32_0 : i32, i32
  }
  func.func @transform_7(%arg0: i32) -> (i32, i32) {
    %c0_i32 = arith.constant 0 : i32
    %c0_i32_0 = arith.constant 0 : i32
    %c0_i32_1 = arith.constant 0 : i32
    return %c0_i32, %c0_i32_0 : i32, i32
  }
  func.func @transform_8(%arg0: i32) -> (i32, i32) {
    %c0_i32 = arith.constant 0 : i32
    %c0_i32_0 = arith.constant 0 : i32
    %c0_i32_1 = arith.constant 0 : i32
    return %c0_i32, %c0_i32_0 : i32, i32
  }
  func.func @transform_9(%arg0: i32) -> (i32, i32) {
    %c0_i32 = arith.constant 0 : i32
    %c0_i32_0 = arith.constant 0 : i32
    return %arg0, %c0_i32 : i32, i32
  }
}

</mosaic_0001>

<bundles_post_ra>
// kernel: cnn_forward.1
= control target key start
LH: loop header
LB: loop body
LE: loop exit
PB: predicated region body
PF: predicated region fallthrough
CT: control target
= control target key end

     0   :  { %v8373_v2 = vmov 0   ;;  %vm99_vm0 = vcmask 392192   ;;  %s8361_s0 = inlined_call_operand.vmem [shape: bf16[2,2,2,16,48], index: 0, kind: input, shape index: {}]   ;;  %s8362_s1 = inlined_call_operand.vmem [shape: bf16[3,48,256], index: 1, kind: input, shape index: {}]   ;;  %s8363_s2 = inlined_call_operand.vmem [shape: f32[1,256], index: 2, kind: input, shape index: {}]   ;;  %s8364_s3 = inlined_call_operand.vmem [shape: bf16[2,3,256,224], index: 3, kind: input, shape index: {}]   ;;  %s8365_s4 = inlined_call_operand.vmem [shape: f32[1,224], index: 4, kind: input, shape index: {}]   ;;  %s8366_s5 = inlined_call_operand.vmem [shape: bf16[7,224,128], index: 5, kind: input, shape index: {}]   ;;  %s8367_s6 = inlined_call_operand.vmem [shape: f32[1,128], index: 6, kind: input, shape index: {}]   ;;  %s8368_s7 = inlined_call_operand.vmem [shape: bf16[128,128], index: 7, kind: input, shape index: {}]   ;;  %s8369_s8 = inlined_call_operand.vmem [shape: f32[1,128], index: 8, kind: input, shape index: {}]   ;;  %s8370_s9 = inlined_call_operand.hbm [shape: f32[2,128], index: 9, kind: output, shape index: {}]  }
   0x1   :  { %v5909_v0 = vld [vmem:[%s8362_s1 + $0x24] ss:$8 sps:$4 sm:$0xff]   ;;  %v5914_v1 = vld [vmem:[%s8362_s1 + $0x20] ss:$8 sps:$4 sm:$0xff]   ;;  %138 = vmatprep.mubr.bf16.mxu1 %v8373_v2  ;;  %342 = vmatprep.mubr.bf16.mxu0 %v8373_v2  ;;  %v5922_v3 = vld [vmem:[%s8362_s1 + $0x14] ss:$8 sps:$4 sm:$0xff]  }
   0x2   :  { %116 = vmatprep.subr.bf16.mxu1 %v5909_v0  ;;  %v5928_v4 = vld [vmem:[%s8362_s1 + $0x10] ss:$8 sps:$4 sm:$0xff]   ;;  %v5933_v5 = vld [vmem:[%s8362_s1 + $0x4] ss:$8 sps:$4 sm:$0xff]   ;;  %v5944_v7 = vld [vmem:[%s8362_s1 + $0x80] ss:$8 sps:$4 sm:$0xff]  }
   0x3   :  { %117 = vmatpush1.bf16.msra.mxu1 %v5914_v1  ;;  %v5939_v6 = vld [vmem:[%s8362_s1 + $0x84] ss:$8 sps:$4 sm:$0xff]   ;;  %v5951_v8 = vld [vmem:[%s8362_s1] ss:$8 sps:$4 sm:$0xff]   ;;  %v5957_v9 = vld [vmem:[%s8362_s1 + $0x54] ss:$8 sps:$4 sm:$0xff]  }
   0x4   :  { %118 = vmatprep.subr.bf16.mxu1 %v5922_v3  ;;  %320 = vmatprep.subr.bf16.mxu0 %v5939_v6  ;;  %v5963_v10 = vld [vmem:[%s8362_s1 + $0x74] ss:$8 sps:$4 sm:$0xff]   ;;  %v5968_v11 = vld [vmem:[%s8362_s1 + $0x70] ss:$8 sps:$4 sm:$0xff]   ;;  %v5973_v12 = vld [vmem:[%s8362_s1 + $0x64] ss:$8 sps:$4 sm:$0xff]  }
   0x5   :  { %321 = vmatpush1.bf16.msra.mxu0 %v5944_v7  ;;  %v5376_v13 = vld [vmem:[%s8361_s0] sm:$0xff]   ;;  %v5983_v14 = vld [vmem:[%s8362_s1 + $0x50] ss:$8 sps:$4 sm:$0xff]   ;;  %v6011_v18 = vld [vmem:[%s8362_s1 + $0x34] ss:$8 sps:$4 sm:$0xff]  }
   0x6   :  { %322 = vmatprep.subr.bf16.mxu0 %v5963_v10  ;;  %v5989_v15 = vld [vmem:[%s8362_s1 + $0x60] ss:$8 sps:$4 sm:$0xff]   ;;  %v5996_v16 = vld [vmem:[%s8362_s1 + $0x44] ss:$8 sps:$4 sm:$0xff]   ;;  %v6022_v20 = vld [vmem:[%s8362_s1 + $0x30] ss:$8 sps:$4 sm:$0xff]  }
   0x7   :  { %119 = vmatpush1.bf16.msra.mxu1 %v5928_v4  ;;  %v6004_v17 = vld [vmem:[%s8362_s1 + $0x40] ss:$8 sps:$4 sm:$0xff]   ;;  %v5395_v23 = vld [vmem:[%s8361_s0 + $0x10] sm:$0xff]   ;;  %v5397_v25 = vld [vmem:[%s8361_s0 + $0x18] sm:$0xff]  }
   0x8   :  { %120 = vmatprep.subr.bf16.mxu1 %v5933_v5  ;;  %v5389_v19 = vld [vmem:[%s8361_s0 + $0x20] sm:$0xff]   ;;  %v5393_v21 = vld [vmem:[%s8361_s0 + $0x8] sm:$0xff]   ;;  %v5396_v24 = vld [vmem:[%s8361_s0 + $0x30] sm:$0xff]  }
   0x9   :  { %323 = vmatpush1.bf16.msra.mxu0 %v5968_v11  ;;  %v5394_v22 = vld [vmem:[%s8361_s0 + $0x28] sm:$0xff]   ;;  %v5398_v26 = vld [vmem:[%s8361_s0 + $0x38] sm:$0xff]  }
   0xa   :  { %324 = vmatprep.subr.bf16.mxu0 %v5973_v12  ;;  %v5401_v27 = vld [vmem:[%s8364_s3 + $0x174] ss:$8 sps:$4 sm:$0xff]   ;;  %v5399_v28 = vld [vmem:[%s8364_s3 + $0x170] ss:$8 sps:$4 sm:$0xff]   ;;  %v5407_v31 = vld [vmem:[%s8364_s3 + $0x164] ss:$8 sps:$4 sm:$0xff]  }
   0xb   :  { %121 = vmatpush1.bf16.msra.mxu1 %v5951_v8  ;;  %v6149_v29 = vld [vmem:[%s8364_s3 + $0x74] ss:$8 sps:$4 sm:$0xff]   ;;  %v5402_v30 = vld [vmem:[%s8364_s3 + $0x70] ss:$8 sps:$4 sm:$0xff]  }
   0xc   :  { %222 = vmatprep.subr.bf16.mxu1 %v5957_v9 }
   0xd   :  { %325 = vmatpush1.bf16.msra.mxu0 %v5989_v15 }
   0xe   :  { %4641 = vmatmul.mubr.msk.bf16.vlgmr.msra.gmra.mxu1 %vm99_vm0, %v5376_v13  ;;  %463 = vmatprep.subr.bf16.mxu0 %v5957_v9 }
   0xf   :  { %223 = vmatpush1.bf16.msra.mxu1 %v5983_v14  ;;  %148 = vmatprep.mubr.bf16.mxu1 %v8373_v2 }
  0x10   :  { %224 = vmatprep.subr.bf16.mxu1 %v5996_v16  ;;  %4671 = vmatmul.mubr.msk.bf16.vlgmr.msra.gmra.mxu0 %vm99_vm0, %v5376_v13 }
  0x11   :  { %464 = vmatpush1.bf16.msra.mxu0 %v5983_v14  ;;  %352 = vmatprep.mubr.bf16.mxu0 %v8373_v2 }
  0x12   :  { %465 = vmatprep.subr.bf16.mxu0 %v5996_v16 }
  0x13   :  { %225 = vmatpush1.bf16.msra.mxu1 %v6004_v17 }
  0x14   :  { %226 = vmatprep.subr.bf16.mxu1 %v6011_v18 }
  0x15   :  { %466 = vmatpush1.bf16.msra.mxu0 %v6004_v17 }
  0x16   :  { %4642 = vmatmul.mubr.msk.bf16.gmra.mxu1 %vm99_vm0, %v5389_v19  ;;  %467 = vmatprep.subr.bf16.mxu0 %v6011_v18 }
  0x17   :  { %227 = vmatpush1.bf16.msra.mxu1 %v6022_v20  ;;  %244 = vmatprep.mubr.bf16.mxu1 %v8373_v2 }
  0x18   :  { %410 = vmatprep.subr.bf16.mxu1 %v5909_v0  ;;  %4672 = vmatmul.mubr.msk.bf16.gmra.mxu0 %vm99_vm0, %v5389_v19 }
  0x19   :  { %485 = vmatprep.mubr.bf16.mxu0 %v8373_v2  ;;  %468 = vmatpush1.bf16.msra.mxu0 %v6022_v20 }
  0x1a   :  { %665 = vmatprep.subr.bf16.mxu0 %v5909_v0 }
  0x1e   :  { %4657 = vmatmul.mubr.msk.bf16.vlgmr.msra.gmra.mxu1 %vm99_vm0, %v5393_v21 }
  0x1f   :  { %411 = vmatpush1.bf16.msra.mxu1 %v5914_v1  ;;  %254 = vmatprep.mubr.bf16.mxu1 %v8373_v2 }
  0x20   :  { %412 = vmatprep.subr.bf16.mxu1 %v5922_v3  ;;  %4675 = vmatmul.mubr.msk.bf16.vlgmr.msra.gmra.mxu0 %vm99_vm0, %v5376_v13 }
  0x21   :  { %666 = vmatpush1.bf16.msra.mxu0 %v5914_v1  ;;  %495 = vmatprep.mubr.bf16.mxu0 %v8373_v2 }
  0x22   :  { %667 = vmatprep.subr.bf16.mxu0 %v5922_v3 }
  0x23   :  { %413 = vmatpush1.bf16.msra.mxu1 %v5928_v4 }
  0x24   :  { %414 = vmatprep.subr.bf16.mxu1 %v5933_v5 }
  0x25   :  { %668 = vmatpush1.bf16.msra.mxu0 %v5928_v4 }
  0x26   :  { %4658 = vmatmul.mubr.msk.bf16.gmra.mxu1 %vm99_vm0, %v5394_v22  ;;  %669 = vmatprep.subr.bf16.mxu0 %v5933_v5 }
  0x27   :  { %415 = vmatpush1.bf16.msra.mxu1 %v5951_v8  ;;  %432 = vmatprep.mubr.bf16.mxu1 %v8373_v2 }
  0x28   :  { %552 = vmatprep.subr.bf16.mxu1 %v5939_v6  ;;  %4676 = vmatmul.mubr.msk.bf16.gmra.mxu0 %vm99_vm0, %v5389_v19 }
  0x29   :  { %687 = vmatprep.mubr.bf16.mxu0 %v8373_v2  ;;  %670 = vmatpush1.bf16.msra.mxu0 %v5951_v8 }
  0x2a   :  { %795 = vmatprep.subr.bf16.mxu0 %v5939_v6 }
  0x2e   :  { %4673 = vmatmul.mubr.msk.bf16.vlgmr.msra.gmra.mxu1 %vm99_vm0, %v5393_v21 }
  0x2f   :  { %553 = vmatpush1.bf16.msra.mxu1 %v5944_v7  ;;  %442 = vmatprep.mubr.bf16.mxu1 %v8373_v2 }
  0x30   :  { %554 = vmatprep.subr.bf16.mxu1 %v5963_v10  ;;  %4681 = vmatmul.mubr.msk.bf16.vlgmr.msra.gmra.mxu0 %vm99_vm0, %v5395_v23 }
  0x31   :  { %796 = vmatpush1.bf16.msra.mxu0 %v5944_v7  ;;  %697 = vmatprep.mubr.bf16.mxu0 %v8373_v2 }
  0x32   :  { %797 = vmatprep.subr.bf16.mxu0 %v5963_v10 }
  0x33   :  { %555 = vmatpush1.bf16.msra.mxu1 %v5968_v11 }
  0x34   :  { %556 = vmatprep.subr.bf16.mxu1 %v5973_v12 }
  0x35   :  { %798 = vmatpush1.bf16.msra.mxu0 %v5968_v11 }
  0x36   :  { %4674 = vmatmul.mubr.msk.bf16.gmra.mxu1 %vm99_vm0, %v5394_v22  ;;  %799 = vmatprep.subr.bf16.mxu0 %v5973_v12 }
  0x37   :  { %557 = vmatpush1.bf16.msra.mxu1 %v5989_v15  ;;  %574 = vmatprep.mubr.bf16.mxu1 %v8373_v2 }
  0x38   :  { %734 = vmatprep.subr.bf16.mxu1 %v5957_v9  ;;  %4682 = vmatmul.mubr.msk.bf16.gmra.mxu0 %vm99_vm0, %v5396_v24 }
  0x39   :  { %817 = vmatprep.mubr.bf16.mxu0 %v8373_v2  ;;  %800 = vmatpush1.bf16.msra.mxu0 %v5989_v15 }
  0x3a   :  { %945 = vmatprep.subr.bf16.mxu0 %v5957_v9 }
  0x3e   :  { %4677 = vmatmul.mubr.msk.bf16.vlgmr.msra.gmra.mxu1 %vm99_vm0, %v5393_v21 }
  0x3f   :  { %735 = vmatpush1.bf16.msra.mxu1 %v5983_v14  ;;  %584 = vmatprep.mubr.bf16.mxu1 %v8373_v2 }
  0x40   :  { %736 = vmatprep.subr.bf16.mxu1 %v5996_v16  ;;  %4687 = vmatmul.mubr.msk.bf16.vlgmr.msra.gmra.mxu0 %vm99_vm0, %v5395_v23 }
  0x41   :  { %946 = vmatpush1.bf16.msra.mxu0 %v5983_v14  ;;  %827 = vmatprep.mubr.bf16.mxu0 %v8373_v2 }
  0x42   :  { %947 = vmatprep.subr.bf16.mxu0 %v5996_v16 }
  0x43   :  { %737 = vmatpush1.bf16.msra.mxu1 %v6004_v17 }
  0x44   :  { %738 = vmatprep.subr.bf16.mxu1 %v6011_v18 }
  0x45   :  { %948 = vmatpush1.bf16.msra.mxu0 %v6004_v17 }
  0x46   :  { %4678 = vmatmul.mubr.msk.bf16.gmra.mxu1 %vm99_vm0, %v5394_v22  ;;  %949 = vmatprep.subr.bf16.mxu0 %v6011_v18 }
  0x47   :  { %739 = vmatpush1.bf16.msra.mxu1 %v6022_v20  ;;  %756 = vmatprep.mubr.bf16.mxu1 %v8373_v2 }
  0x48   :  { %892 = vmatprep.subr.bf16.mxu1 %v5909_v0  ;;  %4688 = vmatmul.mubr.msk.bf16.gmra.mxu0 %vm99_vm0, %v5396_v24 }
  0x49   :  { %967 = vmatprep.mubr.bf16.mxu0 %v8373_v2  ;;  %950 = vmatpush1.bf16.msra.mxu0 %v6022_v20 }
  0x4a   :  { %1684 = vmatprep.subr.bf16.mxu0 %v6149_v29 }
  0x4e   :  { %4685 = vmatmul.mubr.msk.bf16.vlgmr.msra.gmra.mxu1 %vm99_vm0, %v5397_v25 }
  0x4f   :  { %893 = vmatpush1.bf16.msra.mxu1 %v5914_v1  ;;  %766 = vmatprep.mubr.bf16.mxu1 %v8373_v2 }
  0x50   :  { %894 = vmatprep.subr.bf16.mxu1 %v5922_v3  ;;  %4691 = vmatmul.mubr.msk.bf16.vlgmr.msra.gmra.mxu0 %vm99_vm0, %v5395_v23 }
  0x51   :  { %977 = vmatprep.mubr.bf16.mxu0 %v8373_v2 }
  0x53   :  { %895 = vmatpush1.bf16.msra.mxu1 %v5928_v4 }
  0x54   :  { %896 = vmatprep.subr.bf16.mxu1 %v5933_v5 }
  0x56   :  { %4686 = vmatmul.mubr.msk.bf16.gmra.mxu1 %vm99_vm0, %v5398_v26 }
  0x57   :  { %897 = vmatpush1.bf16.msra.mxu1 %v5951_v8  ;;  %914 = vmatprep.mubr.bf16.mxu1 %v8373_v2 }
  0x58   :  { %1034 = vmatprep.subr.bf16.mxu1 %v5939_v6  ;;  %4692 = vmatmul.mubr.msk.bf16.gmra.mxu0 %vm99_vm0, %v5396_v24 }
  0x5e   :  { %4689 = vmatmul.mubr.msk.bf16.vlgmr.msra.gmra.mxu1 %vm99_vm0, %v5397_v25 }
  0x5f   :  { %1035 = vmatpush1.bf16.msra.mxu1 %v5944_v7  ;;  %924 = vmatprep.mubr.bf16.mxu1 %v8373_v2 }
  0x60   :  { %1036 = vmatprep.subr.bf16.mxu1 %v5963_v10 }
  0x63   :  { %1037 = vmatpush1.bf16.msra.mxu1 %v5968_v11 }
  0x64   :  { %1038 = vmatprep.subr.bf16.mxu1 %v5973_v12 }
  0x66   :  { %4690 = vmatmul.mubr.msk.bf16.gmra.mxu1 %vm99_vm0, %v5398_v26 }
  0x67   :  { %1039 = vmatpush1.bf16.msra.mxu1 %v5989_v15  ;;  %1056 = vmatprep.mubr.bf16.mxu1 %v8373_v2 }
  0x68   :  { %1920 = vmatprep.subr.bf16.mxu1 %v5401_v27 }
  0x6e   :  { %4693 = vmatmul.mubr.msk.bf16.vlgmr.msra.gmra.mxu1 %vm99_vm0, %v5397_v25 }
  0x6f   :  { %1066 = vmatprep.mubr.bf16.mxu1 %v8373_v2  ;;  %1921 = vmatpush1.bf16.msra.mxu1 %v5399_v28 }
  0x76   :  { %4694 = vmatmul.mubr.msk.bf16.gmra.mxu1 %vm99_vm0, %v5398_v26 }
  0x77   :  { %14 = vsyncpa [#allocation4], 0  ;;  %1685 = vmatpush1.bf16.msra.mxu0 %v5402_v30  ;;  %v5405_v32 = vld [vmem:[%s8364_s3 + $0x160] ss:$8 sps:$4 sm:$0xff]   ;;  %1922 = vmatprep.subr.bf16.mxu1 %v5407_v31  ;;  %v5410_v33 = vld [vmem:[%s8364_s3 + $0x64] ss:$8 sps:$4 sm:$0xff]   ;;  %v8376_v9 = vlaneseq }
  0x78   :  { %1923 = vmatpush1.bf16.msra.mxu1 %v5405_v32  ;;  %v5408_v34 = vld [vmem:[%s8364_s3 + $0x60] ss:$8 sps:$4 sm:$0xff]   ;;  %1686 = vmatprep.subr.bf16.mxu0 %v5410_v33  ;;  %v5413_v35 = vld [vmem:[%s8364_s3 + $0x154] ss:$8 sps:$4 sm:$0xff]   ;;  %v5411_v36 = vld [vmem:[%s8364_s3 + $0x150] ss:$8 sps:$4 sm:$0xff]  }
  0x79   :  { %1924 = vmatprep.subr.bf16.mxu1 %v5413_v35  ;;  %v6176_v37 = vld [vmem:[%s8364_s3 + $0x54] ss:$8 sps:$4 sm:$0xff]   ;;  %v5414_v38 = vld [vmem:[%s8364_s3 + $0x50] ss:$8 sps:$4 sm:$0xff]   ;;  %v5419_v39 = vld [vmem:[%s8364_s3 + $0x144] ss:$8 sps:$4 sm:$0xff]  }
  0x7a   :  { %8424 = vst [vmem:[#allocation6_spill] sm:$0xff] %v6176_v37  ;;  %v5417_v40 = vld [vmem:[%s8364_s3 + $0x140] ss:$8 sps:$4 sm:$0xff]   ;;  %v6191_v41 = vld [vmem:[%s8364_s3 + $0x44] ss:$8 sps:$4 sm:$0xff]   ;;  %vm6340_vm1 = vcmp.lt.s32.totalorder %v8376_v9, 256 }
  0x7b   :  { %1687 = vmatpush1.bf16.msra.mxu0 %v5408_v34  ;;  %8425 = vst [vmem:[#allocation7_spill] sm:$0xff] %v6191_v41  ;;  %v6196_v42 = vld [vmem:[%s8364_s3 + $0x40] ss:$8 sps:$4 sm:$0xff]   ;;  %v5425_v43 = vld [vmem:[%s8364_s3 + $0x134] ss:$8 sps:$4 sm:$0xff]   ;;  %v8442_v13 = vmov 0 }
  0x7c   :  { %1925 = vmatpush1.bf16.msra.mxu1 %v5411_v36  ;;  %1688 = vmatprep.subr.bf16.mxu0 %v6176_v37  ;;  %8426 = vst [vmem:[#allocation8_spill] sm:$0xff] %v6196_v42  ;;  %v5423_v44 = vld [vmem:[%s8364_s3 + $0x130] ss:$8 sps:$4 sm:$0xff]   ;;  %v6209_v45 = vld [vmem:[%s8364_s3 + $0x34] ss:$8 sps:$4 sm:$0xff]   ;;  %v8443_v13 = vsel %vm6340_vm1, 4294967295, %v8442_v13 }
  0x7d   :  { %1926 = vmatprep.subr.bf16.mxu1 %v5419_v39  ;;  %8427 = vst [vmem:[#allocation9_spill] sm:$0xff] %v6209_v45  ;;  %v6214_v46 = vld [vmem:[%s8364_s3 + $0x30] ss:$8 sps:$4 sm:$0xff]   ;;  %v5431_v47 = vld [vmem:[%s8364_s3 + $0x124] ss:$8 sps:$4 sm:$0xff]   ;;  %8444 = vst [vmem:[#allocation24_spill] sm:$0xff] %v8443_v13 }
  0x7e   :  { %8428 = vst [vmem:[#allocation10_spill] sm:$0xff] %v6214_v46  ;;  %v5429_v48 = vld [vmem:[%s8364_s3 + $0x120] ss:$8 sps:$4 sm:$0xff]   ;;  %v6227_v49 = vld [vmem:[%s8364_s3 + $0x24] ss:$8 sps:$4 sm:$0xff]   ;;  %v8371_v16 = vmov 0.0  }
  0x7f   :  { %1689 = vmatpush1.bf16.msra.mxu0 %v5414_v38  ;;  %8429 = vst [vmem:[#allocation11_spill] sm:$0xff] %v6227_v49  ;;  %v6232_v50 = vld [vmem:[%s8364_s3 + $0x20] ss:$8 sps:$4 sm:$0xff]   ;;  %v5437_v51 = vld [vmem:[%s8364_s3 + $0x114] ss:$8 sps:$4 sm:$0xff]   ;;  %vm371_vm2 = vcmask 1046528  }
  0x80   :  { %1927 = vmatpush1.bf16.msra.mxu1 %v5417_v40  ;;  %1690 = vmatprep.subr.bf16.mxu0 %v6191_v41  ;;  %8430 = vst [vmem:[#allocation12_spill] sm:$0xff] %v6232_v50  ;;  %v5435_v52 = vld [vmem:[%s8364_s3 + $0x110] ss:$8 sps:$4 sm:$0xff]   ;;  %v6245_v53 = vld [vmem:[%s8364_s3 + $0x14] ss:$8 sps:$4 sm:$0xff]   ;;  %vm3371_vm3 = vcmask 1041409  }
  0x81   :  { %1928 = vmatprep.subr.bf16.mxu1 %v5425_v43  ;;  %8431 = vst [vmem:[#allocation13_spill] sm:$0xff] %v6245_v53  ;;  %v6250_v54 = vld [vmem:[%s8364_s3 + $0x10] ss:$8 sps:$4 sm:$0xff]   ;;  %v5443_v55 = vld [vmem:[%s8364_s3 + $0x104] ss:$8 sps:$4 sm:$0xff]   ;;  %vm3462_vm4 = vcmask 785408  }
  0x82   :  { %8432 = vst [vmem:[#allocation14_spill] sm:$0xff] %v6250_v54  ;;  %v5441_v56 = vld [vmem:[%s8364_s3 + $0x100] ss:$8 sps:$4 sm:$0xff]   ;;  %v6263_v57 = vld [vmem:[%s8364_s3 + $0x4] ss:$8 sps:$4 sm:$0xff]   ;;  %vm5854_vm5 = vmmov 0  }
  0x83   :  { %1691 = vmatpush1.bf16.msra.mxu0 %v6196_v42  ;;  %8433 = vst [vmem:[#allocation15_spill] sm:$0xff] %v6263_v57  ;;  %v6268_v58 = vld [vmem:[%s8364_s3] ss:$8 sps:$4 sm:$0xff]   ;;  %v5449_v59 = vld [vmem:[%s8364_s3 + $0x1f4] ss:$8 sps:$4 sm:$0xff]   ;;  %s5855_s10 = smov [#allocation3]  }
  0x84   :  { %1929 = vmatpush1.bf16.msra.mxu1 %v5423_v44  ;;  %1692 = vmatprep.subr.bf16.mxu0 %v6209_v45  ;;  %8434 = vst [vmem:[#allocation16_spill] sm:$0xff] %v6268_v58  ;;  %v5447_v60 = vld [vmem:[%s8364_s3 + $0x1f0] ss:$8 sps:$4 sm:$0xff]   ;;  %v6281_v61 = vld [vmem:[%s8364_s3 + $0xf4] ss:$8 sps:$4 sm:$0xff]   ;;  %s4598_s11 = sshll.u32 %s5855_s10, 4  ;;  %s4599_s11 = int_to_ptr.vmem [resolvable:$true] %s4598_s11 }
  0x85   :  { %1930 = vmatprep.subr.bf16.mxu1 %v5431_v47  ;;  %8435 = vst [vmem:[#allocation17_spill] sm:$0xff] %v6281_v61  ;;  %v6286_v62 = vld [vmem:[%s8364_s3 + $0xf0] ss:$8 sps:$4 sm:$0xff]   ;;  %v5455_v63 = vld [vmem:[%s8364_s3 + $0x1e4] ss:$8 sps:$4 sm:$0xff]   ;;  %p5834_p1 = scmp.lt.s32.totalorder %s4599_s11, %s4599_s11 }
  0x86   :  { %8436 = vst [vmem:[#allocation18_spill] sm:$0xff] %v6286_v62  ;;  %v5453_v0 = vld [vmem:[%s8364_s3 + $0x1e0] ss:$8 sps:$4 sm:$0xff]   ;;  %v6299_v1 = vld [vmem:[%s8364_s3 + $0xe4] ss:$8 sps:$4 sm:$0xff]  }
  0x87   :  { %1693 = vmatpush1.bf16.msra.mxu0 %v6214_v46  ;;  %8437 = vst [vmem:[#allocation19_spill] sm:$0xff] %v6299_v1  ;;  %v6304_v3 = vld [vmem:[%s8364_s3 + $0xe0] ss:$8 sps:$4 sm:$0xff]   ;;  %v5461_v4 = vld [vmem:[%s8364_s3 + $0x1d4] ss:$8 sps:$4 sm:$0xff]  }
  0x88   :  { %1931 = vmatpush1.bf16.msra.mxu1 %v5429_v48  ;;  %1694 = vmatprep.subr.bf16.mxu0 %v6227_v49  ;;  %8438 = vst [vmem:[#allocation20_spill] sm:$0xff] %v6304_v3  ;;  %v5459_v5 = vld [vmem:[%s8364_s3 + $0x1d0] ss:$8 sps:$4 sm:$0xff]   ;;  %v6317_v6 = vld [vmem:[%s8364_s3 + $0xd4] ss:$8 sps:$4 sm:$0xff]  }
  0x89   :  { %1932 = vmatprep.subr.bf16.mxu1 %v5437_v51  ;;  %8439 = vst [vmem:[#allocation21_spill] sm:$0xff] %v6317_v6  ;;  %v6322_v7 = vld [vmem:[%s8364_s3 + $0xd0] ss:$8 sps:$4 sm:$0xff]   ;;  %v5467_v8 = vld [vmem:[%s8364_s3 + $0x1c4] ss:$8 sps:$4 sm:$0xff]  }
  0x8a   :  { %8440 = vst [vmem:[#allocation22_spill] sm:$0xff] %v6322_v7  ;;  %v5465_v10 = vld [vmem:[%s8364_s3 + $0x1c0] ss:$8 sps:$4 sm:$0xff]   ;;  %v6335_v11 = vld [vmem:[%s8364_s3 + $0xc4] ss:$8 sps:$4 sm:$0xff]  }
  0x8b   :  { %1695 = vmatpush1.bf16.msra.mxu0 %v6232_v50  ;;  %8441 = vst [vmem:[#allocation23_spill] sm:$0xff] %v6335_v11  ;;  %v6347_v14 = vld [vmem:[%s8364_s3 + $0xc0] ss:$8 sps:$4 sm:$0xff]   ;;  %v5473_v15 = vld [vmem:[%s8364_s3 + $0x1b4] ss:$8 sps:$4 sm:$0xff]  }
  0x8c   :  { %1933 = vmatpush1.bf16.msra.mxu1 %v5435_v52  ;;  %1696 = vmatprep.subr.bf16.mxu0 %v6245_v53  ;;  %8445 = vst [vmem:[#allocation25_spill] sm:$0xff] %v6347_v14  ;;  %1160 = vst.msk [vmem:[#allocation2 + $0x17] ss:$8 sm:$0x3] %vm6340_vm1, %v8371_v16  ;;  %v5471_v18 = vld [vmem:[%s8364_s3 + $0x1b0] ss:$8 sps:$4 sm:$0xff]  }
  0x8d   :  { %1934 = vmatprep.subr.bf16.mxu1 %v5443_v55  ;;  %1163 = vst.msk [vmem:[#allocation2 + $0x37] ss:$8 sm:$0x3] %vm6340_vm1, %v8371_v16  ;;  %1153 = vst.msk [vmem:[#allocation2] ss:$8 sm:$0x3] %vm6340_vm1, %v8371_v16 }
  0x8e   :  { %1156 = vst.msk [vmem:[#allocation2 + $0x20] ss:$8 sm:$0x3] %vm6340_vm1, %v8371_v16  ;;  %v6372_v19 = vld [vmem:[%s8364_s3 + $0xb4] ss:$8 sps:$4 sm:$0xff]  }
  0x8f   :  { %1697 = vmatpush1.bf16.msra.mxu0 %v6250_v54  ;;  %8446 = vst [vmem:[#allocation26_spill] sm:$0xff] %v6372_v19  ;;  %v6379_v22 = vld [vmem:[%s8364_s3 + $0xb0] ss:$8 sps:$4 sm:$0xff]   ;;  %v5479_v23 = vld [vmem:[%s8364_s3 + $0x1a4] ss:$8 sps:$4 sm:$0xff]  }
  0x90   :  { %1935 = vmatpush1.bf16.msra.mxu1 %v5441_v56  ;;  %1698 = vmatprep.subr.bf16.mxu0 %v6263_v57  ;;  %8447 = vst [vmem:[#allocation27_spill] sm:$0xff] %v6379_v22  ;;  %v5477_v26 = vld [vmem:[%s8364_s3 + $0x1a0] ss:$8 sps:$4 sm:$0xff]   ;;  %v6394_v28 = vld [vmem:[%s8364_s3 + $0xa4] ss:$8 sps:$4 sm:$0xff]  }
  0x91   :  { %1936 = vmatprep.subr.bf16.mxu1 %v5449_v59  ;;  %8448 = vst [vmem:[#allocation28_spill] sm:$0xff] %v6394_v28  ;;  %v6399_v32 = vld [vmem:[%s8364_s3 + $0xa0] ss:$8 sps:$4 sm:$0xff]   ;;  %v5485_v34 = vld [vmem:[%s8364_s3 + $0x194] ss:$8 sps:$4 sm:$0xff]  }
  0x92   :  { %8449 = vst [vmem:[#allocation29_spill] sm:$0xff] %v6399_v32  ;;  %v5483_v38 = vld [vmem:[%s8364_s3 + $0x190] ss:$8 sps:$4 sm:$0xff]   ;;  %v6419_v40 = vld [vmem:[%s8364_s3 + $0x94] ss:$8 sps:$4 sm:$0xff]  }
  0x93   :  { %1699 = vmatpush1.bf16.msra.mxu0 %v6268_v58  ;;  %v6414_v39 = vld [vmem:[%s8364_s3 + $0x90] ss:$8 sps:$4 sm:$0xff]   ;;  %8451 = vst [vmem:[#allocation31_spill] sm:$0xff] %v6419_v40  ;;  %v5491_v44 = vld [vmem:[%s8364_s3 + $0x184] ss:$8 sps:$4 sm:$0xff]  }
  0x94   :  { %1937 = vmatpush2.bf16.msra.mxu1 %v5447_v60  ;;  %1700 = vmatprep.subr.bf16.mxu0 %v6281_v61  ;;  %8450 = vst [vmem:[#allocation30_spill] sm:$0xff] %v6414_v39  ;;  %v5489_v51 = vld [vmem:[%s8364_s3 + $0x180] ss:$8 sps:$4 sm:$0xff]   ;;  %v6432_v52 = vld [vmem:[%s8364_s3 + $0x84] ss:$8 sps:$4 sm:$0xff]  }
  0x95   :  { %1938 = vmatprep.subr.bf16.mxu1 %v5455_v63  ;;  %8452 = vst [vmem:[#allocation32_spill] sm:$0xff] %v6432_v52  ;;  %v6439_v63 = vld [vmem:[%s8364_s3 + $0x80] ss:$8 sps:$4 sm:$0xff]   ;;  %v5853_v41 = vmov 1966171168  }
  0x96   :  { %8453 = vst [vmem:[#allocation33_spill] sm:$0xff] %v6439_v63  ;;  %v1171_v37 = vunpack.c.l.s4 %v5853_v41 }
  0x97   :  { %1701 = vmatpush2.bf16.msra.mxu0 %v6286_v62 }
  0x98   :  { %1939 = vmatpush2.bf16.msra.mxu1 %v5453_v0  ;;  %1702 = vmatprep.subr.bf16.mxu0 %v6299_v1 }
  0x99   :  { %1940 = vmatprep.subr.bf16.mxu1 %v5461_v4 }
  0x9b   :  { %1703 = vmatpush2.bf16.msra.mxu0 %v6304_v3 }
  0x9c   :  { %1941 = vmatpush2.bf16.msra.mxu1 %v5459_v5  ;;  %1704 = vmatprep.subr.bf16.mxu0 %v6317_v6 }
  0x9d   :  { %1942 = vmatprep.subr.bf16.mxu1 %v5467_v8 }
  0x9f   :  { %1705 = vmatpush2.bf16.msra.mxu0 %v6322_v7 }
  0xa0   :  { %1943 = vmatpush2.bf16.msra.mxu1 %v5465_v10  ;;  %1706 = vmatprep.subr.bf16.mxu0 %v6335_v11 }
  0xa1   :  { %1944 = vmatprep.subr.bf16.mxu1 %v5473_v15 }
  0xa3   :  { %1707 = vmatpush2.bf16.msra.mxu0 %v6347_v14 }
  0xa4   :  { %1945 = vmatpush2.bf16.msra.mxu1 %v5471_v18  ;;  %1708 = vmatprep.subr.bf16.mxu0 %v6372_v19 }
  0xa5   :  { %1946 = vmatprep.subr.bf16.mxu1 %v5479_v23 }
  0xa7   :  { %1709 = vmatpush2.bf16.msra.mxu0 %v6379_v22 }
  0xa8   :  { %1947 = vmatpush2.bf16.msra.mxu1 %v5477_v26  ;;  %1710 = vmatprep.subr.bf16.mxu0 %v6394_v28 }
  0xa9   :  { %1948 = vmatprep.subr.bf16.mxu1 %v5485_v34 }
  0xab   :  { %1711 = vmatpush2.bf16.msra.mxu0 %v6399_v32 }
  0xac   :  { %1949 = vmatpush2.bf16.msra.mxu1 %v5483_v38  ;;  %1712 = vmatprep.subr.bf16.mxu0 %v6419_v40 }
  0xad   :  { %1950 = vmatprep.subr.bf16.mxu1 %v5491_v44 }
  0xaf   :  { %1713 = vmatpush2.bf16.msra.mxu0 %v6414_v39 }
  0xb0   :  { %1714 = vmatprep.subr.bf16.mxu0 %v6432_v52  ;;  %1951 = vmatpush2.bf16.msra.mxu1 %v5489_v51 }
  0xb1   :  { %2219 = vmatprep.subr.bf16.mxu1 %v6149_v29 }
  0xb3   :  { %1715 = vmatpush2.bf16.msra.mxu0 %v6439_v63 }
  0xce   :  { %v6337_v12 = vpop.f32.mrf.mxu1 }
  0xd0   :  { %v142_v17 = vpop.f32.mrf.mxu1  ;;  %v344_v21 = vpop.f32.mrf.mxu0 }
  0xd1   :  { %v372_v27 = vrot.slane %v344_v21, 1 }
  0xd2   :  { %v6374_v20 = vpop.f32.mrf.mxu1  ;;  %v346_v25 = vpop.f32.mrf.mxu0 }
  0xd3   :  { %v375_v55 = vrot.slane %v346_v25, 1 }
  0xd4   :  { %v6385_v24 = vpop.f32.mrf.mxu1  ;;  %v348_v31 = vpop.f32.mrf.mxu0 }
  0xd5   :  { %v373_v33 = vrot.slane %v348_v31, 1 }
  0xd6   :  { %v150_v30 = vpop.f32.mrf.mxu1  ;;  %v6405_v36 = vpop.f32.mrf.mxu0 }
  0xd7   :  { %v374_v43 = vsel %vm371_vm2, %v372_v27, %v373_v33  ;;  %v8375_v59 = vrot.slane %v6405_v36, 1 }
  0xd8   :  { %v152_v35 = vpop.f32.mrf.mxu1  ;;  %v354_v48 = vpop.f32.mrf.mxu0 }
  0xd9   :  { %v378_v0 = vrot.slane %v354_v48, 1  ;;  %v377_v21 = vsel %vm371_vm2, %v375_v55, %v8375_v59 }
  0xda   :  { %v154_v47 = vpop.f32.mrf.mxu1  ;;  %v356_v60 = vpop.f32.mrf.mxu0 }
  0xdb   :  { %v381_v10 = vrot.slane %v356_v60, 1 }
  0xdc   :  { %v156_v56 = vpop.f32.mrf.mxu1  ;;  %v358_v5 = vpop.f32.mrf.mxu0 }
  0xdd   :  { %v379_v15 = vrot.slane %v358_v5, 1 }
  0xde   :  { %v246_v4 = vpop.f32.mrf.mxu1  ;;  %v360_v23 = vpop.f32.mrf.mxu0 }
  0xdf   :  { %v265_v8 = vadd.f32 %v246_v4, %v6337_v12  ;;  %v382_v27 = vrot.slane %v360_v23, 1  ;;  %v380_v31 = vsel %vm371_vm2, %v378_v0, %v379_v15  ;;  %v6454_v12 = vld [vmem:[%s8364_s3 + $0x274] ss:$8 sps:$4 sm:$0xff]  }
  0xe0   :  { %v248_v18 = vpop.f32.mrf.mxu1  ;;  %8454 = vst [vmem:[#allocation34_spill] sm:$0xff] %v6454_v12  ;;  %v487_v34 = vpop.f32.mrf.mxu0  ;;  %2160 = vmatprep.subr.bf16.mxu0 %v6454_v12 }
  0xe1   :  { %v6448_v25 = vadd.f32 %v374_v43, %v265_v8  ;;  %v266_v26 = vadd.f32 %v248_v18, %v142_v17  ;;  %v383_v48 = vsel %vm371_vm2, %v381_v10, %v382_v27 }
  0xe2   :  { %v250_v29 = vpop.f32.mrf.mxu1  ;;  %v489_v17 = vpop.f32.mrf.mxu0 }
  0xe3   :  { %v6456_v38 = vadd.f32 %v377_v21, %v266_v26  ;;  %v267_v44 = vadd.f32 %v250_v29, %v6374_v20  ;;  %v517_v12 = vrot.slane %v489_v17, 1 }
  0xe4   :  { %v252_v43 = vpop.f32.mrf.mxu1  ;;  %v6466_v0 = vpop.f32.mrf.mxu0 }
  0xe5   :  { %v6461_v51 = vadd.f32 %v373_v33, %v267_v44  ;;  %v6464_v55 = vadd.f32 %v252_v43, %v6385_v24 }
  0xe6   :  { %v256_v60 = vpop.f32.mrf.mxu1  ;;  %v6468_v8 = vpop.f32.mrf.mxu0 }
  0xe7   :  { %v269_v4 = vadd.f32 %v256_v60, %v150_v30  ;;  %v8394_v63 = vrot.slane %v6468_v8, 1 }
  0xe8   :  { %v258_v5 = vpop.f32.mrf.mxu1  ;;  %v497_v21 = vpop.f32.mrf.mxu0 }
  0xe9   :  { %v6470_v18 = vadd.f32 %v380_v31, %v269_v4  ;;  %v270_v20 = vadd.f32 %v258_v5, %v152_v35  ;;  %v520_v14 = vrot.slane %v497_v21, 1 }
  0xea   :  { %v260_v10 = vpop.f32.mrf.mxu1  ;;  %v499_v29 = vpop.f32.mrf.mxu0 }
  0xeb   :  { %v6472_v23 = vadd.f32 %v383_v48, %v270_v20  ;;  %v271_v26 = vadd.f32 %v260_v10, %v154_v47 }
  0xec   :  { %v262_v33 = vpop.f32.mrf.mxu1  ;;  %v501_v16 = vpop.f32.mrf.mxu0 }
  0xed   :  { %v6474_v44 = vadd.f32 %v379_v15, %v271_v26  ;;  %v272_v24 = vadd.f32 %v262_v33, %v156_v56  ;;  %v514_v26 = vrot.slane %v487_v34, 1  ;;  %v8391_v33 = vrot.slane %v6466_v0, 1 }
  0xee   :  { %v434_v43 = vpop.f32.mrf.mxu1  ;;  %v503_v60 = vpop.f32.mrf.mxu0  ;;  %v519_v34 = vsel %vm371_vm2, %v517_v12, %v8394_v63  ;;  %v521_v6 = vrot.slane %v501_v16, 1 }
  0xef   :  { %v6476_v2 = vadd.f32 %v382_v27, %v272_v24  ;;  %v516_v40 = vsel %vm371_vm2, %v514_v26, %v8391_v33  ;;  %v524_v21 = vrot.slane %v503_v60, 1 }
  0xf0   :  { %v436_v30 = vpop.f32.mrf.mxu1  ;;  %v6480_v31 = vpop.f32.mrf.mxu0  ;;  %v534_v19 = vadd.f32 %v516_v40, %v434_v43  ;;  %v523_v40 = vrot.slane %v499_v29, 1 }
  0xf1   :  { %8455 = vst [vmem:[#allocation35_spill] sm:$0xff] %v6476_v2  ;;  %v535_v1 = vadd.f32 %v519_v34, %v436_v30 }
  0xf2   :  { %v6478_v59 = vpop.f32.mrf.mxu1  ;;  %v6484_v48 = vpop.f32.mrf.mxu0  ;;  %v525_v60 = vsel %vm371_vm2, %v523_v40, %v524_v21 }
  0xf4   :  { %v6482_v35 = vpop.f32.mrf.mxu1  ;;  %v6486_v4 = vpop.f32.mrf.mxu0 }
  0xf6   :  { %v444_v47 = vpop.f32.mrf.mxu1  ;;  %v6488_v5 = vpop.f32.mrf.mxu0 }
  0xf8   :  { %v446_v15 = vpop.f32.mrf.mxu1  ;;  %v6490_v20 = vpop.f32.mrf.mxu0 }
  0xf9   :  { %v539_v54 = vadd.f32 %v525_v60, %v446_v15 }
  0xfa   :  { %v448_v56 = vpop.f32.mrf.mxu1  ;;  %v6492_v10 = vpop.f32.mrf.mxu0 }
  0xfc   :  { %v450_v27 = vpop.f32.mrf.mxu1  ;;  %v6495_v9 = vpop.f32.mrf.mxu0 }
  0xfe   :  { %v576_v24 = vpop.f32.mrf.mxu1  ;;  %v6498_v39 = vpop.f32.mrf.mxu0 }
  0xff   :  { %v603_v22 = vrot.slane %v576_v24, 1 }
 0x100   :  { %v578_v52 = vpop.f32.mrf.mxu1  ;;  %v6505_v28 = vpop.f32.mrf.mxu0 }
 0x101   :  { %v606_v3 = vrot.slane %v578_v52, 1  ;;  %v846_v50 = vrot.slane %v6505_v28, 1 }
 0x102   :  { %v6503_v32 = vpop.f32.mrf.mxu1  ;;  %v6513_v7 = vpop.f32.mrf.mxu0 }
 0x103   :  { %v8396_v17 = vrot.slane %v6503_v32, 1  ;;  %v849_v49 = vrot.slane %v6513_v7, 1 }
 0x104   :  { %v6511_v11 = vpop.f32.mrf.mxu1  ;;  %v6521_v24 = vpop.f32.mrf.mxu0 }
 0x105   :  { %v605_v26 = vsel %vm371_vm2, %v603_v22, %v8396_v17  ;;  %v8395_v33 = vrot.slane %v6511_v11, 1  ;;  %v847_v46 = vrot.slane %v6521_v24, 1 }
 0x106   :  { %v6519_v62 = vadd.f32 %v605_v26, %v534_v19  ;;  %v586_v12 = vpop.f32.mrf.mxu1  ;;  %v6528_v63 = vpop.f32.mrf.mxu0  ;;  %v522_v19 = vsel %vm371_vm2, %v520_v14, %v521_v6  ;;  %v540_v26 = vadd.f32 %v521_v6, %v448_v56 }
 0x107   :  { %v608_v43 = vsel %vm371_vm2, %v606_v3, %v8395_v33  ;;  %v609_v3 = vrot.slane %v586_v12, 1  ;;  %v541_v33 = vadd.f32 %v524_v21, %v450_v27  ;;  %v850_v45 = vrot.slane %v6528_v63, 1 }
 0x108   :  { %v6526_v16 = vadd.f32 %v608_v43, %v535_v1  ;;  %v588_v52 = vpop.f32.mrf.mxu1  ;;  %v6533_v34 = vpop.f32.mrf.mxu0  ;;  %v538_v43 = vadd.f32 %v522_v19, %v444_v47  ;;  %v8461_v21 = vrot.slane %v6466_v0, 1  ;;  %v848_v63 = vsel %vm371_vm2, %v846_v50, %v847_v46 }
 0x109   :  { %v612_v58 = vrot.slane %v588_v52, 1  ;;  %v851_v2 = vsel %vm371_vm2, %v849_v49, %v850_v45  ;;  %v8464_v0 = vrot.slane %v6468_v8, 1  ;;  %v852_v49 = vrot.slane %v6533_v34, 1 }
 0x10a   :  { %v590_v30 = vpop.f32.mrf.mxu1  ;;  %v6538_v61 = vpop.f32.mrf.mxu0  ;;  %v536_v28 = vadd.f32 %v8461_v21, %v6478_v59  ;;  %v8466_v8 = vrot.slane %v6405_v36, 1 }
 0x10b   :  { %v610_v1 = vrot.slane %v590_v30, 1  ;;  %v537_v59 = vadd.f32 %v8464_v0, %v6482_v35  ;;  %v8467_v35 = vrot.slane %v6511_v11, 1 }
 0x10c   :  { %v592_v17 = vpop.f32.mrf.mxu1  ;;  %v6550_v27 = vpop.f32.mrf.mxu0 }
 0x10d   :  { %v611_v22 = vsel %vm371_vm2, %v609_v3, %v610_v1  ;;  %v6541_v14 = vadd.f32 %v610_v1, %v540_v26  ;;  %v613_v57 = vrot.slane %v592_v17, 1  ;;  %v853_v21 = vrot.slane %v6550_v27, 1 }
 0x10e   :  { %v6543_v53 = vadd.f32 %v611_v22, %v538_v43  ;;  %v758_v29 = vpop.f32.mrf.mxu1  ;;  %v6560_v22 = vpop.f32.mrf.mxu0  ;;  %v8458_v43 = vlaneseq }
 0x10f   :  { %8456 = vst [vmem:[#allocation36_spill] sm:$0xff] %v6541_v14  ;;  %v614_v56 = vsel %vm371_vm2, %v612_v58, %v613_v57  ;;  %v6548_v47 = vadd.f32 %v613_v57, %v541_v33  ;;  %v777_v7 = vadd.f32 %v758_v29, %v6480_v31  ;;  %v8465_v31 = vrot.slane %v6503_v32, 1 }
 0x110   :  { %v6552_v12 = vadd.f32 %v614_v56, %v539_v54  ;;  %v760_v40 = vpop.f32.mrf.mxu1  ;;  %v6562_v33 = vpop.f32.mrf.mxu0  ;;  %v6575_v56 = vshrl.u32 %v8458_v43, 7  ;;  %v1121_v43 = vld [vmem:[%s8363_s2] sm:$0x3]  ;;  %v395_v32 = vadd.f32 %v8466_v8, %v6464_v55 }
 0x111   :  { %8457 = vst [vmem:[#allocation37_spill] sm:$0xff] %v6548_v47  ;;  %v778_v24 = vadd.f32 %v760_v40, %v6484_v48  ;;  %v625_v29 = vadd.f32 %v8465_v31, %v536_v28  ;;  %v1172_v40 = vunpack.c.0.s8 %v1171_v37  ;;  %v626_v28 = vadd.f32 %v8467_v35, %v537_v59 }
 0x112   :  { %v762_v17 = vpop.f32.mrf.mxu1  ;;  %v6564_v30 = vpop.f32.mrf.mxu0  ;;  %8459 = vst [vmem:[#allocation38_spill] sm:$0xff] %v6575_v56  ;;  %v8463_v41 = vsub.s32 0, %v6575_v56  ;;  %v866_v37 = vadd.f32 %v848_v63, %v777_v7  ;;  %v996_v27 = vrot.slane %v6562_v33, 1  ;;  %v854_v7 = vsel %vm371_vm2, %v852_v49, %v853_v21 }
 0x113   :  { %v867_v0 = vadd.f32 %v851_v2, %v778_v24  ;;  %v999_v36 = vrot.slane %v6564_v30, 1  ;;  %v633_v2 = vmax.f32 %v6461_v51, %v625_v29  ;;  %v634_v33 = vmax.f32 %v395_v32, %v626_v28 }
 0x114   :  { %v764_v58 = vpop.f32.mrf.mxu1  ;;  %v6570_v3 = vpop.f32.mrf.mxu0  ;;  %v6607_v14 = vrot.slane %v1121_v43, %v8463_v41  ;;  %v8470_v51 = vsub.s32 1, %v6575_v56  ;;  %v8471_v30 = vmax.f32 %v6456_v38, %v6526_v16 }
 0x115   :  { %v997_v50 = vrot.slane %v6570_v3, 1 }
 0x116   :  { %v768_v57 = vpop.f32.mrf.mxu1  ;;  %v6579_v6 = vpop.f32.mrf.mxu0  ;;  %v875_v3 = vmax.f32 %v8471_v30, %v867_v0 }
 0x117   :  { %v1000_v11 = vrot.slane %v6579_v6, 1  ;;  %v6647_v6 = vsub.s32 %v1172_v40, %v6575_v56  ;;  %v7513_v56 = vld [vmem:[%s8364_s3 + $0x484] ss:$8 sps:$4 sm:$0xff]  }
 0x118   :  { %v770_v19 = vpop.f32.mrf.mxu1  ;;  %v6593_v13 = vpop.f32.mrf.mxu0 }
 0x11a   :  { %v772_v54 = vpop.f32.mrf.mxu1  ;;  %v6621_v41 = vpop.f32.mrf.mxu0 }
 0x11c   :  { %v6566_v60 = vpop.f32.mrf.mxu1 }
 0x11d   :  { %v784_v38 = vadd.f32 %v6566_v60, %v6498_v39 }
 0x11e   :  { %v6568_v26 = vpop.f32.mrf.mxu1 }
 0x120   :  { %v6572_v1 = vpop.f32.mrf.mxu1 }
 0x122   :  { %v6577_v15 = vpop.f32.mrf.mxu1 }
 0x123   :  { %v1018_v49 = vadd.f32 %v997_v50, %v6577_v15  ;;  %v1005_v15 = vrot.slane %v6621_v41, 1 }
 0x124   :  { %v6581_v52 = vpop.f32.mrf.mxu1 }
 0x126   :  { %v6588_v42 = vpop.f32.mrf.mxu1 }
 0x127   :  { %8460 = vst [vmem:[#allocation39_spill] sm:$0xff] %v6588_v42  ;;  %v779_v42 = vadd.f32 %v762_v17, %v6486_v4  ;;  %v855_v4 = vrot.slane %v6538_v61, 1  ;;  %v780_v61 = vadd.f32 %v764_v58, %v6488_v5  ;;  %v781_v17 = vadd.f32 %v768_v57, %v6490_v20  ;;  %v983_v58 = vpop.f32.mrf.mxu0 }
 0x128   :  { %v6600_v47 = vpop.f32.mrf.mxu1  ;;  %v783_v5 = vadd.f32 %v772_v54, %v6495_v9  ;;  %v8469_v20 = vmax.f32 %v6448_v25, %v6519_v62  ;;  %v998_v54 = vsel %vm371_vm2, %v996_v27, %v997_v50  ;;  %v1002_v62 = vrot.slane %v6593_v13, 1 }
 0x129   :  { %8462 = vst [vmem:[#allocation40_spill] sm:$0xff] %v6600_v47  ;;  %v868_v34 = vadd.f32 %v847_v46, %v779_v42  ;;  %v782_v47 = vadd.f32 %v770_v19, %v6492_v10  ;;  %v8468_v42 = vrot.slane %v6560_v22, 1  ;;  %v6651_v19 = vrot.slane %v1121_v43, %v8470_v51  ;;  %v985_v43 = vpop.f32.mrf.mxu0 }
 0x12a   :  { %v6614_v48 = vpop.f32.mrf.mxu1  ;;  %v874_v10 = vmax.f32 %v8469_v20, %v866_v37  ;;  %v869_v9 = vadd.f32 %v850_v45, %v780_v61  ;;  %v870_v63 = vadd.f32 %v854_v7, %v781_v17  ;;  %v1001_v25 = vsel %vm371_vm2, %v999_v36, %v1000_v11 }
 0x12b   :  { %v857_v46 = vsel %vm371_vm2, %v855_v4, %v8468_v42  ;;  %v876_v24 = vmax.f32 %v633_v2, %v868_v34  ;;  %v872_v40 = vadd.f32 %v853_v21, %v783_v5  ;;  %v1016_v45 = vadd.f32 %v998_v54, %v6568_v26 }
 0x12c   :  { %v6628_v31 = vpop.f32.mrf.mxu1  ;;  %v871_v59 = vadd.f32 %v857_v46, %v782_v47  ;;  %v1003_v16 = vrot.slane %v983_v58, 1  ;;  %v1019_v17 = vadd.f32 %v1000_v11, %v6581_v52  ;;  %v1017_v21 = vadd.f32 %v1001_v25, %v6572_v1 }
 0x12d   :  { %v1006_v50 = vrot.slane %v985_v43, 1  ;;  %v877_v34 = vmax.f32 %v634_v33, %v869_v9  ;;  %v8472_v52 = vmax.f32 %v6470_v18, %v6543_v53  ;;  %v8473_v27 = vmax.f32 %v6472_v23, %v6552_v12  ;;  %v8479_v43 = vld [vmem:[#allocation35_spill] sm:$0xff] }
 0x12e   :  { %v1058_v55 = vpop.f32.mrf.mxu1  ;;  %v1004_v42 = vsel %vm371_vm2, %v1002_v62, %v1003_v16  ;;  %v8476_v53 = vrot.slane %v6560_v22, 1  ;;  %v1022_v20 = vadd.f32 %v1003_v16, %v6614_v48  ;;  %v8477_v51 = vld [vmem:[#allocation39_spill] sm:$0xff] }
 0x12f   :  { %v1085_v4 = vrot.slane %v1058_v55, 1  ;;  %v878_v61 = vmax.f32 %v8472_v52, %v870_v63  ;;  %v6674_v36 = vmax.f32 %v8473_v27, %v871_v59  ;;  %v8474_v55 = vld [vmem:[#allocation36_spill] sm:$0xff]  ;;  %v1007_v23 = vsel %vm371_vm2, %v1005_v15, %v1006_v50 }
 0x130   :  { %v1060_v57 = vpop.f32.mrf.mxu1  ;;  %v8475_v2 = vmax.f32 %v6474_v44, %v8474_v55  ;;  %v873_v18 = vadd.f32 %v8476_v53, %v784_v38  ;;  %v1020_v30 = vadd.f32 %v1004_v42, %v8477_v51 }
 0x131   :  { %v1088_v32 = vrot.slane %v1060_v57, 1 }
 0x132   :  { %v1062_v29 = vpop.f32.mrf.mxu1  ;;  %v6679_v7 = vmax.f32 %v8475_v2, %v872_v40 }
 0x133   :  { %v1086_v8 = vrot.slane %v1062_v29, 1 }
 0x134   :  { %v1064_v47 = vpop.f32.mrf.mxu1 }
 0x135   :  { %v1087_v13 = vsel %vm371_vm2, %v1085_v4, %v1086_v8  ;;  %v1107_v35 = vadd.f32 %v1086_v8, %v1018_v49  ;;  %v1089_v28 = vrot.slane %v1064_v47, 1  ;;  %v8480_v4 = vld [vmem:[#allocation37_spill] sm:$0xff]  ;;  %v1023_v47 = vadd.f32 %v1006_v50, %v6628_v31 }
 0x136   :  { %v1105_v37 = vadd.f32 %v1087_v13, %v1016_v45  ;;  %v1068_v0 = vpop.f32.mrf.mxu1  ;;  %v8481_v8 = vmax.f32 %v8479_v43, %v8480_v4 }
 0x137   :  { %v1115_v39 = vmax.f32 %v876_v24, %v1107_v35  ;;  %v1090_v60 = vsel %vm371_vm2, %v1088_v32, %v1089_v28  ;;  %v1108_v26 = vadd.f32 %v1089_v28, %v1019_v17 }
 0x138   :  { %v1113_v1 = vmax.f32 %v874_v10, %v1105_v37  ;;  %v1106_v11 = vadd.f32 %v1090_v60, %v1017_v21  ;;  %v1070_v41 = vpop.f32.mrf.mxu1  ;;  %v1091_v10 = vrot.slane %v1068_v0, 1  ;;  %v881_v38 = vmax.f32 %v8481_v8, %v873_v18 }
 0x139   :  { %v1135_v46 = vadd.f32 %v6607_v14, %v1115_v39  ;;  %v1116_v5 = vmax.f32 %v877_v34, %v1108_v26  ;;  %v1094_v54 = vrot.slane %v1070_v41, 1  ;;  %v6824_v41 = vld [vmem:[%s8364_s3 + $0x254] ss:$8 sps:$4 sm:$0xff]  }
 0x13a   :  { %v1133_v12 = vadd.f32 %v6607_v14, %v1113_v1  ;;  %v1114_v58 = vmax.f32 %v875_v3, %v1106_v11  ;;  %v1072_v33 = vpop.f32.mrf.mxu1  ;;  %v8478_v3 = vld [vmem:[#allocation40_spill] sm:$0xff] }
 0x13b   :  { %v1136_v44 = vadd.f32 %v6651_v19, %v1116_v5  ;;  %v1092_v57 = vrot.slane %v1072_v33, 1  ;;  %v1143_v24 = vmax.f32 %v1135_v46, 0.0  ;;  %v1021_v29 = vadd.f32 %v1007_v23, %v8478_v3 }
 0x13c   :  { %v1134_v9 = vadd.f32 %v6651_v19, %v1114_v58  ;;  %v1074_v22 = vpop.f32.mrf.mxu1  ;;  %v1141_v40 = vmax.f32 %v1133_v12, 0.0 }
 0x13d   :  { %v1144_v63 = vmax.f32 %v1136_v44, 0.0  ;;  %v1093_v59 = vsel %vm371_vm2, %v1091_v10, %v1092_v57  ;;  %v1111_v62 = vadd.f32 %v1092_v57, %v1022_v20  ;;  %v1095_v25 = vrot.slane %v1074_v22, 1 }
 0x13e   :  { %v1142_v48 = vmax.f32 %v1134_v9, 0.0  ;;  %v1109_v49 = vadd.f32 %v1093_v59, %v1020_v30 }
 0x13f   :  { %v1336_v45 = vcombine.low %v1143_v24, %v1144_v63  ;;  %v1418_v16 = vcombine.high %v1143_v24, %v1144_v63  ;;  %v1096_v17 = vsel %vm371_vm2, %v1094_v54, %v1095_v25  ;;  %v1119_v37 = vmax.f32 %v6679_v7, %v1111_v62 }
 0x140   :  { %v1169_v32 = vcombine.low %v1141_v40, %v1142_v48  ;;  %v1250_v13 = vcombine.high %v1141_v40, %v1142_v48  ;;  %v1110_v35 = vadd.f32 %v1096_v17, %v1021_v29  ;;  %v1117_v15 = vmax.f32 %v878_v61, %v1109_v49 }
 0x141   :  { %v1343_v28 = vrot.slane %v1336_v45, %v6647_v6  ;;  %v1425_v21 = vrot.slane %v1418_v16, %v6647_v6  ;;  %v1112_v39 = vadd.f32 %v1095_v25, %v1023_v47  ;;  %v1139_v23 = vadd.f32 %v6607_v14, %v1119_v37 }
 0x142   :  { %v1176_v0 = vrot.slane %v1169_v32, %v6647_v6  ;;  %v1257_v34 = vrot.slane %v1250_v13, %v6647_v6  ;;  %v1118_v60 = vmax.f32 %v6674_v36, %v1110_v35  ;;  %v1137_v7 = vadd.f32 %v6607_v14, %v1117_v15 }
 0x143   :  { %v1350_v26 = vrot.slane %v1343_v28, %v6647_v6  ;;  %v1374_v31 = vcombine.high %v1343_v28, %v1343_v28  ;;  %v1432_v50 = vrot.slane %v1425_v21, %v6647_v6  ;;  %v1456_v52 = vcombine.high %v1425_v21, %v1425_v21 }
 0x144   :  { %v1183_v27 = vrot.slane %v1176_v0, %v6647_v6  ;;  %v1206_v1 = vcombine.high %v1176_v0, %v1176_v0  ;;  %v1264_v61 = vrot.slane %v1257_v34, %v6647_v6  ;;  %v1288_v11 = vcombine.high %v1257_v34, %v1257_v34 }
 0x145   :  { %1369 = vst.msk [vmem:[#allocation2 + $0x14] ss:$8 sm:$0x3] %vm6340_vm1, %v1350_v26  ;;  %v1381_v55 = vrot.slane %v1374_v31, %v6647_v6  ;;  %v1398_v2 = vcombine.high %v1350_v26, %v1350_v26  ;;  %1451 = vst.msk [vmem:[#allocation2 + $0x16] ss:$8 sm:$0x3] %vm6340_vm1, %v1432_v50  ;;  %v1463_v36 = vrot.slane %v1456_v52, %v6647_v6 }
 0x146   :  { %1201 = vst.msk [vmem:[#allocation2 + $0x10] ss:$8 sm:$0x3] %vm6340_vm1, %v1183_v27  ;;  %v1213_v42 = vrot.slane %v1206_v1, %v6647_v6  ;;  %v1230_v46 = vcombine.high %v1183_v27, %v1183_v27  ;;  %1283 = vst.msk [vmem:[#allocation2 + $0x12] ss:$8 sm:$0x3] %vm6340_vm1, %v1264_v61  ;;  %v1295_v5 = vrot.slane %v1288_v11, %v6647_v6 }
 0x147   :  { %v1312_v53 = vcombine.high %v1264_v61, %v1264_v61  ;;  %1393 = vst.msk [vmem:[#allocation2 + $0x5] ss:$8 sm:$0x3] %vm6340_vm1, %v1381_v55  ;;  %1403 = vst.msk [vmem:[#allocation2 + $0x15] ss:$8 sm:$0x3] %vm6340_vm1, %v1398_v2  ;;  %v1408_v18 = vcombine.high %v1381_v55, %v1381_v55  ;;  %v1120_v12 = vmax.f32 %v881_v38, %v1112_v39 }
 0x148   :  { %1475 = vst.msk [vmem:[#allocation2 + $0x7] ss:$8 sm:$0x3] %vm6340_vm1, %v1463_v36  ;;  %v1138_v58 = vadd.f32 %v6651_v19, %v1118_v60  ;;  %1225 = vst.msk [vmem:[#allocation2 + $0x1] ss:$8 sm:$0x3] %vm6340_vm1, %v1213_v42  ;;  %v1240_v33 = vcombine.high %v1213_v42, %v1213_v42  ;;  %v1322_v20 = vcombine.high %v1295_v5, %v1295_v5 }
 0x149   :  { %1235 = vst.msk [vmem:[#allocation2 + $0x11] ss:$8 sm:$0x3] %vm6340_vm1, %v1230_v46  ;;  %1307 = vst.msk [vmem:[#allocation2 + $0x3] ss:$8 sm:$0x3] %vm6340_vm1, %v1295_v5  ;;  %v1140_v44 = vadd.f32 %v6651_v19, %v1120_v12 }
 0x14a   :  { %1317 = vst.msk [vmem:[#allocation2 + $0x13] ss:$8 sm:$0x3] %vm6340_vm1, %v1312_v53  ;;  %1413 = vst.msk [vmem:[#allocation2 + $0x6] ss:$8 sm:$0x3] %vm6340_vm1, %v1408_v18 }
 0x14b   :  { %v1145_v14 = vmax.f32 %v1137_v7, 0.0  ;;  %v1146_v10 = vmax.f32 %v1138_v58, 0.0  ;;  %1245 = vst.msk [vmem:[#allocation2 + $0x2] ss:$8 sm:$0x3] %vm6340_vm1, %v1240_v33  ;;  %v1147_v57 = vmax.f32 %v1139_v23, 0.0 }
 0x14c   :  { %1327 = vst.msk [vmem:[#allocation2 + $0x4] ss:$8 sm:$0x3] %vm6340_vm1, %v1322_v20  ;;  %v1148_v51 = vmax.f32 %v1140_v44, 0.0  ;;  %v6794_v50 = vld [vmem:[%s8364_s3 + $0x270] ss:$8 sps:$4 sm:$0xff]  }
 0x14d   :  { %v1184_v30 = vcombine.low %v1145_v14, %v1146_v10  ;;  %v1265_v24 = vcombine.high %v1145_v14, %v1146_v10  ;;  %v6802_v27 = vld [vmem:[%s8364_s3 + $0x264] ss:$8 sps:$4 sm:$0xff]   ;;  %v5793_v1 = vld [vmem:[%s8364_s3 + $0x70] ss:$8 sps:$4 sm:$0xff]   ;;  %v6815_v61 = vld [vmem:[%s8364_s3 + $0x260] ss:$8 sps:$4 sm:$0xff]  }
 0x14e   :  { %v1351_v22 = vcombine.low %v1147_v57, %v1148_v51  ;;  %v1433_v63 = vcombine.high %v1147_v57, %v1148_v51  ;;  %v5794_v11 = vld [vmem:[%s8364_s3 + $0x64] ss:$8 sps:$4 sm:$0xff]   ;;  %v5795_v55 = vld [vmem:[%s8364_s3 + $0x60] ss:$8 sps:$4 sm:$0xff]   ;;  %v6834_v36 = vld [vmem:[%s8364_s3 + $0x250] ss:$8 sps:$4 sm:$0xff]  }
 0x14f   :  { %v1191_v9 = vrot.slane %v1184_v30, %v6647_v6  ;;  %v1272_v54 = vrot.slane %v1265_v24, %v6647_v6  ;;  %v8483_v2 = vld [vmem:[#allocation6_spill] sm:$0xff]  ;;  %v5796_v42 = vld [vmem:[%s8364_s3 + $0x50] ss:$8 sps:$4 sm:$0xff]   ;;  %v6856_v53 = vld [vmem:[%s8364_s3 + $0x234] ss:$8 sps:$4 sm:$0xff]  }
 0x150   :  { %v1358_v3 = vrot.slane %v1351_v22, %v6647_v6  ;;  %v1440_v29 = vrot.slane %v1433_v63, %v6647_v6  ;;  %v6840_v7 = vld [vmem:[%s8364_s3 + $0x244] ss:$8 sps:$4 sm:$0xff]   ;;  %v6850_v5 = vld [vmem:[%s8364_s3 + $0x240] ss:$8 sps:$4 sm:$0xff]   ;;  %v8485_v18 = vld [vmem:[#allocation8_spill] sm:$0xff]  ;;  %8517 = vst [vmem:[#allocation6_spill] sm:$0xff] %v7513_v56 }
 0x151   :  { %v1198_v59 = vrot.slane %v1191_v9, %v6647_v6  ;;  %v1214_v19 = vcombine.high %v1191_v9, %v1191_v9  ;;  %v1279_v62 = vrot.slane %v1272_v54, %v6647_v6  ;;  %v1296_v25 = vcombine.high %v1272_v54, %v1272_v54  ;;  %v1486_v21 = vld [vmem:[#allocation2 + $0x10] sm:$0xff]  ;;  %v8486_v23 = vld [vmem:[#allocation9_spill] sm:$0xff]  ;;  %v6870_v58 = vld [vmem:[%s8364_s3 + $0x224] ss:$8 sps:$4 sm:$0xff]  }
 0x152   :  { %v1365_v4 = vrot.slane %v1358_v3, %v6647_v6  ;;  %v1382_v8 = vcombine.high %v1358_v3, %v1358_v3  ;;  %v1447_v38 = vrot.slane %v1440_v29, %v6647_v6  ;;  %v1464_v45 = vcombine.high %v1440_v29, %v1440_v29  ;;  %v8484_v46 = vld [vmem:[#allocation7_spill] sm:$0xff]  ;;  %v8487_v33 = vld [vmem:[#allocation10_spill] sm:$0xff]  ;;  %v6884_v44 = vld [vmem:[%s8364_s3 + $0x214] ss:$8 sps:$4 sm:$0xff]  }
 0x153   :  { %1204 = vst.msk [vmem:[#allocation2 + $0x30] ss:$8 sm:$0x3] %vm6340_vm1, %v1198_v59  ;;  %v1221_v40 = vrot.slane %v1214_v19, %v6647_v6  ;;  %v1231_v48 = vcombine.high %v1198_v59, %v1198_v59  ;;  %1286 = vst.msk [vmem:[#allocation2 + $0x32] ss:$8 sm:$0x3] %vm6340_vm1, %v1279_v62  ;;  %v1303_v49 = vrot.slane %v1296_v25, %v6647_v6 }
 0x154   :  { %v1313_v43 = vcombine.high %v1279_v62, %v1279_v62  ;;  %1372 = vst.msk [vmem:[#allocation2 + $0x34] ss:$8 sm:$0x3] %vm6340_vm1, %v1365_v4  ;;  %v1389_v47 = vrot.slane %v1382_v8, %v6647_v6  ;;  %v1399_v32 = vcombine.high %v1365_v4, %v1365_v4  ;;  %1454 = vst.msk [vmem:[#allocation2 + $0x36] ss:$8 sm:$0x3] %vm6340_vm1, %v1447_v38 }
 0x155   :  { %1228 = vst.msk [vmem:[#allocation2 + $0x21] ss:$8 sm:$0x3] %vm6340_vm1, %v1221_v40  ;;  %1238 = vst.msk [vmem:[#allocation2 + $0x31] ss:$8 sm:$0x3] %vm6340_vm1, %v1231_v48  ;;  %v1241_v16 = vcombine.high %v1221_v40, %v1221_v40  ;;  %v1323_v17 = vcombine.high %v1303_v49, %v1303_v49  ;;  %v1471_v13 = vrot.slane %v1464_v45, %v6647_v6 }
 0x156   :  { %1310 = vst.msk [vmem:[#allocation2 + $0x23] ss:$8 sm:$0x3] %vm6340_vm1, %v1303_v49  ;;  %1320 = vst.msk [vmem:[#allocation2 + $0x33] ss:$8 sm:$0x3] %vm6340_vm1, %v1313_v43  ;;  %v1409_v35 = vcombine.high %v1389_v47, %v1389_v47 }
 0x157   :  { %1248 = vst.msk [vmem:[#allocation2 + $0x22] ss:$8 sm:$0x3] %vm6340_vm1, %v1241_v16  ;;  %1330 = vst.msk [vmem:[#allocation2 + $0x24] ss:$8 sm:$0x3] %vm6340_vm1, %v1323_v17 }
 0x158   :  { %1396 = vst.msk [vmem:[#allocation2 + $0x25] ss:$8 sm:$0x3] %vm6340_vm1, %v1389_v47  ;;  %1406 = vst.msk [vmem:[#allocation2 + $0x35] ss:$8 sm:$0x3] %vm6340_vm1, %v1399_v32 }
 0x159   :  { %1478 = vst.msk [vmem:[#allocation2 + $0x27] ss:$8 sm:$0x3] %vm6340_vm1, %v1471_v13  ;;  %1416 = vst.msk [vmem:[#allocation2 + $0x26] ss:$8 sm:$0x3] %vm6340_vm1, %v1409_v35 }
 0x15a   :  { %v1487_v6 = vld [vmem:[#allocation2 + $0x18] sm:$0xff]  ;;  %v1481_v34 = vld [vmem:[#allocation2 + $0x8] sm:$0xff]  ;;  %v1480_v60 = vld [vmem:[#allocation2] sm:$0xff] }
 0x15b   :  { %v6864_v12 = vld [vmem:[%s8364_s3 + $0x230] ss:$8 sps:$4 sm:$0xff]   ;;  %v6878_v14 = vld [vmem:[%s8364_s3 + $0x220] ss:$8 sps:$4 sm:$0xff]   ;;  %v6898_v30 = vld [vmem:[%s8364_s3 + $0x204] ss:$8 sps:$4 sm:$0xff]  }
 0x15c   :  { %v8488_v20 = vld [vmem:[#allocation11_spill] sm:$0xff]  ;;  %v8489_v10 = vld [vmem:[#allocation12_spill] sm:$0xff]  ;;  %v8490_v57 = vld [vmem:[#allocation13_spill] sm:$0xff] }
 0x15d   :  { %v6892_v51 = vld [vmem:[%s8364_s3 + $0x210] ss:$8 sps:$4 sm:$0xff]   ;;  %v8491_v24 = vld [vmem:[#allocation14_spill] sm:$0xff]  ;;  %v6912_v22 = vld [vmem:[%s8364_s3 + $0x2f4] ss:$8 sps:$4 sm:$0xff]  }
 0x15e   :  { %v8492_v9 = vld [vmem:[#allocation15_spill] sm:$0xff]  ;;  %v8493_v63 = vld [vmem:[#allocation16_spill] sm:$0xff]  ;;  %v8494_v59 = vld [vmem:[#allocation17_spill] sm:$0xff] }
 0x15f   :  { %v1489_v28 = vld [vmem:[#allocation2 + $0x38] sm:$0xff]  ;;  %v1488_v15 = vld [vmem:[#allocation2 + $0x30] sm:$0xff]  ;;  %v6906_v54 = vld [vmem:[%s8364_s3 + $0x200] ss:$8 sps:$4 sm:$0xff]  }
 0x160   :  { %v6784_v37 = vpack.c.bf16 %v1489_v28, %v1487_v6  ;;  %v6786_v0 = vpack.c.bf16 %v1488_v15, %v1486_v21  ;;  %v1483_v39 = vld [vmem:[#allocation2 + $0x28] sm:$0xff]  ;;  %v1482_v26 = vld [vmem:[#allocation2 + $0x20] sm:$0xff]  ;;  %v6920_v19 = vld [vmem:[%s8364_s3 + $0x2f0] ss:$8 sps:$4 sm:$0xff]  }
 0x161   :  { %v6789_v31 = vpack.c.bf16 %v1483_v39, %v1481_v34  ;;  %v6796_v52 = vpack.c.bf16 %v1482_v26, %v1480_v60  ;;  %v6926_v62 = vld [vmem:[%s8364_s3 + $0x2e4] ss:$8 sps:$4 sm:$0xff]   ;;  %v6934_v29 = vld [vmem:[%s8364_s3 + $0x2e0] ss:$8 sps:$4 sm:$0xff]   ;;  %v6940_v40 = vld [vmem:[%s8364_s3 + $0x2d4] ss:$8 sps:$4 sm:$0xff]  }
 0x162   :  { %1952 = vmatprep.mubr.bf16.mxu1 %v6784_v37  ;;  %v8495_v25 = vld [vmem:[#allocation18_spill] sm:$0xff]  ;;  %v8496_v3 = vld [vmem:[#allocation19_spill] sm:$0xff]  ;;  %v8497_v48 = vld [vmem:[#allocation20_spill] sm:$0xff] }
 0x163   :  { %1953 = vmatmul.mubr.bf16.vlgmr.msra.gmra.mxu1 %v6786_v0  ;;  %1716 = vmatprep.mubr.bf16.mxu0 %v6789_v31  ;;  %v8498_v49 = vld [vmem:[#allocation21_spill] sm:$0xff]  ;;  %v6954_v4 = vld [vmem:[%s8364_s3 + $0x2c4] ss:$8 sps:$4 sm:$0xff]   ;;  %v8504_v6 = vld [vmem:[#allocation28_spill] sm:$0xff] }
 0x164   :  { %2220 = vmatpush1.bf16.msra.mxu1 %v5793_v1  ;;  %2251 = vmatprep.mubr.bf16.mxu1 %v6784_v37  ;;  %v6948_v43 = vld [vmem:[%s8364_s3 + $0x2d0] ss:$8 sps:$4 sm:$0xff]   ;;  %v8499_v8 = vld [vmem:[#allocation22_spill] sm:$0xff]  ;;  %v6968_v16 = vld [vmem:[%s8364_s3 + $0x2b4] ss:$8 sps:$4 sm:$0xff]  }
 0x165   :  { %1717 = vmatmul.mubr.bf16.vlgmr.msra.gmra.mxu0 %v6796_v52  ;;  %2221 = vmatprep.subr.bf16.mxu1 %v5794_v11  ;;  %v8500_v38 = vld [vmem:[#allocation23_spill] sm:$0xff]  ;;  %v8501_v17 = vld [vmem:[#allocation25_spill] sm:$0xff]  ;;  %v8502_v47 = vld [vmem:[#allocation26_spill] sm:$0xff] }
 0x166   :  { %2161 = vmatpush1.bf16.msra.mxu0 %v6794_v50  ;;  %2192 = vmatprep.mubr.bf16.mxu0 %v6789_v31  ;;  %v6962_v45 = vld [vmem:[%s8364_s3 + $0x2c0] ss:$8 sps:$4 sm:$0xff]   ;;  %v6976_v32 = vld [vmem:[%s8364_s3 + $0x2b0] ss:$8 sps:$4 sm:$0xff]   ;;  %v6982_v13 = vld [vmem:[%s8364_s3 + $0x2a4] ss:$8 sps:$4 sm:$0xff]  }
 0x167   :  { %2162 = vmatprep.subr.bf16.mxu0 %v6802_v27  ;;  %v8503_v35 = vld [vmem:[#allocation27_spill] sm:$0xff]  ;;  %v6996_v21 = vld [vmem:[%s8364_s3 + $0x294] ss:$8 sps:$4 sm:$0xff]   ;;  %v8507_v26 = vld [vmem:[#allocation30_spill] sm:$0xff] }
 0x168   :  { %2222 = vmatpush1.bf16.msra.mxu1 %v5795_v55  ;;  %v6990_v28 = vld [vmem:[%s8364_s3 + $0x2a0] ss:$8 sps:$4 sm:$0xff]   ;;  %v7004_v39 = vld [vmem:[%s8364_s3 + $0x290] ss:$8 sps:$4 sm:$0xff]   ;;  %v7010_v60 = vld [vmem:[%s8364_s3 + $0x284] ss:$8 sps:$4 sm:$0xff]  }
 0x169   :  { %2223 = vmatprep.subr.bf16.mxu1 %v8483_v2  ;;  %v8505_v15 = vld [vmem:[#allocation29_spill] sm:$0xff]  ;;  %v8506_v34 = vld [vmem:[#allocation31_spill] sm:$0xff]  ;;  %v8508_v1 = vld [vmem:[#allocation32_spill] sm:$0xff] }
 0x16a   :  { %2163 = vmatpush1.bf16.msra.mxu0 %v6815_v61  ;;  %v7018_v11 = vld [vmem:[%s8364_s3 + $0x280] ss:$8 sps:$4 sm:$0xff]  }
 0x16b   :  { %2164 = vmatprep.subr.bf16.mxu0 %v6824_v41  ;;  %v8509_v55 = vld [vmem:[#allocation33_spill] sm:$0xff]  ;;  %v8510_v2 = vld [vmem:[#allocation34_spill] sm:$0xff] }
 0x16c   :  { %2224 = vmatpush1.bf16.msra.mxu1 %v5796_v42  ;;  %v5797_v42 = vld [vmem:[%s8364_s3 + $0x174] ss:$8 sps:$4 sm:$0xff]  }
 0x16d   :  { %2225 = vmatprep.subr.bf16.mxu1 %v8484_v46  ;;  %v5798_v46 = vld [vmem:[%s8364_s3 + $0x170] ss:$8 sps:$4 sm:$0xff]  }
 0x16e   :  { %2165 = vmatpush1.bf16.msra.mxu0 %v6834_v36 }
 0x16f   :  { %2166 = vmatprep.subr.bf16.mxu0 %v6840_v7 }
 0x170   :  { %2226 = vmatpush1.bf16.msra.mxu1 %v8485_v18  ;;  %v5799_v18 = vld [vmem:[%s8364_s3 + $0x164] ss:$8 sps:$4 sm:$0xff]  }
 0x171   :  { %2227 = vmatprep.subr.bf16.mxu1 %v8486_v23  ;;  %v5808_v23 = vld [vmem:[%s8364_s3 + $0x120] ss:$8 sps:$4 sm:$0xff]  }
 0x172   :  { %2167 = vmatpush1.bf16.msra.mxu0 %v6850_v5 }
 0x173   :  { %2168 = vmatprep.subr.bf16.mxu0 %v6856_v53 }
 0x174   :  { %2228 = vmatpush1.bf16.msra.mxu1 %v8487_v33  ;;  %v5811_v33 = vld [vmem:[%s8364_s3 + $0x104] ss:$8 sps:$4 sm:$0xff]  }
 0x175   :  { %2229 = vmatprep.subr.bf16.mxu1 %v8488_v20  ;;  %v5812_v20 = vld [vmem:[%s8364_s3 + $0x100] ss:$8 sps:$4 sm:$0xff]  }
 0x176   :  { %2169 = vmatpush1.bf16.msra.mxu0 %v6864_v12 }
 0x177   :  { %2170 = vmatprep.subr.bf16.mxu0 %v6870_v58 }
 0x178   :  { %2230 = vmatpush1.bf16.msra.mxu1 %v8489_v10  ;;  %v5815_v10 = vld [vmem:[%s8364_s3 + $0x1e4] ss:$8 sps:$4 sm:$0xff]  }
 0x179   :  { %2231 = vmatprep.subr.bf16.mxu1 %v8490_v57  ;;  %v5816_v57 = vld [vmem:[%s8364_s3 + $0x1e0] ss:$8 sps:$4 sm:$0xff]  }
 0x17a   :  { %2171 = vmatpush1.bf16.msra.mxu0 %v6878_v14 }
 0x17b   :  { %2172 = vmatprep.subr.bf16.mxu0 %v6884_v44 }
 0x17c   :  { %2232 = vmatpush1.bf16.msra.mxu1 %v8491_v24  ;;  %v5819_v24 = vld [vmem:[%s8364_s3 + $0x1c4] ss:$8 sps:$4 sm:$0xff]  }
 0x17d   :  { %2233 = vmatprep.subr.bf16.mxu1 %v8492_v9  ;;  %v5820_v9 = vld [vmem:[%s8364_s3 + $0x1c0] ss:$8 sps:$4 sm:$0xff]  }
 0x17e   :  { %2173 = vmatpush1.bf16.msra.mxu0 %v6892_v51 }
 0x17f   :  { %2174 = vmatprep.subr.bf16.mxu0 %v6898_v30 }
 0x180   :  { %2234 = vmatpush1.bf16.msra.mxu1 %v8493_v63  ;;  %v5823_v63 = vld [vmem:[%s8364_s3 + $0x1a4] ss:$8 sps:$4 sm:$0xff]  }
 0x181   :  { %2235 = vmatprep.subr.bf16.mxu1 %v8494_v59  ;;  %v5824_v59 = vld [vmem:[%s8364_s3 + $0x1a0] ss:$8 sps:$4 sm:$0xff]  }
 0x182   :  { %2175 = vmatpush1.bf16.msra.mxu0 %v6906_v54 }
 0x183   :  { %2176 = vmatprep.subr.bf16.mxu0 %v6912_v22 }
 0x184   :  { %2236 = vmatpush2.bf16.msra.mxu1 %v8495_v25  ;;  %v5826_v25 = vld [vmem:[%s8364_s3 + $0x190] ss:$8 sps:$4 sm:$0xff]  }
 0x185   :  { %2237 = vmatprep.subr.bf16.mxu1 %v8496_v3  ;;  %v5827_v3 = vld [vmem:[%s8364_s3 + $0x184] ss:$8 sps:$4 sm:$0xff]  }
 0x186   :  { %2177 = vmatpush2.bf16.msra.mxu0 %v6920_v19 }
 0x187   :  { %2178 = vmatprep.subr.bf16.mxu0 %v6926_v62 }
 0x188   :  { %2238 = vmatpush2.bf16.msra.mxu1 %v8497_v48  ;;  %v7171_v48 = vld [vmem:[%s8364_s3 + $0x464] ss:$8 sps:$4 sm:$0xff]  }
 0x189   :  { %2239 = vmatprep.subr.bf16.mxu1 %v8498_v49  ;;  %v5828_v49 = vld [vmem:[%s8364_s3 + $0x180] ss:$8 sps:$4 sm:$0xff]  }
 0x18a   :  { %2179 = vmatpush2.bf16.msra.mxu0 %v6934_v29 }
 0x18b   :  { %2180 = vmatprep.subr.bf16.mxu0 %v6940_v40 }
 0x18c   :  { %2240 = vmatpush2.bf16.msra.mxu1 %v8499_v8  ;;  %v7193_v8 = vld [vmem:[%s8364_s3 + $0x460] ss:$8 sps:$4 sm:$0xff]  }
 0x18d   :  { %2241 = vmatprep.subr.bf16.mxu1 %v8500_v38  ;;  %v7200_v38 = vld [vmem:[%s8364_s3 + $0x454] ss:$8 sps:$4 sm:$0xff]  }
 0x18e   :  { %2181 = vmatpush2.bf16.msra.mxu0 %v6948_v43 }
 0x18f   :  { %2182 = vmatprep.subr.bf16.mxu0 %v6954_v4 }
 0x190   :  { %2242 = vmatpush2.bf16.msra.mxu1 %v8501_v17  ;;  %v7219_v17 = vld [vmem:[%s8364_s3 + $0x450] ss:$8 sps:$4 sm:$0xff]  }
 0x191   :  { %2243 = vmatprep.subr.bf16.mxu1 %v8502_v47  ;;  %v7225_v47 = vld [vmem:[%s8364_s3 + $0x444] ss:$8 sps:$4 sm:$0xff]  }
 0x192   :  { %2183 = vmatpush2.bf16.msra.mxu0 %v6962_v45 }
 0x193   :  { %2184 = vmatprep.subr.bf16.mxu0 %v6968_v16 }
 0x194   :  { %2244 = vmatpush2.bf16.msra.mxu1 %v8503_v35  ;;  %v7243_v35 = vld [vmem:[%s8364_s3 + $0x440] ss:$8 sps:$4 sm:$0xff]  }
 0x195   :  { %2245 = vmatprep.subr.bf16.mxu1 %v8504_v6  ;;  %v7249_v6 = vld [vmem:[%s8364_s3 + $0x434] ss:$8 sps:$4 sm:$0xff]  }
 0x196   :  { %2185 = vmatpush2.bf16.msra.mxu0 %v6976_v32 }
 0x197   :  { %2186 = vmatprep.subr.bf16.mxu0 %v6982_v13 }
 0x198   :  { %2246 = vmatpush2.bf16.msra.mxu1 %v8505_v15  ;;  %v7267_v15 = vld [vmem:[%s8364_s3 + $0x430] ss:$8 sps:$4 sm:$0xff]  }
 0x199   :  { %2247 = vmatprep.subr.bf16.mxu1 %v8506_v34  ;;  %v7273_v34 = vld [vmem:[%s8364_s3 + $0x424] ss:$8 sps:$4 sm:$0xff]  }
 0x19a   :  { %2187 = vmatpush2.bf16.msra.mxu0 %v6990_v28 }
 0x19b   :  { %2188 = vmatprep.subr.bf16.mxu0 %v6996_v21 }
 0x19c   :  { %2248 = vmatpush2.bf16.msra.mxu1 %v8507_v26  ;;  %v7291_v26 = vld [vmem:[%s8364_s3 + $0x420] ss:$8 sps:$4 sm:$0xff]  }
 0x19d   :  { %2249 = vmatprep.subr.bf16.mxu1 %v8508_v1  ;;  %v7297_v1 = vld [vmem:[%s8364_s3 + $0x414] ss:$8 sps:$4 sm:$0xff]  }
 0x19e   :  { %2189 = vmatpush2.bf16.msra.mxu0 %v7004_v39 }
 0x19f   :  { %2190 = vmatprep.subr.bf16.mxu0 %v7010_v60 }
 0x1a0   :  { %2250 = vmatpush2.bf16.msra.mxu1 %v8509_v55  ;;  %v7309_v55 = vld [vmem:[%s8364_s3 + $0x314] ss:$8 sps:$4 sm:$0xff]  }
 0x1a1   :  { %2321 = vmatprep.subr.bf16.mxu1 %v8510_v2  ;;  %v7315_v2 = vld [vmem:[%s8364_s3 + $0x410] ss:$8 sps:$4 sm:$0xff]  }
 0x1a2   :  { %2191 = vmatpush2.bf16.msra.mxu0 %v7018_v11 }
 0x1a3   :  { %2252 = vmatmul.mubr.bf16.vlgmr.msra.gmra.mxu1 %v6786_v0  ;;  %2262 = vmatprep.subr.bf16.mxu0 %v5797_v42  ;;  %v7321_v42 = vld [vmem:[%s8364_s3 + $0x404] ss:$8 sps:$4 sm:$0xff]  }
 0x1a4   :  { %2322 = vmatpush1.bf16.msra.mxu1 %v6794_v50  ;;  %2353 = vmatprep.mubr.bf16.mxu1 %v6784_v37  ;;  %v5800_v50 = vld [vmem:[%s8364_s3 + $0x160] ss:$8 sps:$4 sm:$0xff]  }
 0x1a5   :  { %2193 = vmatmul.mubr.bf16.vlgmr.msra.gmra.mxu0 %v6796_v52  ;;  %2323 = vmatprep.subr.bf16.mxu1 %v6802_v27  ;;  %v5801_v27 = vld [vmem:[%s8364_s3 + $0x154] ss:$8 sps:$4 sm:$0xff]  }
 0x1a6   :  { %2263 = vmatpush1.bf16.msra.mxu0 %v5798_v46  ;;  %2294 = vmatprep.mubr.bf16.mxu0 %v6789_v31  ;;  %v7327_v46 = vld [vmem:[%s8364_s3 + $0x310] ss:$8 sps:$4 sm:$0xff]  }
 0x1a7   :  { %2264 = vmatprep.subr.bf16.mxu0 %v5799_v18  ;;  %v7333_v18 = vld [vmem:[%s8364_s3 + $0x304] ss:$8 sps:$4 sm:$0xff]  }
 0x1a8   :  { %2324 = vmatpush1.bf16.msra.mxu1 %v6815_v61  ;;  %v5802_v61 = vld [vmem:[%s8364_s3 + $0x150] ss:$8 sps:$4 sm:$0xff]  }
 0x1a9   :  { %2325 = vmatprep.subr.bf16.mxu1 %v6824_v41  ;;  %v5803_v41 = vld [vmem:[%s8364_s3 + $0x144] ss:$8 sps:$4 sm:$0xff]  }
 0x1aa   :  { %2265 = vmatpush1.bf16.msra.mxu0 %v5800_v50  ;;  %v7339_v50 = vld [vmem:[%s8364_s3 + $0x400] ss:$8 sps:$4 sm:$0xff]  }
 0x1ab   :  { %2266 = vmatprep.subr.bf16.mxu0 %v5801_v27  ;;  %v7345_v27 = vld [vmem:[%s8364_s3 + $0x4f4] ss:$8 sps:$4 sm:$0xff]  }
 0x1ac   :  { %2326 = vmatpush1.bf16.msra.mxu1 %v6834_v36  ;;  %v5804_v36 = vld [vmem:[%s8364_s3 + $0x140] ss:$8 sps:$4 sm:$0xff]  }
 0x1ad   :  { %2327 = vmatprep.subr.bf16.mxu1 %v6840_v7  ;;  %v5805_v7 = vld [vmem:[%s8364_s3 + $0x134] ss:$8 sps:$4 sm:$0xff]  }
 0x1ae   :  { %2267 = vmatpush1.bf16.msra.mxu0 %v5802_v61  ;;  %v7351_v61 = vld [vmem:[%s8364_s3 + $0x300] ss:$8 sps:$4 sm:$0xff]  }
 0x1af   :  { %2268 = vmatprep.subr.bf16.mxu0 %v5803_v41  ;;  %v7357_v41 = vld [vmem:[%s8364_s3 + $0x3f4] ss:$8 sps:$4 sm:$0xff]  }
 0x1b0   :  { %2328 = vmatpush1.bf16.msra.mxu1 %v6850_v5  ;;  %v5806_v5 = vld [vmem:[%s8364_s3 + $0x130] ss:$8 sps:$4 sm:$0xff]  }
 0x1b1   :  { %2329 = vmatprep.subr.bf16.mxu1 %v6856_v53  ;;  %v5807_v53 = vld [vmem:[%s8364_s3 + $0x124] ss:$8 sps:$4 sm:$0xff]  }
 0x1b2   :  { %2269 = vmatpush1.bf16.msra.mxu0 %v5804_v36  ;;  %v7363_v36 = vld [vmem:[%s8364_s3 + $0x4f0] ss:$8 sps:$4 sm:$0xff]  }
 0x1b3   :  { %2270 = vmatprep.subr.bf16.mxu0 %v5805_v7  ;;  %v7369_v7 = vld [vmem:[%s8364_s3 + $0x4e4] ss:$8 sps:$4 sm:$0xff]  }
 0x1b4   :  { %2330 = vmatpush1.bf16.msra.mxu1 %v6864_v12  ;;  %v5809_v12 = vld [vmem:[%s8364_s3 + $0x114] ss:$8 sps:$4 sm:$0xff]  }
 0x1b5   :  { %2331 = vmatprep.subr.bf16.mxu1 %v6870_v58  ;;  %v5810_v58 = vld [vmem:[%s8364_s3 + $0x110] ss:$8 sps:$4 sm:$0xff]  }
 0x1b6   :  { %2271 = vmatpush1.bf16.msra.mxu0 %v5806_v5  ;;  %v7375_v5 = vld [vmem:[%s8364_s3 + $0x3f0] ss:$8 sps:$4 sm:$0xff]  }
 0x1b7   :  { %2272 = vmatprep.subr.bf16.mxu0 %v5807_v53  ;;  %v7381_v53 = vld [vmem:[%s8364_s3 + $0x3e4] ss:$8 sps:$4 sm:$0xff]  }
 0x1b8   :  { %2332 = vmatpush1.bf16.msra.mxu1 %v6878_v14  ;;  %v5813_v14 = vld [vmem:[%s8364_s3 + $0x1f4] ss:$8 sps:$4 sm:$0xff]  }
 0x1b9   :  { %2333 = vmatprep.subr.bf16.mxu1 %v6884_v44  ;;  %v5814_v44 = vld [vmem:[%s8364_s3 + $0x1f0] ss:$8 sps:$4 sm:$0xff]  }
 0x1ba   :  { %2273 = vmatpush1.bf16.msra.mxu0 %v5808_v23  ;;  %v7387_v23 = vld [vmem:[%s8364_s3 + $0x4e0] ss:$8 sps:$4 sm:$0xff]  }
 0x1bb   :  { %2274 = vmatprep.subr.bf16.mxu0 %v5809_v12  ;;  %v7393_v12 = vld [vmem:[%s8364_s3 + $0x4d4] ss:$8 sps:$4 sm:$0xff]  }
 0x1bc   :  { %2334 = vmatpush1.bf16.msra.mxu1 %v6892_v51  ;;  %v5817_v51 = vld [vmem:[%s8364_s3 + $0x1d4] ss:$8 sps:$4 sm:$0xff]  }
 0x1bd   :  { %2335 = vmatprep.subr.bf16.mxu1 %v6898_v30  ;;  %v5818_v30 = vld [vmem:[%s8364_s3 + $0x1d0] ss:$8 sps:$4 sm:$0xff]  }
 0x1be   :  { %2275 = vmatpush1.bf16.msra.mxu0 %v5810_v58  ;;  %v7399_v58 = vld [vmem:[%s8364_s3 + $0x3e0] ss:$8 sps:$4 sm:$0xff]  }
 0x1bf   :  { %2276 = vmatprep.subr.bf16.mxu0 %v5811_v33  ;;  %v7405_v33 = vld [vmem:[%s8364_s3 + $0x3d4] ss:$8 sps:$4 sm:$0xff]  }
 0x1c0   :  { %2336 = vmatpush1.bf16.msra.mxu1 %v6906_v54  ;;  %v5821_v54 = vld [vmem:[%s8364_s3 + $0x1b4] ss:$8 sps:$4 sm:$0xff]  }
 0x1c1   :  { %2337 = vmatprep.subr.bf16.mxu1 %v6912_v22  ;;  %v5822_v22 = vld [vmem:[%s8364_s3 + $0x1b0] ss:$8 sps:$4 sm:$0xff]  }
 0x1c2   :  { %2277 = vmatpush1.bf16.msra.mxu0 %v5812_v20  ;;  %v7411_v20 = vld [vmem:[%s8364_s3 + $0x4d0] ss:$8 sps:$4 sm:$0xff]  }
 0x1c3   :  { %2278 = vmatprep.subr.bf16.mxu0 %v5813_v14  ;;  %v7417_v14 = vld [vmem:[%s8364_s3 + $0x4c4] ss:$8 sps:$4 sm:$0xff]  }
 0x1c4   :  { %2338 = vmatpush2.bf16.msra.mxu1 %v6920_v19  ;;  %v5825_v19 = vld [vmem:[%s8364_s3 + $0x194] ss:$8 sps:$4 sm:$0xff]  }
 0x1c5   :  { %2339 = vmatprep.subr.bf16.mxu1 %v6926_v62  ;;  %v7148_v62 = vld [vmem:[%s8364_s3 + $0x474] ss:$8 sps:$4 sm:$0xff]  }
 0x1c6   :  { %2279 = vmatpush2.bf16.msra.mxu0 %v5814_v44  ;;  %v7423_v44 = vld [vmem:[%s8364_s3 + $0x3d0] ss:$8 sps:$4 sm:$0xff]  }
 0x1c7   :  { %2280 = vmatprep.subr.bf16.mxu0 %v5815_v10  ;;  %v7429_v10 = vld [vmem:[%s8364_s3 + $0x3c4] ss:$8 sps:$4 sm:$0xff]  }
 0x1c8   :  { %2340 = vmatpush2.bf16.msra.mxu1 %v6934_v29  ;;  %v7159_v29 = vld [vmem:[%s8364_s3 + $0x374] ss:$8 sps:$4 sm:$0xff]  }
 0x1c9   :  { %2341 = vmatprep.subr.bf16.mxu1 %v6940_v40  ;;  %v7165_v40 = vld [vmem:[%s8364_s3 + $0x470] ss:$8 sps:$4 sm:$0xff]  }
 0x1ca   :  { %2281 = vmatpush2.bf16.msra.mxu0 %v5816_v57  ;;  %v7435_v57 = vld [vmem:[%s8364_s3 + $0x4c0] ss:$8 sps:$4 sm:$0xff]  }
 0x1cb   :  { %2282 = vmatprep.subr.bf16.mxu0 %v5817_v51  ;;  %v7441_v51 = vld [vmem:[%s8364_s3 + $0x4b4] ss:$8 sps:$4 sm:$0xff]  }
 0x1cc   :  { %2342 = vmatpush2.bf16.msra.mxu1 %v6948_v43  ;;  %v7179_v43 = vld [vmem:[%s8364_s3 + $0x370] ss:$8 sps:$4 sm:$0xff]   ;;  %8511 = vst [vmem:[#allocation36_spill] sm:$0xff] %v7441_v51 }
 0x1cd   :  { %2343 = vmatprep.subr.bf16.mxu1 %v6954_v4  ;;  %v7186_v4 = vld [vmem:[%s8364_s3 + $0x364] ss:$8 sps:$4 sm:$0xff]  }
 0x1ce   :  { %2283 = vmatpush2.bf16.msra.mxu0 %v5818_v30  ;;  %v7447_v30 = vld [vmem:[%s8364_s3 + $0x3c0] ss:$8 sps:$4 sm:$0xff]  }
 0x1cf   :  { %2284 = vmatprep.subr.bf16.mxu0 %v5819_v24  ;;  %v7453_v24 = vld [vmem:[%s8364_s3 + $0x3b4] ss:$8 sps:$4 sm:$0xff]  }
 0x1d0   :  { %2344 = vmatpush2.bf16.msra.mxu1 %v6962_v45  ;;  %v7207_v45 = vld [vmem:[%s8364_s3 + $0x360] ss:$8 sps:$4 sm:$0xff]  }
 0x1d1   :  { %2345 = vmatprep.subr.bf16.mxu1 %v6968_v16  ;;  %v7213_v16 = vld [vmem:[%s8364_s3 + $0x354] ss:$8 sps:$4 sm:$0xff]  }
 0x1d2   :  { %2285 = vmatpush2.bf16.msra.mxu0 %v5820_v9  ;;  %v7459_v9 = vld [vmem:[%s8364_s3 + $0x4b0] ss:$8 sps:$4 sm:$0xff]  }
 0x1d3   :  { %2286 = vmatprep.subr.bf16.mxu0 %v5821_v54  ;;  %8512 = vst [vmem:[#allocation39_spill] sm:$0xff] %v7459_v9  ;;  %v7465_v54 = vld [vmem:[%s8364_s3 + $0x4a4] ss:$8 sps:$4 sm:$0xff]  }
 0x1d4   :  { %2346 = vmatpush2.bf16.msra.mxu1 %v6976_v32  ;;  %v7231_v32 = vld [vmem:[%s8364_s3 + $0x350] ss:$8 sps:$4 sm:$0xff]   ;;  %8513 = vst [vmem:[#allocation40_spill] sm:$0xff] %v7465_v54 }
 0x1d5   :  { %2347 = vmatprep.subr.bf16.mxu1 %v6982_v13  ;;  %v7237_v13 = vld [vmem:[%s8364_s3 + $0x344] ss:$8 sps:$4 sm:$0xff]  }
 0x1d6   :  { %2287 = vmatpush2.bf16.msra.mxu0 %v5822_v22  ;;  %v7471_v22 = vld [vmem:[%s8364_s3 + $0x3b0] ss:$8 sps:$4 sm:$0xff]  }
 0x1d7   :  { %2288 = vmatprep.subr.bf16.mxu0 %v5823_v63  ;;  %v7477_v63 = vld [vmem:[%s8364_s3 + $0x3a4] ss:$8 sps:$4 sm:$0xff]  }
 0x1d8   :  { %2348 = vmatpush2.bf16.msra.mxu1 %v6990_v28  ;;  %v7255_v28 = vld [vmem:[%s8364_s3 + $0x340] ss:$8 sps:$4 sm:$0xff]  }
 0x1d9   :  { %2349 = vmatprep.subr.bf16.mxu1 %v6996_v21  ;;  %v7261_v21 = vld [vmem:[%s8364_s3 + $0x334] ss:$8 sps:$4 sm:$0xff]  }
 0x1da   :  { %2289 = vmatpush2.bf16.msra.mxu0 %v5824_v59  ;;  %v7483_v59 = vld [vmem:[%s8364_s3 + $0x4a0] ss:$8 sps:$4 sm:$0xff]  }
 0x1db   :  { %2290 = vmatprep.subr.bf16.mxu0 %v5825_v19  ;;  %8514 = vst [vmem:[#allocation35_spill] sm:$0xff] %v7483_v59  ;;  %v7489_v19 = vld [vmem:[%s8364_s3 + $0x494] ss:$8 sps:$4 sm:$0xff]  }
 0x1dc   :  { %2350 = vmatpush2.bf16.msra.mxu1 %v7004_v39  ;;  %v7279_v39 = vld [vmem:[%s8364_s3 + $0x330] ss:$8 sps:$4 sm:$0xff]   ;;  %8515 = vst [vmem:[#allocation37_spill] sm:$0xff] %v7489_v19 }
 0x1dd   :  { %2351 = vmatprep.subr.bf16.mxu1 %v7010_v60  ;;  %v7285_v60 = vld [vmem:[%s8364_s3 + $0x324] ss:$8 sps:$4 sm:$0xff]  }
 0x1de   :  { %2291 = vmatpush2.bf16.msra.mxu0 %v5826_v25  ;;  %v7495_v25 = vld [vmem:[%s8364_s3 + $0x3a0] ss:$8 sps:$4 sm:$0xff]  }
 0x1df   :  { %2292 = vmatprep.subr.bf16.mxu0 %v5827_v3  ;;  %v7501_v3 = vld [vmem:[%s8364_s3 + $0x394] ss:$8 sps:$4 sm:$0xff]  }
 0x1e0   :  { %2352 = vmatpush2.bf16.msra.mxu1 %v7018_v11  ;;  %v7303_v11 = vld [vmem:[%s8364_s3 + $0x320] ss:$8 sps:$4 sm:$0xff]  }
 0x1e1   :  { %2813 = vmatprep.subr.bf16.mxu1 %v7148_v62 }
 0x1e2   :  { %2293 = vmatpush2.bf16.msra.mxu0 %v5828_v49  ;;  %v7507_v49 = vld [vmem:[%s8364_s3 + $0x490] ss:$8 sps:$4 sm:$0xff]  }
 0x1e3   :  { %2354 = vmatmul.mubr.bf16.vlgmr.msra.gmra.mxu1 %v6786_v0  ;;  %2577 = vmatprep.subr.bf16.mxu0 %v7159_v29  ;;  %8516 = vst [vmem:[#allocation24_spill] sm:$0xff] %v7507_v49 }
 0x1e4   :  { %2814 = vmatpush1.bf16.msra.mxu1 %v7165_v40  ;;  %2845 = vmatprep.mubr.bf16.mxu1 %v6784_v37 }
 0x1e5   :  { %2295 = vmatmul.mubr.bf16.vlgmr.msra.gmra.mxu0 %v6796_v52  ;;  %2815 = vmatprep.subr.bf16.mxu1 %v7171_v48 }
 0x1e6   :  { %2578 = vmatpush1.bf16.msra.mxu0 %v7179_v43  ;;  %2609 = vmatprep.mubr.bf16.mxu0 %v6789_v31 }
 0x1e7   :  { %2579 = vmatprep.subr.bf16.mxu0 %v7186_v4 }
 0x1e8   :  { %2816 = vmatpush1.bf16.msra.mxu1 %v7193_v8 }
 0x1e9   :  { %2817 = vmatprep.subr.bf16.mxu1 %v7200_v38 }
 0x1ea   :  { %2580 = vmatpush1.bf16.msra.mxu0 %v7207_v45 }
 0x1eb   :  { %2581 = vmatprep.subr.bf16.mxu0 %v7213_v16 }
 0x1ec   :  { %2818 = vmatpush1.bf16.msra.mxu1 %v7219_v17 }
 0x1ed   :  { %2819 = vmatprep.subr.bf16.mxu1 %v7225_v47 }
 0x1ee   :  { %2582 = vmatpush1.bf16.msra.mxu0 %v7231_v32 }
 0x1ef   :  { %2583 = vmatprep.subr.bf16.mxu0 %v7237_v13 }
 0x1f0   :  { %2820 = vmatpush1.bf16.msra.mxu1 %v7243_v35 }
 0x1f1   :  { %2821 = vmatprep.subr.bf16.mxu1 %v7249_v6 }
 0x1f2   :  { %2584 = vmatpush1.bf16.msra.mxu0 %v7255_v28 }
 0x1f3   :  { %2585 = vmatprep.subr.bf16.mxu0 %v7261_v21 }
 0x1f4   :  { %2822 = vmatpush1.bf16.msra.mxu1 %v7267_v15 }
 0x1f5   :  { %2823 = vmatprep.subr.bf16.mxu1 %v7273_v34 }
 0x1f6   :  { %2586 = vmatpush1.bf16.msra.mxu0 %v7279_v39 }
 0x1f7   :  { %2587 = vmatprep.subr.bf16.mxu0 %v7285_v60 }
 0x1f8   :  { %2824 = vmatpush1.bf16.msra.mxu1 %v7291_v26 }
 0x1f9   :  { %2825 = vmatprep.subr.bf16.mxu1 %v7297_v1 }
 0x1fa   :  { %2588 = vmatpush1.bf16.msra.mxu0 %v7303_v11 }
 0x1fb   :  { %2589 = vmatprep.subr.bf16.mxu0 %v7309_v55 }
 0x1fc   :  { %2826 = vmatpush1.bf16.msra.mxu1 %v7315_v2 }
 0x1fd   :  { %2827 = vmatprep.subr.bf16.mxu1 %v7321_v42 }
 0x1fe   :  { %2590 = vmatpush1.bf16.msra.mxu0 %v7327_v46 }
 0x1ff   :  { %2591 = vmatprep.subr.bf16.mxu0 %v7333_v18 }
 0x200   :  { %2828 = vmatpush1.bf16.msra.mxu1 %v7339_v50 }
 0x201   :  { %2829 = vmatprep.subr.bf16.mxu1 %v7345_v27 }
 0x202   :  { %2592 = vmatpush1.bf16.msra.mxu0 %v7351_v61 }
 0x203   :  { %2593 = vmatprep.subr.bf16.mxu0 %v7357_v41 }
 0x204   :  { %2830 = vmatpush2.bf16.msra.mxu1 %v7363_v36 }
 0x205   :  { %2831 = vmatprep.subr.bf16.mxu1 %v7369_v7 }
 0x206   :  { %2594 = vmatpush2.bf16.msra.mxu0 %v7375_v5 }
 0x207   :  { %2595 = vmatprep.subr.bf16.mxu0 %v7381_v53 }
 0x208   :  { %2832 = vmatpush2.bf16.msra.mxu1 %v7387_v23 }
 0x209   :  { %2833 = vmatprep.subr.bf16.mxu1 %v7393_v12 }
 0x20a   :  { %2596 = vmatpush2.bf16.msra.mxu0 %v7399_v58 }
 0x20b   :  { %2597 = vmatprep.subr.bf16.mxu0 %v7405_v33 }
 0x20c   :  { %2834 = vmatpush2.bf16.msra.mxu1 %v7411_v20 }
 0x20d   :  { %2835 = vmatprep.subr.bf16.mxu1 %v7417_v14 }
 0x20e   :  { %2598 = vmatpush2.bf16.msra.mxu0 %v7423_v44 }
 0x20f   :  { %2599 = vmatprep.subr.bf16.mxu0 %v7429_v10 }
 0x210   :  { %2836 = vmatpush2.bf16.msra.mxu1 %v7435_v57 }
 0x211   :  { %2837 = vmatprep.subr.bf16.mxu1 %v7441_v51  ;;  %v7559_v51 = vld [vmem:[%s8364_s3 + $0x564] ss:$8 sps:$4 sm:$0xff]  }
 0x212   :  { %2600 = vmatpush2.bf16.msra.mxu0 %v7447_v30 }
 0x213   :  { %2601 = vmatprep.subr.bf16.mxu0 %v7453_v24 }
 0x214   :  { %2838 = vmatpush2.bf16.msra.mxu1 %v7459_v9  ;;  %v7538_v9 = vld [vmem:[%s8364_s3 + $0x380] ss:$8 sps:$4 sm:$0xff]  }
 0x215   :  { %2839 = vmatprep.subr.bf16.mxu1 %v7465_v54  ;;  %v7519_v54 = vld [vmem:[%s8364_s3 + $0x390] ss:$8 sps:$4 sm:$0xff]  }
 0x216   :  { %2602 = vmatpush2.bf16.msra.mxu0 %v7471_v22 }
 0x217   :  { %2603 = vmatprep.subr.bf16.mxu0 %v7477_v63 }
 0x218   :  { %2840 = vmatpush2.bf16.msra.mxu1 %v7483_v59  ;;  %v7525_v59 = vld [vmem:[%s8364_s3 + $0x384] ss:$8 sps:$4 sm:$0xff]  }
 0x219   :  { %2841 = vmatprep.subr.bf16.mxu1 %v7489_v19  ;;  %v7531_v19 = vld [vmem:[%s8364_s3 + $0x480] ss:$8 sps:$4 sm:$0xff]  }
 0x21a   :  { %2604 = vmatpush2.bf16.msra.mxu0 %v7495_v25  ;;  %8518 = vst [vmem:[#allocation7_spill] sm:$0xff] %v7531_v19 }
 0x21b   :  { %2605 = vmatprep.subr.bf16.mxu0 %v7501_v3 }
 0x21c   :  { %2842 = vmatpush2.bf16.msra.mxu1 %v7507_v49  ;;  %v7544_v49 = vld [vmem:[%s8364_s3 + $0x574] ss:$8 sps:$4 sm:$0xff]  }
 0x21d   :  { %2843 = vmatprep.subr.bf16.mxu1 %v7513_v56  ;;  %v7552_v56 = vld [vmem:[%s8364_s3 + $0x570] ss:$8 sps:$4 sm:$0xff]  }
 0x21e   :  { %2606 = vmatpush2.bf16.msra.mxu0 %v7519_v54 }
 0x21f   :  { %2607 = vmatprep.subr.bf16.mxu0 %v7525_v59 }
 0x220   :  { %2844 = vmatpush2.bf16.msra.mxu1 %v7531_v19  ;;  %v7590_v19 = vld [vmem:[%s8364_s3 + $0x544] ss:$8 sps:$4 sm:$0xff]  }
 0x221   :  { %3116 = vmatprep.subr.bf16.mxu1 %v7159_v29  ;;  %v7570_v29 = vld [vmem:[%s8364_s3 + $0x560] ss:$8 sps:$4 sm:$0xff]  }
 0x222   :  { %2608 = vmatpush2.bf16.msra.mxu0 %v7538_v9 }
 0x223   :  { %2846 = vmatmul.mubr.bf16.vlgmr.msra.gmra.mxu1 %v6786_v0  ;;  %3053 = vmatprep.subr.bf16.mxu0 %v7544_v49 }
 0x224   :  { %3117 = vmatpush1.bf16.msra.mxu1 %v7179_v43  ;;  %3148 = vmatprep.mubr.bf16.mxu1 %v6784_v37  ;;  %v7576_v43 = vld [vmem:[%s8364_s3 + $0x554] ss:$8 sps:$4 sm:$0xff]  }
 0x225   :  { %2610 = vmatmul.mubr.bf16.vlgmr.msra.gmra.mxu0 %v6796_v52  ;;  %3118 = vmatprep.subr.bf16.mxu1 %v7186_v4  ;;  %v7584_v4 = vld [vmem:[%s8364_s3 + $0x550] ss:$8 sps:$4 sm:$0xff]  }
 0x226   :  { %3054 = vmatpush1.bf16.msra.mxu0 %v7552_v56  ;;  %3085 = vmatprep.mubr.bf16.mxu0 %v6789_v31 }
 0x227   :  { %3055 = vmatprep.subr.bf16.mxu0 %v7559_v51 }
 0x228   :  { %3119 = vmatpush1.bf16.msra.mxu1 %v7207_v45  ;;  %v7598_v45 = vld [vmem:[%s8364_s3 + $0x540] ss:$8 sps:$4 sm:$0xff]  }
 0x229   :  { %3120 = vmatprep.subr.bf16.mxu1 %v7213_v16  ;;  %v7604_v16 = vld [vmem:[%s8364_s3 + $0x534] ss:$8 sps:$4 sm:$0xff]  }
 0x22a   :  { %3056 = vmatpush1.bf16.msra.mxu0 %v7570_v29 }
 0x22b   :  { %3057 = vmatprep.subr.bf16.mxu0 %v7576_v43 }
 0x22c   :  { %3121 = vmatpush1.bf16.msra.mxu1 %v7231_v32  ;;  %v7612_v32 = vld [vmem:[%s8364_s3 + $0x530] ss:$8 sps:$4 sm:$0xff]  }
 0x22d   :  { %3122 = vmatprep.subr.bf16.mxu1 %v7237_v13  ;;  %v7618_v13 = vld [vmem:[%s8364_s3 + $0x524] ss:$8 sps:$4 sm:$0xff]  }
 0x22e   :  { %3058 = vmatpush1.bf16.msra.mxu0 %v7584_v4 }
 0x22f   :  { %3059 = vmatprep.subr.bf16.mxu0 %v7590_v19 }
 0x230   :  { %3123 = vmatpush1.bf16.msra.mxu1 %v7255_v28  ;;  %v7626_v28 = vld [vmem:[%s8364_s3 + $0x520] ss:$8 sps:$4 sm:$0xff]  }
 0x231   :  { %3124 = vmatprep.subr.bf16.mxu1 %v7261_v21  ;;  %v7632_v21 = vld [vmem:[%s8364_s3 + $0x514] ss:$8 sps:$4 sm:$0xff]  }
 0x232   :  { %3060 = vmatpush1.bf16.msra.mxu0 %v7598_v45 }
 0x233   :  { %3061 = vmatprep.subr.bf16.mxu0 %v7604_v16 }
 0x234   :  { %3125 = vmatpush1.bf16.msra.mxu1 %v7279_v39  ;;  %v7640_v39 = vld [vmem:[%s8364_s3 + $0x510] ss:$8 sps:$4 sm:$0xff]  }
 0x235   :  { %3126 = vmatprep.subr.bf16.mxu1 %v7285_v60  ;;  %v7646_v60 = vld [vmem:[%s8364_s3 + $0x504] ss:$8 sps:$4 sm:$0xff]  }
 0x236   :  { %3062 = vmatpush1.bf16.msra.mxu0 %v7612_v32 }
 0x237   :  { %3063 = vmatprep.subr.bf16.mxu0 %v7618_v13 }
 0x238   :  { %3127 = vmatpush1.bf16.msra.mxu1 %v7303_v11  ;;  %v7654_v11 = vld [vmem:[%s8364_s3 + $0x500] ss:$8 sps:$4 sm:$0xff]  }
 0x239   :  { %3128 = vmatprep.subr.bf16.mxu1 %v7309_v55  ;;  %v7660_v55 = vld [vmem:[%s8364_s3 + $0x5f4] ss:$8 sps:$4 sm:$0xff]  }
 0x23a   :  { %3064 = vmatpush1.bf16.msra.mxu0 %v7626_v28 }
 0x23b   :  { %3065 = vmatprep.subr.bf16.mxu0 %v7632_v21 }
 0x23c   :  { %3129 = vmatpush1.bf16.msra.mxu1 %v7327_v46  ;;  %v7668_v46 = vld [vmem:[%s8364_s3 + $0x5f0] ss:$8 sps:$4 sm:$0xff]  }
 0x23d   :  { %3130 = vmatprep.subr.bf16.mxu1 %v7333_v18  ;;  %v7674_v18 = vld [vmem:[%s8364_s3 + $0x5e4] ss:$8 sps:$4 sm:$0xff]  }
 0x23e   :  { %3066 = vmatpush1.bf16.msra.mxu0 %v7640_v39 }
 0x23f   :  { %3067 = vmatprep.subr.bf16.mxu0 %v7646_v60 }
 0x240   :  { %3131 = vmatpush1.bf16.msra.mxu1 %v7351_v61  ;;  %v7682_v61 = vld [vmem:[%s8364_s3 + $0x5e0] ss:$8 sps:$4 sm:$0xff]  }
 0x241   :  { %3132 = vmatprep.subr.bf16.mxu1 %v7357_v41  ;;  %v7688_v41 = vld [vmem:[%s8364_s3 + $0x5d4] ss:$8 sps:$4 sm:$0xff]  }
 0x242   :  { %3068 = vmatpush1.bf16.msra.mxu0 %v7654_v11 }
 0x243   :  { %3069 = vmatprep.subr.bf16.mxu0 %v7660_v55 }
 0x244   :  { %3133 = vmatpush2.bf16.msra.mxu1 %v7375_v5  ;;  %v7696_v5 = vld [vmem:[%s8364_s3 + $0x5d0] ss:$8 sps:$4 sm:$0xff]  }
 0x245   :  { %3134 = vmatprep.subr.bf16.mxu1 %v7381_v53  ;;  %v7702_v53 = vld [vmem:[%s8364_s3 + $0x5c4] ss:$8 sps:$4 sm:$0xff]  }
 0x246   :  { %3070 = vmatpush2.bf16.msra.mxu0 %v7668_v46 }
 0x247   :  { %3071 = vmatprep.subr.bf16.mxu0 %v7674_v18 }
 0x248   :  { %3135 = vmatpush2.bf16.msra.mxu1 %v7399_v58  ;;  %v7710_v58 = vld [vmem:[%s8364_s3 + $0x5c0] ss:$8 sps:$4 sm:$0xff]  }
 0x249   :  { %3136 = vmatprep.subr.bf16.mxu1 %v7405_v33  ;;  %v7716_v33 = vld [vmem:[%s8364_s3 + $0x5b4] ss:$8 sps:$4 sm:$0xff]  }
 0x24a   :  { %3072 = vmatpush2.bf16.msra.mxu0 %v7682_v61 }
 0x24b   :  { %3073 = vmatprep.subr.bf16.mxu0 %v7688_v41 }
 0x24c   :  { %3137 = vmatpush2.bf16.msra.mxu1 %v7423_v44  ;;  %v7724_v44 = vld [vmem:[%s8364_s3 + $0x5b0] ss:$8 sps:$4 sm:$0xff]  }
 0x24d   :  { %3138 = vmatprep.subr.bf16.mxu1 %v7429_v10  ;;  %v7730_v10 = vld [vmem:[%s8364_s3 + $0x5a4] ss:$8 sps:$4 sm:$0xff]  }
 0x24e   :  { %3074 = vmatpush2.bf16.msra.mxu0 %v7696_v5 }
 0x24f   :  { %3075 = vmatprep.subr.bf16.mxu0 %v7702_v53 }
 0x250   :  { %3139 = vmatpush2.bf16.msra.mxu1 %v7447_v30  ;;  %v7738_v30 = vld [vmem:[%s8364_s3 + $0x5a0] ss:$8 sps:$4 sm:$0xff]  }
 0x251   :  { %3140 = vmatprep.subr.bf16.mxu1 %v7453_v24  ;;  %v7744_v24 = vld [vmem:[%s8364_s3 + $0x594] ss:$8 sps:$4 sm:$0xff]  }
 0x252   :  { %3076 = vmatpush2.bf16.msra.mxu0 %v7710_v58 }
 0x253   :  { %3077 = vmatprep.subr.bf16.mxu0 %v7716_v33 }
 0x254   :  { %3141 = vmatpush2.bf16.msra.mxu1 %v7471_v22  ;;  %v7752_v22 = vld [vmem:[%s8364_s3 + $0x590] ss:$8 sps:$4 sm:$0xff]  }
 0x255   :  { %3142 = vmatprep.subr.bf16.mxu1 %v7477_v63  ;;  %v7758_v63 = vld [vmem:[%s8364_s3 + $0x584] ss:$8 sps:$4 sm:$0xff]  }
 0x256   :  { %3078 = vmatpush2.bf16.msra.mxu0 %v7724_v44 }
 0x257   :  { %3079 = vmatprep.subr.bf16.mxu0 %v7730_v10 }
 0x258   :  { %3143 = vmatpush2.bf16.msra.mxu1 %v7495_v25  ;;  %v7766_v25 = vld [vmem:[%s8364_s3 + $0x580] ss:$8 sps:$4 sm:$0xff]  }
 0x259   :  { %3144 = vmatprep.subr.bf16.mxu1 %v7501_v3  ;;  %v5712_v3 = vld [vmem:[%s8366_s5 + $0x48] sm:$0xff]  }
 0x25a   :  { %3080 = vmatpush2.bf16.msra.mxu0 %v7738_v30 }
 0x25b   :  { %3081 = vmatprep.subr.bf16.mxu0 %v7744_v24 }
 0x25c   :  { %3145 = vmatpush2.bf16.msra.mxu1 %v7519_v54  ;;  %v5709_v54 = vld [vmem:[%s8366_s5 + $0xc0] sm:$0xff]  }
 0x25d   :  { %3146 = vmatprep.subr.bf16.mxu1 %v7525_v59  ;;  %v5710_v59 = vld [vmem:[%s8366_s5 + $0x50] sm:$0xff]  }
 0x25e   :  { %3082 = vmatpush2.bf16.msra.mxu0 %v7752_v22 }
 0x25f   :  { %3083 = vmatprep.subr.bf16.mxu0 %v7758_v63 }
 0x260   :  { %3147 = vmatpush2.bf16.msra.mxu1 %v7538_v9  ;;  %v5708_v9 = vld [vmem:[%s8366_s5 + $0x58] sm:$0xff]  }
 0x261   :  { %3218 = vmatprep.subr.bf16.mxu1 %v7544_v49  ;;  %v5713_v49 = vld [vmem:[%s8366_s5 + $0xb0] sm:$0xff]  }
 0x262   :  { %3084 = vmatpush2.bf16.msra.mxu0 %v7766_v25 }
 0x263   :  { %3149 = vmatmul.mubr.bf16.vlgmr.msra.gmra.mxu1 %v6786_v0  ;;  %3159 = vmatprep.subr.bf16.mxu0 %v7148_v62  ;;  %v8522_v62 = vld [vmem:[#allocation35_spill] sm:$0xff] }
 0x264   :  { %3219 = vmatpush1.bf16.msra.mxu1 %v7552_v56  ;;  %3250 = vmatprep.mubr.bf16.mxu1 %v6784_v37  ;;  %v8519_v56 = vld [vmem:[#allocation36_spill] sm:$0xff]  ;;  %v8520_v37 = vld [vmem:[#allocation39_spill] sm:$0xff] }
 0x265   :  { %3086 = vmatmul.mubr.bf16.vlgmr.msra.gmra.mxu0 %v6796_v52  ;;  %3220 = vmatprep.subr.bf16.mxu1 %v7559_v51  ;;  %v5707_v51 = vld [vmem:[%s8366_s5 + $0xc8] sm:$0xff]  }
 0x266   :  { %3160 = vmatpush1.bf16.msra.mxu0 %v7165_v40  ;;  %3191 = vmatprep.mubr.bf16.mxu0 %v6789_v31  ;;  %v8521_v31 = vld [vmem:[#allocation40_spill] sm:$0xff]  ;;  %v8523_v40 = vld [vmem:[#allocation37_spill] sm:$0xff] }
 0x267   :  { %3161 = vmatprep.subr.bf16.mxu0 %v7171_v48  ;;  %v8524_v48 = vld [vmem:[#allocation24_spill] sm:$0xff] }
 0x268   :  { %3221 = vmatpush1.bf16.msra.mxu1 %v7570_v29  ;;  %v5714_v29 = vld [vmem:[%s8366_s5 + $0x40] sm:$0xff]  }
 0x269   :  { %3222 = vmatprep.subr.bf16.mxu1 %v7576_v43  ;;  %v1954_v43 = vpop.f32.mrf.mxu1 }
 0x26a   :  { %3162 = vmatpush1.bf16.msra.mxu0 %v7193_v8  ;;  %v8525_v8 = vld [vmem:[#allocation6_spill] sm:$0xff] }
 0x26b   :  { %3163 = vmatprep.subr.bf16.mxu0 %v7200_v38  ;;  %v8526_v38 = vmov 0  }
 0x26c   :  { %3223 = vmatpush1.bf16.msra.mxu1 %v7584_v4  ;;  %v1718_v4 = vpop.f32.mrf.mxu0 }
 0x26d   :  { %3224 = vmatprep.subr.bf16.mxu1 %v7590_v19  ;;  %v5711_v19 = vld [vmem:[%s8366_s5 + $0xb8] sm:$0xff]  }
 0x26e   :  { %3164 = vmatpush1.bf16.msra.mxu0 %v7219_v17  ;;  %v8527_v17 = vld [vmem:[#allocation7_spill] sm:$0xff] }
 0x26f   :  { %3165 = vmatprep.subr.bf16.mxu0 %v7225_v47  ;;  %v5687_v47 = vld [vmem:[%s8366_s5 + $0xa8] sm:$0xff]  }
 0x270   :  { %3225 = vmatpush1.bf16.msra.mxu1 %v7598_v45  ;;  %v1956_v45 = vpop.f32.mrf.mxu1 }
 0x271   :  { %3226 = vmatprep.subr.bf16.mxu1 %v7604_v16  ;;  %v1720_v16 = vpop.f32.mrf.mxu0 }
 0x272   :  { %3166 = vmatpush1.bf16.msra.mxu0 %v7243_v35  ;;  %v5688_v35 = vld [vmem:[%s8366_s5 + $0x38] sm:$0xff]  }
 0x273   :  { %3167 = vmatprep.subr.bf16.mxu0 %v7249_v6  ;;  %v5689_v6 = vld [vmem:[%s8366_s5 + $0xa0] sm:$0xff]  }
 0x274   :  { %3227 = vmatpush1.bf16.msra.mxu1 %v7612_v32  ;;  %v1958_v32 = vpop.f32.mrf.mxu1 }
 0x275   :  { %3228 = vmatprep.subr.bf16.mxu1 %v7618_v13  ;;  %v1722_v13 = vpop.f32.mrf.mxu0 }
 0x276   :  { %3168 = vmatpush1.bf16.msra.mxu0 %v7267_v15  ;;  %v5692_v15 = vld [vmem:[%s8366_s5 + $0x28] sm:$0xff]  }
 0x277   :  { %3169 = vmatprep.subr.bf16.mxu0 %v7273_v34  ;;  %v5693_v34 = vld [vmem:[%s8366_s5 + $0x90] sm:$0xff]  }
 0x278   :  { %3229 = vmatpush1.bf16.msra.mxu1 %v7626_v28  ;;  %v1960_v28 = vpop.f32.mrf.mxu1 }
 0x279   :  { %3230 = vmatprep.subr.bf16.mxu1 %v7632_v21  ;;  %v1724_v21 = vpop.f32.mrf.mxu0 }
 0x27a   :  { %3170 = vmatpush1.bf16.msra.mxu0 %v7291_v26  ;;  %v5694_v26 = vld [vmem:[%s8366_s5 + $0x20] sm:$0xff]  }
 0x27b   :  { %3171 = vmatprep.subr.bf16.mxu0 %v7297_v1  ;;  %v5695_v1 = vld [vmem:[%s8366_s5 + $0x88] sm:$0xff]  }
 0x27c   :  { %3231 = vmatpush1.bf16.msra.mxu1 %v7640_v39  ;;  %v2253_v39 = vpop.f32.mrf.mxu1 }
 0x27d   :  { %3232 = vmatprep.subr.bf16.mxu1 %v7646_v60  ;;  %v2194_v60 = vpop.f32.mrf.mxu0 }
 0x27e   :  { %3172 = vmatpush1.bf16.msra.mxu0 %v7315_v2  ;;  %v5696_v2 = vld [vmem:[%s8366_s5 + $0x18] sm:$0xff]  }
 0x27f   :  { %3173 = vmatprep.subr.bf16.mxu0 %v7321_v42  ;;  %v5697_v42 = vld [vmem:[%s8366_s5 + $0x80] sm:$0xff]  }
 0x280   :  { %3233 = vmatpush1.bf16.msra.mxu1 %v7654_v11  ;;  %v2255_v11 = vpop.f32.mrf.mxu1 }
 0x281   :  { %3234 = vmatprep.subr.bf16.mxu1 %v7660_v55  ;;  %v2196_v55 = vpop.f32.mrf.mxu0 }
 0x282   :  { %3174 = vmatpush1.bf16.msra.mxu0 %v7339_v50  ;;  %v5698_v50 = vld [vmem:[%s8366_s5 + $0x10] sm:$0xff]  }
 0x283   :  { %3175 = vmatprep.subr.bf16.mxu0 %v7345_v27  ;;  %v5699_v27 = vld [vmem:[%s8366_s5 + $0x78] sm:$0xff]  }
 0x284   :  { %3235 = vmatpush2.bf16.msra.mxu1 %v7668_v46  ;;  %v2257_v46 = vpop.f32.mrf.mxu1 }
 0x285   :  { %3236 = vmatprep.subr.bf16.mxu1 %v7674_v18  ;;  %v2198_v18 = vpop.f32.mrf.mxu0 }
 0x286   :  { %3176 = vmatpush2.bf16.msra.mxu0 %v7363_v36  ;;  %v5700_v36 = vld [vmem:[%s8366_s5 + $0x8] sm:$0xff]  }
 0x287   :  { %3177 = vmatprep.subr.bf16.mxu0 %v7369_v7  ;;  %v5701_v7 = vld [vmem:[%s8366_s5 + $0x70] sm:$0xff]  }
 0x288   :  { %3237 = vmatpush2.bf16.msra.mxu1 %v7682_v61  ;;  %v2259_v61 = vpop.f32.mrf.mxu1 }
 0x289   :  { %3238 = vmatprep.subr.bf16.mxu1 %v7688_v41  ;;  %v2200_v41 = vpop.f32.mrf.mxu0 }
 0x28a   :  { %3178 = vmatpush2.bf16.msra.mxu0 %v7387_v23  ;;  %v5702_v23 = vld [vmem:[%s8366_s5] sm:$0xff]  }
 0x28b   :  { %3179 = vmatprep.subr.bf16.mxu0 %v7393_v12  ;;  %v5703_v12 = vld [vmem:[%s8366_s5 + $0xd8] sm:$0xff]  }
 0x28c   :  { %3239 = vmatpush2.bf16.msra.mxu1 %v7696_v5 }
 0x28d   :  { %3240 = vmatprep.subr.bf16.mxu1 %v7702_v53 }
 0x28e   :  { %3180 = vmatpush2.bf16.msra.mxu0 %v7411_v20  ;;  %v5704_v20 = vld [vmem:[%s8366_s5 + $0x68] sm:$0xff]  }
 0x28f   :  { %3181 = vmatprep.subr.bf16.mxu0 %v7417_v14  ;;  %v5705_v14 = vld [vmem:[%s8366_s5 + $0xd0] sm:$0xff]  }
 0x290   :  { %3241 = vmatpush2.bf16.msra.mxu1 %v7710_v58 }
 0x291   :  { %3242 = vmatprep.subr.bf16.mxu1 %v7716_v33 }
 0x292   :  { %3182 = vmatpush2.bf16.msra.mxu0 %v7435_v57  ;;  %v5706_v57 = vld [vmem:[%s8366_s5 + $0x60] sm:$0xff]  }
 0x293   :  { %3183 = vmatprep.subr.bf16.mxu0 %v8519_v56 }
 0x294   :  { %3243 = vmatpush2.bf16.msra.mxu1 %v7724_v44 }
 0x295   :  { %3244 = vmatprep.subr.bf16.mxu1 %v7730_v10 }
 0x296   :  { %3184 = vmatpush2.bf16.msra.mxu0 %v8520_v37 }
 0x297   :  { %3185 = vmatprep.subr.bf16.mxu0 %v8521_v31 }
 0x298   :  { %3245 = vmatpush2.bf16.msra.mxu1 %v7738_v30 }
 0x299   :  { %3246 = vmatprep.subr.bf16.mxu1 %v7744_v24 }
 0x29a   :  { %3186 = vmatpush2.bf16.msra.mxu0 %v8522_v62 }
 0x29b   :  { %3187 = vmatprep.subr.bf16.mxu0 %v8523_v40 }
 0x29c   :  { %3247 = vmatpush2.bf16.msra.mxu1 %v7752_v22 }
 0x29d   :  { %3248 = vmatprep.subr.bf16.mxu1 %v7758_v63 }
 0x29e   :  { %3188 = vmatpush2.bf16.msra.mxu0 %v8524_v48 }
 0x29f   :  { %3189 = vmatprep.subr.bf16.mxu0 %v8525_v8 }
 0x2a0   :  { %3249 = vmatpush2.bf16.msra.mxu1 %v7766_v25 }
 0x2a1   :  { %3600 = vmatprep.subr.bf16.mxu1 %v8526_v38 }
 0x2a2   :  { %3190 = vmatpush2.bf16.msra.mxu0 %v8527_v17 }
 0x2a3   :  { %3251 = vmatmul.mubr.bf16.vlgmr.msra.gmra.mxu1 %v6786_v0  ;;  %3466 = vmatprep.subr.bf16.mxu0 %v8526_v38  ;;  %v5690_v0 = vld [vmem:[%s8366_s5 + $0x30] sm:$0xff]   ;;  %v2355_v5 = vpop.f32.mrf.mxu1 }
 0x2a4   :  { %3601 = vmatpush1.bf16.msra.mxu1 %v5688_v35 }
 0x2a5   :  { %3192 = vmatmul.mubr.bf16.vlgmr.msra.gmra.mxu0 %v6796_v52  ;;  %3602 = vmatprep.subr.bf16.mxu1 %v8526_v38  ;;  %v5691_v52 = vld [vmem:[%s8366_s5 + $0x98] sm:$0xff]   ;;  %v2296_v53 = vpop.f32.mrf.mxu0  ;;  %v2357_v58 = vpop.f32.mrf.mxu1 }
 0x2a6   :  { %3467 = vmatpush1.bf16.msra.mxu0 %v5687_v47  ;;  %v2309_v47 = vrot.slane %v2296_v53, 1 }
 0x2a7   :  { %3468 = vmatprep.subr.bf16.mxu0 %v8526_v38  ;;  %v2298_v33 = vpop.f32.mrf.mxu0  ;;  %v2359_v44 = vpop.f32.mrf.mxu1 }
 0x2a8   :  { %3603 = vmatpush1.bf16.msra.mxu1 %v5690_v0  ;;  %v2310_v35 = vrot.slane %v2298_v33, 1 }
 0x2a9   :  { %3604 = vmatprep.subr.bf16.mxu1 %v8526_v38  ;;  %v2300_v10 = vpop.f32.mrf.mxu0  ;;  %v2361_v30 = vpop.f32.mrf.mxu1 }
 0x2aa   :  { %3469 = vmatpush1.bf16.msra.mxu0 %v5689_v6  ;;  %v2311_v0 = vrot.slane %v2300_v10, 1 }
 0x2ab   :  { %3470 = vmatprep.subr.bf16.mxu0 %v8526_v38  ;;  %v2302_v24 = vpop.f32.mrf.mxu0 }
 0x2ac   :  { %3605 = vmatpush1.bf16.msra.mxu1 %v5692_v15  ;;  %v2317_v15 = vadd.f32 %v2309_v47, %v2253_v39 }
 0x2ad   :  { %3606 = vmatprep.subr.bf16.mxu1 %v8526_v38 }
 0x2ae   :  { %3471 = vmatpush1.bf16.msra.mxu0 %v5691_v52 }
 0x2af   :  { %3472 = vmatprep.subr.bf16.mxu0 %v8526_v38 }
 0x2b0   :  { %3607 = vmatpush1.bf16.msra.mxu1 %v5694_v26  ;;  %v2207_v26 = vrot.slane %v2194_v60, 1 }
 0x2b1   :  { %3608 = vmatprep.subr.bf16.mxu1 %v8526_v38 }
 0x2b2   :  { %3473 = vmatpush1.bf16.msra.mxu0 %v5693_v34  ;;  %v2318_v34 = vadd.f32 %v2310_v35, %v2255_v11  ;;  %v8528_v35 = vld [vmem:[#allocation38_spill] sm:$0xff] }
 0x2b3   :  { %3474 = vmatprep.subr.bf16.mxu0 %v8526_v38 }
 0x2b4   :  { %3609 = vmatpush1.bf16.msra.mxu1 %v5696_v2  ;;  %v2312_v2 = vrot.slane %v2302_v24, 1 }
 0x2b5   :  { %3610 = vmatprep.subr.bf16.mxu1 %v8526_v38 }
 0x2b6   :  { %3475 = vmatpush1.bf16.msra.mxu0 %v5695_v1  ;;  %v2208_v1 = vrot.slane %v2196_v55, 1 }
 0x2b7   :  { %3476 = vmatprep.subr.bf16.mxu0 %v8526_v38 }
 0x2b8   :  { %3611 = vmatpush1.bf16.msra.mxu1 %v5698_v50  ;;  %v2209_v50 = vrot.slane %v2198_v18, 1 }
 0x2b9   :  { %3612 = vmatprep.subr.bf16.mxu1 %v8526_v38 }
 0x2ba   :  { %3477 = vmatpush1.bf16.msra.mxu0 %v5697_v42 }
 0x2bb   :  { %3478 = vmatprep.subr.bf16.mxu0 %v8526_v38 }
 0x2bc   :  { %3613 = vmatpush1.bf16.msra.mxu1 %v5700_v36  ;;  %v2369_v36 = vrot.slane %v2357_v58, 1 }
 0x2bd   :  { %3614 = vmatprep.subr.bf16.mxu1 %v8526_v38 }
 0x2be   :  { %3479 = vmatpush1.bf16.msra.mxu0 %v5699_v27  ;;  %v2368_v27 = vrot.slane %v2355_v5, 1 }
 0x2bf   :  { %3480 = vmatprep.subr.bf16.mxu0 %v8526_v38 }
 0x2c0   :  { %3615 = vmatpush1.bf16.msra.mxu1 %v5702_v23  ;;  %v1963_v23 = vadd.f32 %v1954_v43, %v1718_v4 }
 0x2c1   :  { %3620 = vmatprep.subr.bf16.mxu1 %v8526_v38 }
 0x2c2   :  { %3481 = vmatpush1.bf16.msra.mxu0 %v5701_v7  ;;  %v2319_v7 = vadd.f32 %v2311_v0, %v2257_v46  ;;  %v2215_v11 = vadd.f32 %v2207_v26, %v1963_v23  ;;  %v2371_v46 = vrot.slane %v2361_v30, 1 }
 0x2c3   :  { %3486 = vmatprep.subr.bf16.mxu0 %v8526_v38 }
 0x2c4   :  { %3621 = vmatpush2.bf16.msra.mxu1 %v5704_v20  ;;  %v1965_v20 = vadd.f32 %v1958_v32, %v1722_v13 }
 0x2c5   :  { %3622 = vmatprep.subr.bf16.mxu1 %v8526_v38 }
 0x2c6   :  { %3487 = vmatpush2.bf16.msra.mxu0 %v5703_v12  ;;  %v1964_v12 = vadd.f32 %v1956_v45, %v1720_v16  ;;  %v2217_v18 = vadd.f32 %v2209_v50, %v1965_v20  ;;  %v8530_v50 = vsub.s32 1, %v8528_v35 }
 0x2c7   :  { %3488 = vmatprep.subr.bf16.mxu0 %v8526_v38 }
 0x2c8   :  { %3623 = vmatpush2.bf16.msra.mxu1 %v5706_v57  ;;  %v2216_v55 = vadd.f32 %v2208_v1, %v1964_v12 }
 0x2c9   :  { %3624 = vmatprep.subr.bf16.mxu1 %v8526_v38 }
 0x2ca   :  { %3489 = vmatpush2.bf16.msra.mxu0 %v5705_v14 }
 0x2cb   :  { %3490 = vmatprep.subr.bf16.mxu0 %v8526_v38 }
 0x2cc   :  { %3625 = vmatpush2.bf16.msra.mxu1 %v5708_v9  ;;  %v2376_v9 = vadd.f32 %v2368_v27, %v2317_v15 }
 0x2cd   :  { %3626 = vmatprep.subr.bf16.mxu1 %v8526_v38 }
 0x2ce   :  { %3491 = vmatpush2.bf16.msra.mxu0 %v5707_v51  ;;  %v2210_v51 = vrot.slane %v2200_v41, 1  ;;  %v2380_v41 = vmax.f32 %v2215_v11, %v2376_v9 }
 0x2cf   :  { %3492 = vmatprep.subr.bf16.mxu0 %v8526_v38 }
 0x2d0   :  { %3627 = vmatpush2.bf16.msra.mxu1 %v5710_v59  ;;  %v2370_v59 = vrot.slane %v2359_v44, 1 }
 0x2d1   :  { %3628 = vmatprep.subr.bf16.mxu1 %v8526_v38 }
 0x2d2   :  { %3493 = vmatpush2.bf16.msra.mxu0 %v5709_v54  ;;  %v2377_v54 = vadd.f32 %v2369_v36, %v2318_v34  ;;  %v2378_v5 = vadd.f32 %v2370_v59, %v2319_v7 }
 0x2d3   :  { %3494 = vmatprep.subr.bf16.mxu0 %v8526_v38 }
 0x2d4   :  { %3629 = vmatpush2.bf16.msra.mxu1 %v5712_v3  ;;  %v2320_v3 = vadd.f32 %v2312_v2, %v2259_v61  ;;  %v2381_v53 = vmax.f32 %v2216_v55, %v2377_v54  ;;  %v2382_v30 = vmax.f32 %v2217_v18, %v2378_v5 }
 0x2d5   :  { %3630 = vmatprep.subr.bf16.mxu1 %v8526_v38 }
 0x2d6   :  { %3495 = vmatpush2.bf16.msra.mxu0 %v5711_v19  ;;  %v1966_v19 = vadd.f32 %v1960_v28, %v1724_v21  ;;  %v3281_v28 = vld [vmem:[%s8365_s4] sm:$0x3]  ;;  %v2379_v21 = vadd.f32 %v2371_v46, %v2320_v3 }
 0x2d7   :  { %3496 = vmatprep.subr.bf16.mxu0 %v8526_v38  ;;  %v3290_v27 = vrot.slane %v3281_v28, %v8530_v50 }
 0x2d8   :  { %3631 = vmatpush2.bf16.msra.mxu1 %v5714_v29  ;;  %v2218_v13 = vadd.f32 %v2210_v51, %v1966_v19 }
 0x2d9   :  { %3931 = vmatprep.subr.bf16.mxu1 %v8526_v38 }
 0x2da   :  { %3497 = vmatpush2.bf16.msra.mxu0 %v5713_v49  ;;  %v2383_v20 = vmax.f32 %v2218_v13, %v2379_v21 }
 0x2db   :  { %3765 = vmatprep.subr.bf16.mxu0 %v8526_v38 }
 0x2e3   :  { %v2847_v22 = vpop.f32.mrf.mxu1 }
 0x2e5   :  { %v2611_v63 = vpop.f32.mrf.mxu0  ;;  %v2849_v25 = vpop.f32.mrf.mxu1 }
 0x2e6   :  { %v2856_v49 = vadd.f32 %v2847_v22, %v2611_v63 }
 0x2e7   :  { %v2613_v56 = vpop.f32.mrf.mxu0  ;;  %v2851_v37 = vpop.f32.mrf.mxu1 }
 0x2e8   :  { %v2857_v43 = vadd.f32 %v2849_v25, %v2613_v56 }
 0x2e9   :  { %v2615_v31 = vpop.f32.mrf.mxu0  ;;  %v2853_v62 = vpop.f32.mrf.mxu1 }
 0x2ea   :  { %v2858_v61 = vadd.f32 %v2851_v37, %v2615_v31 }
 0x2eb   :  { %v2617_v40 = vpop.f32.mrf.mxu0 }
 0x2ec   :  { %v2859_v56 = vadd.f32 %v2853_v62, %v2617_v40 }
 0x323   :  { %v3150_v48 = vpop.f32.mrf.mxu1 }
 0x325   :  { %v3087_v8 = vpop.f32.mrf.mxu0  ;;  %v7955_v17 = vpop.f32.mrf.mxu1 }
 0x326   :  { %v3100_v14 = vrot.slane %v3087_v8, 1 }
 0x327   :  { %v3089_v6 = vpop.f32.mrf.mxu0  ;;  %v7957_v52 = vpop.f32.mrf.mxu1 }
 0x328   :  { %v3101_v29 = vrot.slane %v3089_v6, 1  ;;  %v3108_v4 = vadd.f32 %v3100_v14, %v2856_v49  ;;  %v8529_v6 = vsub.s32 0, %v8528_v35 }
 0x329   :  { %v3091_v42 = vpop.f32.mrf.mxu0  ;;  %v3156_v57 = vpop.f32.mrf.mxu1 }
 0x32a   :  { %v3102_v45 = vrot.slane %v3091_v42, 1  ;;  %v3109_v33 = vadd.f32 %v3101_v29, %v2857_v43  ;;  %v3112_v8 = vmax.f32 %v2380_v41, %v3108_v4  ;;  %v3286_v0 = vrot.slane %v3281_v28, %v8529_v6 }
 0x32b   :  { %v3093_v39 = vpop.f32.mrf.mxu0 }
 0x32c   :  { %v3103_v44 = vrot.slane %v3093_v39, 1  ;;  %v3110_v47 = vadd.f32 %v3102_v45, %v2858_v61  ;;  %v3113_v2 = vmax.f32 %v2381_v53, %v3109_v33 }
 0x32e   :  { %v3111_v42 = vadd.f32 %v3103_v44, %v2859_v56  ;;  %v3114_v12 = vmax.f32 %v2382_v30, %v3110_v47  ;;  %v5715_v30 = vld [vmem:[%s8366_s5 + $0x118] sm:$0xff]  }
 0x330   :  { %v3115_v59 = vmax.f32 %v2383_v20, %v3111_v42  ;;  %v5721_v20 = vld [vmem:[%s8366_s5 + $0x100] sm:$0xff]  }
 0x363   :  { %v3252_v60 = vpop.f32.mrf.mxu1 }
 0x364   :  { %v3265_v22 = vrot.slane %v3252_v60, 1 }
 0x365   :  { %v3193_v16 = vpop.f32.mrf.mxu0  ;;  %v3254_v32 = vpop.f32.mrf.mxu1 }
 0x366   :  { %v3206_v58 = vrot.slane %v3193_v16, 1  ;;  %v3266_v26 = vrot.slane %v3254_v32, 1 }
 0x367   :  { %v3195_v10 = vpop.f32.mrf.mxu0  ;;  %v3256_v24 = vpop.f32.mrf.mxu1 }
 0x368   :  { %v3214_v63 = vadd.f32 %v3206_v58, %v3150_v48  ;;  %v3207_v25 = vrot.slane %v3195_v10, 1  ;;  %v3267_v48 = vrot.slane %v3256_v24, 1 }
 0x369   :  { %v3197_v15 = vpop.f32.mrf.mxu0  ;;  %v3258_v31 = vpop.f32.mrf.mxu1 }
 0x36a   :  { %v3273_v34 = vadd.f32 %v3265_v22, %v3214_v63  ;;  %v3215_v1 = vadd.f32 %v3207_v25, %v7955_v17  ;;  %v3208_v37 = vrot.slane %v3197_v15, 1  ;;  %v3268_v14 = vrot.slane %v3258_v31, 1  ;;  %v5716_v15 = vld [vmem:[%s8366_s5 + $0x188] sm:$0xff]  }
 0x36b   :  { %v3199_v36 = vpop.f32.mrf.mxu0 }
 0x36c   :  { %v3277_v62 = vmax.f32 %v3112_v8, %v3273_v34  ;;  %v3274_v40 = vadd.f32 %v3266_v26, %v3215_v1  ;;  %v3216_v7 = vadd.f32 %v3208_v37, %v7957_v52  ;;  %v3209_v23 = vrot.slane %v3199_v36, 1  ;;  %v5717_v37 = vld [vmem:[%s8366_s5 + $0x110] sm:$0xff]  }
 0x36e   :  { %v3293_v51 = vadd.f32 %v3286_v0, %v3277_v62  ;;  %v3278_v9 = vmax.f32 %v3113_v2, %v3274_v40  ;;  %v3275_v17 = vadd.f32 %v3267_v48, %v3216_v7  ;;  %v3217_v54 = vadd.f32 %v3209_v23, %v3156_v57  ;;  %v5718_v48 = vld [vmem:[%s8366_s5 + $0x180] sm:$0xff]   ;;  %v5719_v7 = vld [vmem:[%s8366_s5 + $0x108] sm:$0xff]  }
 0x370   :  { %v3297_v19 = vmax.f32 %v3293_v51, 0.0  ;;  %v3294_v3 = vadd.f32 %v3290_v27, %v3278_v9  ;;  %v3279_v49 = vmax.f32 %v3114_v12, %v3275_v17  ;;  %v3276_v29 = vadd.f32 %v3268_v14, %v3217_v54  ;;  %v5720_v12 = vld [vmem:[%s8366_s5 + $0x178] sm:$0xff]   ;;  %v5722_v14 = vld [vmem:[%s8366_s5 + $0x170] sm:$0xff]   ;;  %v5724_v9 = vld [vmem:[%s8366_s5 + $0x168] sm:$0xff]  }
 0x371   :  { %v5723_v51 = vld [vmem:[%s8366_s5 + $0xf8] sm:$0xff]   ;;  %v5725_v17 = vld [vmem:[%s8366_s5 + $0xf0] sm:$0xff]   ;;  %v5726_v54 = vld [vmem:[%s8366_s5 + $0x160] sm:$0xff]  }
 0x372   :  { %v3301_v39 = vpack.c.bf16 %v3297_v19, %v3297_v19  ;;  %v3298_v60 = vmax.f32 %v3294_v3, 0.0  ;;  %v3295_v11 = vadd.f32 %v3286_v0, %v3279_v49  ;;  %v3280_v55 = vmax.f32 %v3115_v59, %v3276_v29  ;;  %v5727_v59 = vld [vmem:[%s8366_s5 + $0xe8] sm:$0xff]   ;;  %v5728_v19 = vld [vmem:[%s8366_s5 + $0x158] sm:$0xff]   ;;  %v5729_v3 = vld [vmem:[%s8366_s5 + $0xe0] sm:$0xff]  }
 0x373   :  { %v5730_v49 = vld [vmem:[%s8366_s5 + $0x150] sm:$0xff]   ;;  %v5731_v29 = vld [vmem:[%s8366_s5 + $0x148] sm:$0xff]  }
 0x374   :  { %v3302_v18 = vpack.c.bf16 %v3298_v60, %v3298_v60  ;;  %v3299_v5 = vmax.f32 %v3295_v11, 0.0  ;;  %v3296_v52 = vadd.f32 %v3290_v27, %v3280_v55  ;;  %v7968_v46 = vunpack.c.l.b16 %v3301_v39  ;;  %v5732_v39 = vld [vmem:[%s8366_s5 + $0x1b8] sm:$0xff]   ;;  %v5733_v60 = vld [vmem:[%s8366_s5 + $0x140] sm:$0xff]   ;;  %v5734_v11 = vld [vmem:[%s8366_s5 + $0x1b0] sm:$0xff]  }
 0x375   :  { %v5735_v55 = vld [vmem:[%s8366_s5 + $0x138] sm:$0xff]  }
 0x376   :  { %v7970_v43 = vunpack.c.l.b16 %v3302_v18  ;;  %v3303_v4 = vpack.c.bf16 %v3299_v5, %v3299_v5  ;;  %v3300_v45 = vmax.f32 %v3296_v52, 0.0  ;;  %v3370_v32 = vrot.slane %v7968_v46, 1  ;;  %v5736_v18 = vld [vmem:[%s8366_s5 + $0x1a8] sm:$0xff]   ;;  %v5737_v5 = vld [vmem:[%s8366_s5 + $0x130] sm:$0xff]   ;;  %v5738_v52 = vld [vmem:[%s8366_s5 + $0x1a0] sm:$0xff]  }
 0x377   :  { %v4001_v35 = vrot.slane %v7968_v46, 4  ;;  %v4167_v26 = vrot.slane %v7968_v46, 5  ;;  %v4333_v62 = vrot.slane %v7968_v46, 6 }
 0x378   :  { %v7972_v16 = vunpack.c.l.b16 %v3303_v4  ;;  %v3304_v57 = vpack.c.bf16 %v3300_v45, %v3300_v45  ;;  %v3373_v41 = vrot.slane %v7970_v43, 1  ;;  %v3672_v28 = vrot.slane %v7970_v43, 2  ;;  %v5739_v4 = vld [vmem:[%s8366_s5 + $0x128] sm:$0xff]   ;;  %v5740_v45 = vld [vmem:[%s8366_s5 + $0x198] sm:$0xff]  }
 0x379   :  { %v3838_v21 = vrot.slane %v7970_v43, 3  ;;  %v4336_v2 = vrot.slane %v7970_v43, 6 }
 0x37a   :  { %v7975_v13 = vunpack.c.l.b16 %v3304_v57  ;;  %v3506_v53 = vrot.slane %v7972_v16, 7  ;;  %v3372_v58 = vsel %vm3371_vm3, %v7972_v16, %v3370_v32  ;;  %v4002_v10 = vrot.slane %v7972_v16, 3 }
 0x37b   :  { %v4168_v25 = vrot.slane %v7972_v16, 4  ;;  %v3375_v56 = vpack.c.b16 %v3372_v58, %v3372_v58  ;;  %v4334_v40 = vrot.slane %v7972_v16, 5  ;;  %v3670_v57 = vrot.slane %v7972_v16, 1 }
 0x37c   :  { %v3374_v61 = vsel %vm3371_vm3, %v7975_v13, %v3373_v41  ;;  %v3508_v33 = vrot.slane %v7975_v13, 7  ;;  %v3673_v44 = vrot.slane %v7975_v13, 1  ;;  %v3507_v22 = vsel %vm3371_vm3, %v3506_v53, %v7968_v46  ;;  %v5741_v41 = vld [vmem:[%s8366_s5 + $0x120] sm:$0xff]  }
 0x37d   :  { %v3376_v24 = vpack.c.b16 %v3374_v61, %v3374_v61  ;;  %v3839_v63 = vrot.slane %v7975_v13, 2  ;;  %v3510_v1 = vpack.c.b16 %v3507_v22, %v3507_v22  ;;  %v8010_v31 = vsel %vm3371_vm3, %v4002_v10, %v4001_v35  ;;  %v5742_v61 = vld [vmem:[%s8366_s5 + $0x190] sm:$0xff]   ;;  %v5748_v35 = vld [vmem:[%s8366_s5 + $0x258] sm:$0xff]  }
 0x37e   :  { %v3509_v8 = vsel %vm3371_vm3, %v3508_v33, %v7970_v43  ;;  %v3674_v47 = vsel %vm3371_vm3, %v3673_v44, %v3672_v28  ;;  %v4337_v42 = vrot.slane %v7975_v13, 5  ;;  %v8015_v50 = vsel %vm3371_vm3, %v4168_v25, %v4167_v26  ;;  %v5753_v26 = vld [vmem:[%s8366_s5 + $0x1d0] sm:$0xff]  }
 0x37f   :  { %5089 = vmatprep.mubr.msk.bf16.mxu0 %vm3462_vm4, %v3376_v24  ;;  %v3511_v6 = vpack.c.b16 %v3509_v8, %v3509_v8  ;;  %v3676_v0 = vpack.c.b16 %v3674_v47, %v3674_v47  ;;  %v3840_v34 = vsel %vm3371_vm3, %v3839_v63, %v3838_v21  ;;  %v8033_v23 = vsel %vm3371_vm3, %v4334_v40, %v4333_v62  ;;  %v5744_v63 = vld [vmem:[%s8366_s5 + $0x268] sm:$0xff]   ;;  %v5746_v8 = vld [vmem:[%s8366_s5 + $0x260] sm:$0xff]   ;;  %v5760_v62 = vld [vmem:[%s8366_s5 + $0x298] sm:$0xff]  }
 0x380   :  { %3499 = vmatmul.mubr.bf16.vlgmr.msra.gmra.mxu0 %v3375_v56  ;;  %v3842_v27 = vpack.c.b16 %v3840_v34, %v3840_v34  ;;  %v8023_v36 = vsel %vm3371_vm3, %v4337_v42, %v4336_v2  ;;  %v4005_v32 = vrot.slane %v7975_v13, 3  ;;  %v3669_v53 = vrot.slane %v7968_v46, 2  ;;  %v5745_v56 = vld [vmem:[%s8366_s5 + $0x1f0] sm:$0xff]   ;;  %v5747_v47 = vld [vmem:[%s8366_s5 + $0x1e8] sm:$0xff]   ;;  %v5756_v2 = vld [vmem:[%s8366_s5 + $0x238] sm:$0xff]  }
 0x381   :  { %3766 = vmatpush1.bf16.msra.mxu0 %v5715_v30  ;;  %5104 = vmatprep.mubr.msk.bf16.mxu1 %vm3462_vm4, %v3511_v6  ;;  %v3836_v58 = vrot.slane %v7972_v16, 2  ;;  %v4004_v28 = vrot.slane %v7970_v43, 4  ;;  %v4171_v21 = vrot.slane %v7975_v13, 4  ;;  %v3835_v44 = vrot.slane %v7968_v46, 3  ;;  %v5743_v13 = vld [vmem:[%s8366_s5 + $0x1f8] sm:$0xff]   ;;  %v5749_v6 = vld [vmem:[%s8366_s5 + $0x1e0] sm:$0xff]  }
 0x382   :  { %5147 = vmatprep.mubr.msk.bf16.mxu0 %vm3462_vm4, %v3676_v0  ;;  %3633 = vmatmul.mubr.bf16.vlgmr.msra.gmra.mxu1 %v3510_v1  ;;  %v3671_v33 = vsel %vm3371_vm3, %v3670_v57, %v3669_v53  ;;  %v4170_v16 = vrot.slane %v7970_v43, 5  ;;  %v5750_v0 = vld [vmem:[%s8366_s5 + $0x250] sm:$0xff]   ;;  %v5752_v34 = vld [vmem:[%s8366_s5 + $0x248] sm:$0xff]   ;;  %v5754_v1 = vld [vmem:[%s8366_s5 + $0x240] sm:$0xff]  }
 0x383   :  { %3932 = vmatpush1.bf16.msra.mxu1 %v5716_v15  ;;  %3767 = vmatprep.subr.bf16.mxu0 %v8526_v38  ;;  %v4006_v10 = vsel %vm3371_vm3, %v4005_v32, %v4004_v28  ;;  %v3837_v24 = vsel %vm3371_vm3, %v3836_v58, %v3835_v44  ;;  %v3675_v30 = vpack.c.b16 %v3671_v33, %v3671_v33  ;;  %v5751_v15 = vld [vmem:[%s8366_s5 + $0x1d8] sm:$0xff]   ;;  %v5757_v42 = vld [vmem:[%s8366_s5 + $0x1c0] sm:$0xff]   ;;  %v5783_v57 = vld [vmem:[%s8366_s5 + $0x2e8] sm:$0xff]  }
 0x384   :  { %5190 = vmatprep.mubr.msk.bf16.mxu1 %vm3462_vm4, %v3842_v27  ;;  %3933 = vmatprep.subr.bf16.mxu1 %v8526_v38  ;;  %v4172_v22 = vsel %vm3371_vm3, %v4171_v21, %v4170_v16  ;;  %v4008_v46 = vpack.c.b16 %v4006_v10, %v4006_v10  ;;  %v3841_v43 = vpack.c.b16 %v3837_v24, %v3837_v24  ;;  %v5758_v27 = vld [vmem:[%s8366_s5 + $0x230] sm:$0xff]   ;;  %v5761_v40 = vld [vmem:[%s8366_s5 + $0x220] sm:$0xff]   ;;  %v5785_v53 = vld [vmem:[%s8368_s7 + $0x38] sm:$0xff]  }
 0x385   :  { %3768 = vmatpush1.bf16.msra.mxu0 %v5717_v37  ;;  %v4174_v25 = vpack.c.b16 %v4172_v22, %v4172_v22  ;;  %v5755_v37 = vld [vmem:[%s8366_s5 + $0x1c8] sm:$0xff]   ;;  %v5784_v32 = vld [vmem:[%s8366_s5 + $0x2e0] sm:$0xff]   ;;  %v5786_v58 = vld [vmem:[%s8368_s7 + $0x30] sm:$0xff]  }
 0x386   :  { %3769 = vmatprep.subr.bf16.mxu0 %v8526_v38  ;;  %v5789_v24 = vld [vmem:[%s8368_s7 + $0x18] sm:$0xff]   ;;  %v5790_v22 = vld [vmem:[%s8368_s7 + $0x10] sm:$0xff]  }
 0x387   :  { %3934 = vmatpush1.bf16.msra.mxu1 %v5718_v48  ;;  %v5759_v48 = vld [vmem:[%s8366_s5 + $0x228] sm:$0xff]  }
 0x388   :  { %3935 = vmatprep.subr.bf16.mxu1 %v8526_v38 }
 0x389   :  { %3770 = vmatpush1.bf16.msra.mxu0 %v5719_v7  ;;  %v5762_v7 = vld [vmem:[%s8366_s5 + $0x290] sm:$0xff]  }
 0x38a   :  { %3771 = vmatprep.subr.bf16.mxu0 %v8526_v38 }
 0x38b   :  { %3936 = vmatpush1.bf16.msra.mxu1 %v5720_v12  ;;  %v5763_v12 = vld [vmem:[%s8366_s5 + $0x218] sm:$0xff]  }
 0x38c   :  { %3937 = vmatprep.subr.bf16.mxu1 %v8526_v38 }
 0x38d   :  { %3772 = vmatpush1.bf16.msra.mxu0 %v5721_v20  ;;  %v5764_v20 = vld [vmem:[%s8366_s5 + $0x288] sm:$0xff]  }
 0x38e   :  { %3773 = vmatprep.subr.bf16.mxu0 %v8526_v38 }
 0x38f   :  { %3938 = vmatpush1.bf16.msra.mxu1 %v5722_v14  ;;  %v5765_v14 = vld [vmem:[%s8366_s5 + $0x210] sm:$0xff]  }
 0x390   :  { %3939 = vmatprep.subr.bf16.mxu1 %v8526_v38 }
 0x391   :  { %3774 = vmatpush1.bf16.msra.mxu0 %v5723_v51  ;;  %v5766_v51 = vld [vmem:[%s8366_s5 + $0x280] sm:$0xff]  }
 0x392   :  { %3775 = vmatprep.subr.bf16.mxu0 %v8526_v38 }
 0x393   :  { %3940 = vmatpush1.bf16.msra.mxu1 %v5724_v9  ;;  %v5767_v9 = vld [vmem:[%s8366_s5 + $0x208] sm:$0xff]  }
 0x394   :  { %3941 = vmatprep.subr.bf16.mxu1 %v8526_v38 }
 0x395   :  { %3776 = vmatpush1.bf16.msra.mxu0 %v5725_v17  ;;  %v5768_v17 = vld [vmem:[%s8366_s5 + $0x278] sm:$0xff]  }
 0x396   :  { %3777 = vmatprep.subr.bf16.mxu0 %v8526_v38 }
 0x397   :  { %3942 = vmatpush1.bf16.msra.mxu1 %v5726_v54  ;;  %v5769_v54 = vld [vmem:[%s8366_s5 + $0x200] sm:$0xff]  }
 0x398   :  { %3943 = vmatprep.subr.bf16.mxu1 %v8526_v38 }
 0x399   :  { %3778 = vmatpush1.bf16.msra.mxu0 %v5727_v59  ;;  %v5770_v59 = vld [vmem:[%s8366_s5 + $0x270] sm:$0xff]  }
 0x39a   :  { %3779 = vmatprep.subr.bf16.mxu0 %v8526_v38 }
 0x39b   :  { %3944 = vmatpush1.bf16.msra.mxu1 %v5728_v19  ;;  %v5771_v19 = vld [vmem:[%s8366_s5 + $0x2d8] sm:$0xff]  }
 0x39c   :  { %3945 = vmatprep.subr.bf16.mxu1 %v8526_v38 }
 0x39d   :  { %3780 = vmatpush1.bf16.msra.mxu0 %v5729_v3  ;;  %v4007_v3 = vpack.c.b16 %v8010_v31, %v8010_v31  ;;  %v5773_v31 = vld [vmem:[%s8366_s5 + $0x2c8] sm:$0xff]  }
 0x39e   :  { %3785 = vmatprep.subr.bf16.mxu0 %v8526_v38 }
 0x39f   :  { %3946 = vmatpush1.bf16.msra.mxu1 %v5730_v49  ;;  %v4340_v49 = vpack.c.b16 %v8023_v36, %v8023_v36  ;;  %v5775_v36 = vld [vmem:[%s8366_s5 + $0x2b8] sm:$0xff]  }
 0x3a0   :  { %3951 = vmatprep.subr.bf16.mxu1 %v8526_v38 }
 0x3a1   :  { %3786 = vmatpush2.bf16.msra.mxu0 %v5731_v29  ;;  %v4173_v29 = vpack.c.b16 %v8015_v50, %v8015_v50  ;;  %v5774_v50 = vld [vmem:[%s8366_s5 + $0x2c0] sm:$0xff]  }
 0x3a2   :  { %3787 = vmatprep.subr.bf16.mxu0 %v8526_v38 }
 0x3a3   :  { %3952 = vmatpush2.bf16.msra.mxu1 %v5732_v39  ;;  %v8531_v39 = vmov 0.0  }
 0x3a4   :  { %3953 = vmatprep.subr.bf16.mxu1 %v8526_v38 }
 0x3a5   :  { %3788 = vmatpush2.bf16.msra.mxu0 %v5733_v60  ;;  %v5772_v60 = vld [vmem:[%s8366_s5 + $0x2d0] sm:$0xff]  }
 0x3a6   :  { %3789 = vmatprep.subr.bf16.mxu0 %v8526_v38 }
 0x3a7   :  { %3954 = vmatpush2.bf16.msra.mxu1 %v5734_v11  ;;  %v5776_v11 = vld [vmem:[%s8366_s5 + $0x2b0] sm:$0xff]  }
 0x3a8   :  { %3955 = vmatprep.subr.bf16.mxu1 %v8526_v38 }
 0x3a9   :  { %3790 = vmatpush2.bf16.msra.mxu0 %v5735_v55  ;;  %v5777_v55 = vld [vmem:[%s8366_s5 + $0x2a8] sm:$0xff]  }
 0x3aa   :  { %3791 = vmatprep.subr.bf16.mxu0 %v8526_v38 }
 0x3ab   :  { %3956 = vmatpush2.bf16.msra.mxu1 %v5736_v18  ;;  %v5778_v18 = vld [vmem:[%s8366_s5 + $0x2a0] sm:$0xff]  }
 0x3ac   :  { %3957 = vmatprep.subr.bf16.mxu1 %v8526_v38 }
 0x3ad   :  { %3792 = vmatpush2.bf16.msra.mxu0 %v5737_v5  ;;  %v5779_v5 = vld [vmem:[%s8366_s5 + $0x308] sm:$0xff]  }
 0x3ae   :  { %3793 = vmatprep.subr.bf16.mxu0 %v8526_v38 }
 0x3af   :  { %3958 = vmatpush2.bf16.msra.mxu1 %v5738_v52  ;;  %v5780_v52 = vld [vmem:[%s8366_s5 + $0x300] sm:$0xff]  }
 0x3b0   :  { %3959 = vmatprep.subr.bf16.mxu1 %v8526_v38 }
 0x3b1   :  { %3794 = vmatpush2.bf16.msra.mxu0 %v5739_v4  ;;  %v5781_v4 = vld [vmem:[%s8366_s5 + $0x2f8] sm:$0xff]  }
 0x3b2   :  { %3795 = vmatprep.subr.bf16.mxu0 %v8526_v38 }
 0x3b3   :  { %3960 = vmatpush2.bf16.msra.mxu1 %v5740_v45  ;;  %v5782_v45 = vld [vmem:[%s8366_s5 + $0x2f0] sm:$0xff]  }
 0x3b4   :  { %3961 = vmatprep.subr.bf16.mxu1 %v8526_v38 }
 0x3b5   :  { %3796 = vmatpush2.bf16.msra.mxu0 %v5741_v41  ;;  %v4339_v41 = vpack.c.b16 %v8033_v23, %v8033_v23 }
 0x3b6   :  { %4097 = vmatprep.subr.bf16.mxu0 %v8526_v38 }
 0x3b7   :  { %3962 = vmatpush2.bf16.msra.mxu1 %v5742_v61  ;;  %v5788_v61 = vld [vmem:[%s8368_s7 + $0x20] sm:$0xff]  }
 0x3b8   :  { %3798 = vmatmul.mubr.bf16.vlgmr.msra.gmra.mxu0 %v3675_v30  ;;  %4263 = vmatprep.subr.bf16.mxu1 %v8526_v38 }
 0x3b9   :  { %4098 = vmatpush1.bf16.msra.mxu0 %v5743_v13  ;;  %5233 = vmatprep.mubr.msk.bf16.mxu0 %vm3462_vm4, %v4008_v46  ;;  %v5791_v46 = vld [vmem:[%s8368_s7 + $0x8] sm:$0xff]  }
 0x3ba   :  { %3964 = vmatmul.mubr.bf16.vlgmr.msra.gmra.mxu1 %v3841_v43  ;;  %4099 = vmatprep.subr.bf16.mxu0 %v8526_v38 }
 0x3bb   :  { %4264 = vmatpush1.bf16.msra.mxu1 %v5744_v63  ;;  %5276 = vmatprep.mubr.msk.bf16.mxu1 %vm3462_vm4, %v4174_v25  ;;  %v5792_v63 = vld [vmem:[%s8368_s7] sm:$0xff]  }
 0x3bc   :  { %4265 = vmatprep.subr.bf16.mxu1 %v8526_v38 }
 0x3bd   :  { %4100 = vmatpush1.bf16.msra.mxu0 %v5745_v56 }
 0x3be   :  { %4101 = vmatprep.subr.bf16.mxu0 %v8526_v38 }
 0x3bf   :  { %4266 = vmatpush1.bf16.msra.mxu1 %v5746_v8 }
 0x3c0   :  { %4267 = vmatprep.subr.bf16.mxu1 %v8526_v38 }
 0x3c1   :  { %4102 = vmatpush1.bf16.msra.mxu0 %v5747_v47 }
 0x3c2   :  { %4103 = vmatprep.subr.bf16.mxu0 %v8526_v38 }
 0x3c3   :  { %4268 = vmatpush1.bf16.msra.mxu1 %v5748_v35 }
 0x3c4   :  { %4269 = vmatprep.subr.bf16.mxu1 %v8526_v38 }
 0x3c5   :  { %4104 = vmatpush1.bf16.msra.mxu0 %v5749_v6 }
 0x3c6   :  { %4105 = vmatprep.subr.bf16.mxu0 %v8526_v38 }
 0x3c7   :  { %4270 = vmatpush1.bf16.msra.mxu1 %v5750_v0 }
 0x3c8   :  { %4271 = vmatprep.subr.bf16.mxu1 %v8526_v38 }
 0x3c9   :  { %4106 = vmatpush1.bf16.msra.mxu0 %v5751_v15 }
 0x3ca   :  { %4107 = vmatprep.subr.bf16.mxu0 %v8526_v38 }
 0x3cb   :  { %4272 = vmatpush1.bf16.msra.mxu1 %v5752_v34 }
 0x3cc   :  { %4273 = vmatprep.subr.bf16.mxu1 %v8526_v38 }
 0x3cd   :  { %4108 = vmatpush1.bf16.msra.mxu0 %v5753_v26 }
 0x3ce   :  { %4109 = vmatprep.subr.bf16.mxu0 %v8526_v38 }
 0x3cf   :  { %4274 = vmatpush1.bf16.msra.mxu1 %v5754_v1 }
 0x3d0   :  { %4275 = vmatprep.subr.bf16.mxu1 %v8526_v38 }
 0x3d1   :  { %4110 = vmatpush1.bf16.msra.mxu0 %v5755_v37 }
 0x3d2   :  { %4111 = vmatprep.subr.bf16.mxu0 %v8526_v38 }
 0x3d3   :  { %4276 = vmatpush1.bf16.msra.mxu1 %v5756_v2 }
 0x3d4   :  { %4277 = vmatprep.subr.bf16.mxu1 %v8526_v38 }
 0x3d5   :  { %4112 = vmatpush1.bf16.msra.mxu0 %v5757_v42 }
 0x3d6   :  { %4117 = vmatprep.subr.bf16.mxu0 %v8526_v38 }
 0x3d7   :  { %4278 = vmatpush1.bf16.msra.mxu1 %v5758_v27 }
 0x3d8   :  { %4283 = vmatprep.subr.bf16.mxu1 %v8526_v38 }
 0x3d9   :  { %4118 = vmatpush2.bf16.msra.mxu0 %v5759_v48 }
 0x3da   :  { %4119 = vmatprep.subr.bf16.mxu0 %v8526_v38 }
 0x3db   :  { %4284 = vmatpush2.bf16.msra.mxu1 %v5760_v62 }
 0x3dc   :  { %4285 = vmatprep.subr.bf16.mxu1 %v8526_v38 }
 0x3dd   :  { %4120 = vmatpush2.bf16.msra.mxu0 %v5761_v40 }
 0x3de   :  { %4121 = vmatprep.subr.bf16.mxu0 %v8526_v38 }
 0x3df   :  { %4286 = vmatpush2.bf16.msra.mxu1 %v5762_v7 }
 0x3e0   :  { %4287 = vmatprep.subr.bf16.mxu1 %v8526_v38 }
 0x3e1   :  { %4122 = vmatpush2.bf16.msra.mxu0 %v5763_v12 }
 0x3e2   :  { %4123 = vmatprep.subr.bf16.mxu0 %v8526_v38 }
 0x3e3   :  { %4288 = vmatpush2.bf16.msra.mxu1 %v5764_v20  ;;  %v5320_v20 = vld [vmem:[%s8367_s6] ss:$0 sm:$0xff]  ;;  %s5829_s6 = scalar_lea.vmem %s4599_s11, 32 }
 0x3e4   :  { %4289 = vmatprep.subr.bf16.mxu1 %v8526_v38  ;;  %p5830_p0 = scmp.ne.s32.totalorder %s4599_s11, %s5829_s6  ;;  %p5835_p2 = scmp.lt.s32.totalorder %s5829_s6, %s5829_s6 }
 0x3e5   :  { %4124 = vmatpush2.bf16.msra.mxu0 %v5765_v14 }
 0x3e6   :  { %4125 = vmatprep.subr.bf16.mxu0 %v8526_v38  ;;  %p5836_p3 = por %p5835_p2, %p5834_p1 }
 0x3e7   :  { %4290 = vmatpush2.bf16.msra.mxu1 %v5766_v51 }
 0x3e8   :  { %4291 = vmatprep.subr.bf16.mxu1 %v8526_v38  ;;  %p5837_p4 = pnand %p5836_p3, %p5830_p0 }
 0x3e9   :  { %4126 = vmatpush2.bf16.msra.mxu0 %v5767_v9 }
 0x3ea   :  { %4127 = vmatprep.subr.bf16.mxu0 %v8526_v38 }
 0x3eb   :  { %4292 = vmatpush2.bf16.msra.mxu1 %v5768_v17 }
 0x3ec   :  { %4293 = vmatprep.subr.bf16.mxu1 %v8526_v38 }
 0x3ed   :  { %4128 = vmatpush2.bf16.msra.mxu0 %v5769_v54 }
 0x3ee   :  { %4429 = vmatprep.subr.bf16.mxu0 %v8526_v38 }
 0x3ef   :  { %4294 = vmatpush2.bf16.msra.mxu1 %v5770_v59 }
 0x3f0   :  { %4130 = vmatmul.mubr.bf16.vlgmr.msra.gmra.mxu0 %v4007_v3  ;;  %5339 = vmatprep.subr.bf16.mxu1 %v8531_v39  ;;  %v5321_v3 = vld [vmem:[%s8369_s8] ss:$0 sm:$0xff] }
 0x3f1   :  { %4430 = vmatpush1.bf16.msra.mxu0 %v5771_v19  ;;  %5319 = vmatprep.mubr.msk.bf16.mxu0 %vm3462_vm4, %v4340_v49 }
 0x3f2   :  { %4296 = vmatmul.mubr.bf16.vlgmr.msra.gmra.mxu1 %v4173_v29  ;;  %4431 = vmatprep.subr.bf16.mxu0 %v8526_v38 }
 0x3f3   :  { %5340 = vmatpush3.bf16.msra.mxu1 %v5785_v53  ;;  %5355 = vmatprep.mubr.msk.bf16.mxu1 %vm5854_vm5, %v8531_v39 }
 0x3f4   :  { %5341 = vmatprep.subr.bf16.mxu1 %v8531_v39 }
 0x3f5   :  { %4432 = vmatpush1.bf16.msra.mxu0 %v5772_v60 }
 0x3f6   :  { %4433 = vmatprep.subr.bf16.mxu0 %v8526_v38 }
 0x3f7   :  { %5342 = vmatpush3.bf16.msra.mxu1 %v5786_v58 }
 0x3f8   :  { %5343 = vmatprep.subr.bf16.mxu1 %v8531_v39 }
 0x3f9   :  { %4434 = vmatpush1.bf16.msra.mxu0 %v5773_v31 }
 0x3fa   :  { %4435 = vmatprep.subr.bf16.mxu0 %v8526_v38 }
 0x3fd   :  { %4436 = vmatpush1.bf16.msra.mxu0 %v5774_v50 }
 0x3fe   :  { %4437 = vmatprep.subr.bf16.mxu0 %v8526_v38 }
 0x401   :  { %4438 = vmatpush1.bf16.msra.mxu0 %v5775_v36 }
 0x402   :  { %4439 = vmatprep.subr.bf16.mxu0 %v8526_v38 }
 0x405   :  { %4440 = vmatpush1.bf16.msra.mxu0 %v5776_v11 }
 0x406   :  { %4441 = vmatprep.subr.bf16.mxu0 %v8526_v38 }
 0x409   :  { %4442 = vmatpush1.bf16.msra.mxu0 %v5777_v55 }
 0x40a   :  { %4443 = vmatprep.subr.bf16.mxu0 %v8526_v38 }
 0x40d   :  { %4444 = vmatpush1.bf16.msra.mxu0 %v5778_v18 }
 0x40e   :  { %4449 = vmatprep.subr.bf16.mxu0 %v8526_v38 }
 0x411   :  { %4450 = vmatpush2.bf16.msra.mxu0 %v5779_v5 }
 0x412   :  { %4451 = vmatprep.subr.bf16.mxu0 %v8526_v38 }
 0x415   :  { %4452 = vmatpush2.bf16.msra.mxu0 %v5780_v52 }
 0x416   :  { %4453 = vmatprep.subr.bf16.mxu0 %v8526_v38 }
 0x419   :  { %4454 = vmatpush2.bf16.msra.mxu0 %v5781_v4 }
 0x41a   :  { %4455 = vmatprep.subr.bf16.mxu0 %v8526_v38 }
 0x41d   :  { %4456 = vmatpush2.bf16.msra.mxu0 %v5782_v45 }
 0x41e   :  { %4457 = vmatprep.subr.bf16.mxu0 %v8526_v38 }
 0x421   :  { %4458 = vmatpush2.bf16.msra.mxu0 %v5783_v57 }
 0x422   :  { %4459 = vmatprep.subr.bf16.mxu0 %v8526_v38  ;;  %v5787_v38 = vld [vmem:[%s8368_s7 + $0x28] sm:$0xff]  }
 0x423   :  { %5344 = vmatpush3.bf16.msra.mxu1 %v5787_v38 }
 0x424   :  { %5345 = vmatprep.subr.bf16.mxu1 %v8531_v39 }
 0x425   :  { %4460 = vmatpush2.bf16.msra.mxu0 %v5784_v32 }
 0x427   :  { %5346 = vmatpush3.bf16.msra.mxu1 %v5788_v61 }
 0x428   :  { %4462 = vmatmul.mubr.bf16.vlgmr.msra.gmra.mxu0 %v4339_v41  ;;  %5347 = vmatprep.subr.bf16.mxu1 %v8531_v39 }
 0x42b   :  { %5348 = vmatpush3.bf16.msra.mxu1 %v5789_v24 }
 0x42c   :  { %5349 = vmatprep.subr.bf16.mxu1 %v8531_v39 }
 0x42f   :  { %5350 = vmatpush3.bf16.msra.mxu1 %v5790_v22 }
 0x430   :  { %5351 = vmatprep.subr.bf16.mxu1 %v8531_v39 }
 0x433   :  { %5352 = vmatpush3.bf16.msra.mxu1 %v5791_v46 }
 0x434   :  { %5353 = vmatprep.subr.bf16.mxu1 %v8531_v39 }
 0x437   :  { %5354 = vmatpush3.bf16.msra.mxu1 %v5792_v63 }
 0x440   :  { %v3500_v23 = vpop.f32.mrf.mxu0 }
 0x442   :  { %v3502_v28 = vpop.f32.mrf.mxu0  ;;  %v3634_v21 = vpop.f32.mrf.mxu1 }
 0x443   :  { %v3635_v33 = vadd.f32 %v3634_v21, %v3500_v23 }
 0x444   :  { %v3503_v44 = vpop.f32.mrf.mxu0  ;;  %v3636_v10 = vpop.f32.mrf.mxu1 }
 0x446   :  { %v3504_v16 = vpop.f32.mrf.mxu0  ;;  %v3637_v13 = vpop.f32.mrf.mxu1 }
 0x448   :  { %v3638_v30 = vpop.f32.mrf.mxu1 }
 0x478   :  { %v3799_v43 = vpop.f32.mrf.mxu0 }
 0x479   :  { %v3805_v25 = vadd.f32 %v3799_v43, %v3635_v33 }
 0x47a   :  { %v3801_v56 = vpop.f32.mrf.mxu0  ;;  %v3965_v8 = vpop.f32.mrf.mxu1 }
 0x47b   :  { %v3971_v47 = vadd.f32 %v3965_v8, %v3805_v25 }
 0x47c   :  { %v3802_v35 = vpop.f32.mrf.mxu0  ;;  %v3967_v6 = vpop.f32.mrf.mxu1 }
 0x47e   :  { %v3803_v0 = vpop.f32.mrf.mxu0  ;;  %v3968_v15 = vpop.f32.mrf.mxu1 }
 0x480   :  { %v3969_v34 = vpop.f32.mrf.mxu1 }
 0x4b0   :  { %v4131_v26 = vpop.f32.mrf.mxu0 }
 0x4b1   :  { %v4137_v40 = vadd.f32 %v4131_v26, %v3971_v47 }
 0x4b2   :  { %v4133_v1 = vpop.f32.mrf.mxu0  ;;  %v4297_v37 = vpop.f32.mrf.mxu1 }
 0x4b3   :  { %v4303_v7 = vadd.f32 %v4297_v37, %v4137_v40 }
 0x4b4   :  { %v4134_v2 = vpop.f32.mrf.mxu0  ;;  %v4299_v42 = vpop.f32.mrf.mxu1 }
 0x4b6   :  { %v4135_v27 = vpop.f32.mrf.mxu0  ;;  %v4300_v48 = vpop.f32.mrf.mxu1 }
 0x4b8   :  { %v4301_v62 = vpop.f32.mrf.mxu1 }
 0x4e8   :  { %v4463_v12 = vpop.f32.mrf.mxu0 }
 0x4e9   :  { %v4469_v14 = vadd.f32 %v4463_v12, %v4303_v7 }
 0x4ea   :  { %v4465_v51 = vpop.f32.mrf.mxu0 }
 0x4eb   :  { %v4477_v9 = vadd.f32 %v5320_v20, %v4469_v14 }
 0x4ec   :  { %v4466_v17 = vpop.f32.mrf.mxu0 }
 0x4ed   :  { %v4478_v54 = vmax.f32 %v4477_v9, 0.0 }
 0x4ee   :  { %v4467_v59 = vpop.f32.mrf.mxu0 }
 0x4ef   :  { %v4479_v19 = vpack.c.bf16 %v4478_v54, %v4478_v54 }
 0x4f1   :  { %5356 = vmatmul.mubr.bf16.vlgmr.msra.gmra.mxu1 %v4479_v19 }
 0x5b1   :  { %v4585_v49 = vpop.f32.mrf.mxu1 }
 0x5b2   :  { %v4586_v29 = vadd.f32 %v5321_v3, %v4585_v49 }
 0x5b3   :  { %v5357_v39 = vpop.f32.mrf.mxu1 }
 0x5b4   :  { %4591 = vst [vmem:[#allocation3] sm:$0x3] %v4586_v29 }
 0x5b5   :  { %v4588_v60 = vpop.f32.mrf.mxu1 }
 0x5b6   :  { %5840 = shalt.err (!%p5837_p4)
}
 0x5b7   :  { %4601 = dma.vmem_to_hbm [thread:$0]  %s4599_s11, 32, %s8370_s9, [#allocation4]   ;;  %v5358_v31 = vpop.f32.mrf.mxu1 }
 0x5b8   :  { %5849 = dma.done.wait [#allocation4], 32  }
 0x5b9   :  { %5850 = vsyncadd [#allocation4], 4294967264 }
 0x5ba   :  { %4605 = vsyncpa [#allocation4], 1 }

</bundles_post_ra>
